<compile_context>
chip_gen: v7x
topology: tpu7x:2x2x1
jax: 0.10.0
libtpu: 0.0.40
codegen_flags: <defaults>
</compile_context>

<pallas_src>
import functools

import jax
import jax.numpy as jnp
import numpy as np
from jax import lax
from jax.experimental import pallas as pl
from jax.experimental.pallas import tpu as pltpu


def _round_up(n, m):
    return (n + m - 1) // m * m


def lstm_stack_kernel(x_ref, wih_ref, whh_ref, b_ref, wlog_ref, blog_ref,
                      out_ref, seq_ref, gates_ref, *, num_layers):
    """LSTM stack + output projection for one (padded) sequence.

    x_ref:     (T, Bp, Hp)       time-major embedded inputs (zero padded)
    wih_ref:   (L, Hp, 4Hp)      input->gates weights, gate order (i,f,o,g)
    whh_ref:   (L, Hp, 4Hp)      hidden->gates weights, gate order (i,f,o,g)
    b_ref:     (L, 1, 4Hp)       b_ih + b_hh, gate order (i,f,o,g)
    wlog_ref:  (Hp, Vp)          logits weight (pre-transposed, padded)
    blog_ref:  (1, Vp)
    out_ref:   (T, Bp, Vp)
    seq_ref:   (T, Bp, Hp)       scratch: current layer's hidden sequence
    gates_ref: (T, Bp, 4Hp)      scratch: hoisted input-gate projections
    """
    T, B, H = x_ref.shape          # B, H already padded to (8, 128) multiples
    V = out_ref.shape[-1]

    for layer in range(num_layers):                 # static unroll over layers
        # Layer 0 reads the embeddings directly; later layers read the previous
        # layer's output from seq_ref (no full-sequence copy needed).
        src_ref = x_ref if layer == 0 else seq_ref

        # Hoisted input projection + bias: one large MXU matmul per layer
        # instead of T tiny ones on the serial critical path.
        xin = src_ref[...].reshape(T * B, H)
        gates_ref[...] = (
            jnp.dot(xin, wih_ref[layer], preferred_element_type=jnp.float32)
            + b_ref[layer]).reshape(T, B, 4 * H)

        whh = whh_ref[layer]                        # (Hp, 4Hp)

        def step(t, carry):
            h, c = carry
            gates = gates_ref[t] + jnp.dot(h, whh,
                                           preferred_element_type=jnp.float32)
            # Gate order (i, f, o, g): sigmoid over the first 3H lanes,
            # tanh over the last H lanes -> 2 EUP pushes per timestep.
            sig = jax.nn.sigmoid(gates[:, :3 * H])
            i = sig[:, 0 * H:1 * H]
            f = sig[:, 1 * H:2 * H]
            o = sig[:, 2 * H:3 * H]
            g = jnp.tanh(gates[:, 3 * H:])
            c_new = f * c + i * g
            h_new = o * jnp.tanh(c_new)
            seq_ref[t] = h_new                      # layer output, in place
            return (h_new, c_new)

        h0 = jnp.zeros((B, H), jnp.float32)
        c0 = jnp.zeros((B, H), jnp.float32)
        lax.fori_loop(0, T, step, (h0, c0), unroll=True)

    # Output projection as a single 2-D matmul; Vp is a multiple of 128 so the
    # final store is lane-dense (no masked partial stores).
    seq = seq_ref[...].reshape(T * B, H)
    logits = jnp.dot(seq, wlog_ref[...],
                     preferred_element_type=jnp.float32) + blog_ref[...]
    out_ref[...] = logits.reshape(T, B, V)


def prepare_kernel_params(params, *, hidden_size, vocab_size, num_layers):
    """Pad / reorder PyTorch-layout params into the kernel layout.

    - H and V padded to multiples of 128 (lane dim); zero padding of the
      hidden dim is exact for an LSTM (padded channels get g = tanh(0) = 0,
      so c and h stay 0 forever),
    - gates reordered from PyTorch (i, f, g, o) to kernel (i, f, o, g),
    - weights pre-transposed so the kernel computes x @ W,
    - the two LSTM biases are pre-summed.
    """
    H, V, L = hidden_size, vocab_size, num_layers
    Hp = _round_up(H, 128)
    Vp = _round_up(V, 128)

    def reorder_pad_gates(w):
        # w: (4H, ...) in (i, f, g, o) -> (4Hp, ...) in (i, f, o, g).
        i, f, g, o = (w[k * H:(k + 1) * H] for k in range(4))
        pad = [(0, Hp - H)] + [(0, 0)] * (w.ndim - 1)
        return jnp.concatenate([jnp.pad(x, pad) for x in (i, f, o, g)], axis=0)

    w_ih, w_hh, b = [], [], []
    for l in range(L):
        wi = jnp.pad(params["w_ih"][l], ((0, 0), (0, Hp - H)))      # (4H, Hp)
        wh = jnp.pad(params["w_hh"][l], ((0, 0), (0, Hp - H)))      # (4H, Hp)
        w_ih.append(reorder_pad_gates(wi).T)                        # (Hp, 4Hp)
        w_hh.append(reorder_pad_gates(wh).T)                        # (Hp, 4Hp)
        b.append(reorder_pad_gates(params["b_ih"][l]
                                   + params["b_hh"][l])[None, :])   # (1, 4Hp)

    wlog = jnp.pad(params["logits_w"], ((0, Vp - V), (0, Hp - H))).T  # (Hp, Vp)
    blog = jnp.pad(params["logits_b"], (0, Vp - V))[None, :]          # (1, Vp)
    emb = jnp.pad(params["embedding"], ((0, 0), (0, Hp - H)))         # (V, Hp)

    kernel_params = {
        "embedding": emb,
        "w_ih": jnp.stack(w_ih),      # (L, Hp, 4Hp)
        "w_hh": jnp.stack(w_hh),      # (L, Hp, 4Hp)
        "b": jnp.stack(b),            # (L, 1, 4Hp)
        "logits_w": wlog,             # (Hp, Vp)
        "logits_b": blog,             # (1, Vp)
    }
    return kernel_params, Hp, Vp


def model_forward(tokens, params, *, hidden_size, vocab_size, num_layers):
    """tokens: (B, T) int32. Returns logits (B, T, V) float32 (PyTorch layout)."""
    B, T = tokens.shape
    kp, Hp, Vp = prepare_kernel_params(params, hidden_size=hidden_size,
                                       vocab_size=vocab_size,
                                       num_layers=num_layers)
    Bp = _round_up(B, 8)
    L = num_layers

    # Embedding gather directly into time-major layout (no separate transpose
    # pass over a (B,T,H) array), then pad the batch to the f32 sublane (8).
    x = jnp.take(kp["embedding"], tokens.T, axis=0)          # (T, B, Hp)
    x = jnp.pad(x, ((0, 0), (0, Bp - B), (0, 0)))            # (T, Bp, Hp)

    # Explicit VMEM budget sized from the actual resident footprint.
    shapes = [(T, Bp, Hp), (L, Hp, 4 * Hp), (L, Hp, 4 * Hp), (L, 1, 4 * Hp),
              (Hp, Vp), (1, Vp), (T, Bp, Vp),
              (T, Bp, Hp), (T, Bp, 4 * Hp)]
    footprint = sum(int(np.prod(s)) * 4 for s in shapes)
    vmem_limit = int(min(64 * 2**20, max(32 * 2**20, 2 * footprint)))

    vmem = pl.BlockSpec(memory_space=pltpu.MemorySpace.VMEM)
    out_tbv = pl.pallas_call(
        functools.partial(lstm_stack_kernel, num_layers=num_layers),
        out_shape=jax.ShapeDtypeStruct((T, Bp, Vp), jnp.float32),
        in_specs=[vmem] * 6,
        out_specs=vmem,
        scratch_shapes=[pltpu.VMEM((T, Bp, Hp), jnp.float32),
                        pltpu.VMEM((T, Bp, 4 * Hp), jnp.float32)],
        compiler_params=pltpu.CompilerParams(vmem_limit_bytes=vmem_limit),
    )(x, kp["w_ih"], kp["w_hh"], kp["b"], kp["logits_w"], kp["logits_b"])

    # Strip padding, back to PyTorch (B, T, V).
    return jnp.transpose(out_tbv[:, :B, :vocab_size], (1, 0, 2))


def init_params(key, vocab_size, hidden_size, num_layers):
    """Deterministic init matching PyTorch parameter shapes/layout."""
    H, V, L = hidden_size, vocab_size, num_layers
    bound = 1.0 / np.sqrt(H)
    keys = jax.random.split(key, 4 * L + 3)
    u = lambda k, shape: jax.random.uniform(k, shape, jnp.float32, -bound, bound)

    embedding = jax.random.normal(keys[0], (V, H), jnp.float32)  # like nn.Embedding
    w_ih = jnp.stack([u(keys[1 + 4 * l + 0], (4 * H, H)) for l in range(L)])
    w_hh = jnp.stack([u(keys[1 + 4 * l + 1], (4 * H, H)) for l in range(L)])
    b_ih = jnp.stack([u(keys[1 + 4 * l + 2], (4 * H,)) for l in range(L)])
    b_hh = jnp.stack([u(keys[1 + 4 * l + 3], (4 * H,)) for l in range(L)])
    logits_w = u(keys[-2], (V, H))
    logits_b = u(keys[-1], (V,))
    return {
        "embedding": embedding,
        "w_ih": w_ih,          # (L, 4H, H), PyTorch gate order (i, f, g, o)
        "w_hh": w_hh,          # (L, 4H, H)
        "b_ih": b_ih,          # (L, 4H)
        "b_hh": b_hh,          # (L, 4H)
        "logits_w": logits_w,  # (V, H)
        "logits_b": logits_b,  # (V,)
    }


def reference_forward(tokens, params, *, num_layers):
    """Pure-JAX reference with PyTorch LSTM semantics (gate order i, f, g, o)."""
    x = jnp.take(params["embedding"], tokens, axis=0)        # (B, T, H)
    B, T, H = x.shape
    seq = x
    for l in range(num_layers):
        wih, whh = params["w_ih"][l], params["w_hh"][l]
        bias = params["b_ih"][l] + params["b_hh"][l]
        h = jnp.zeros((B, H), jnp.float32)
        c = jnp.zeros((B, H), jnp.float32)
        outs = []
        for t in range(T):
            gates = seq[:, t, :] @ wih.T + h @ whh.T + bias
            i = jax.nn.sigmoid(gates[:, 0 * H:1 * H])
            f = jax.nn.sigmoid(gates[:, 1 * H:2 * H])
            g = jnp.tanh(gates[:, 2 * H:3 * H])
            o = jax.nn.sigmoid(gates[:, 3 * H:4 * H])
            c = f * c + i * g
            h = o * jnp.tanh(c)
            outs.append(h)
        seq = jnp.stack(outs, axis=1)
    return seq @ params["logits_w"].T + params["logits_b"]


if __name__ == "__main__":
    VOCAB, HIDDEN, LAYERS = 16, 32, 2
    BATCH, SEQ = 2, 8

    key = jax.random.PRNGKey(0)
    pkey, tkey = jax.random.split(key)
    params = init_params(pkey, VOCAB, HIDDEN, LAYERS)
    tokens = jax.random.randint(tkey, (BATCH, SEQ), 0, VOCAB, dtype=jnp.int32)

    logits = jax.block_until_ready(
        model_forward(tokens, params, hidden_size=HIDDEN, vocab_size=VOCAB,
                      num_layers=LAYERS))

    assert logits.shape == (BATCH, SEQ, VOCAB), logits.shape
    ref = reference_forward(tokens, params, num_layers=LAYERS)
    np.testing.assert_allclose(np.asarray(logits), np.asarray(ref),
                               rtol=1e-4, atol=1e-4)
    print("KERNEL_OK")
</pallas_src>

<mosaic_0001>
module attributes {stable_mosaic.version = 11 : i64} {
  func.func @lstm_stack_kernel(%arg0: memref<8x8x128xf32, #tpu.memory_space<vmem>>, %arg1: memref<2x128x512xf32, #tpu.memory_space<vmem>>, %arg2: memref<2x128x512xf32, #tpu.memory_space<vmem>>, %arg3: memref<2x1x512xf32, #tpu.memory_space<vmem>>, %arg4: memref<128x128xf32, #tpu.memory_space<vmem>>, %arg5: memref<1x128xf32, #tpu.memory_space<vmem>>, %arg6: memref<8x8x128xf32, #tpu.memory_space<vmem>>, %arg7: memref<8x8x128xf32, #tpu.memory_space<vmem>>, %arg8: memref<8x8x512xf32, #tpu.memory_space<vmem>>) attributes {dimension_semantics = [], scalar_prefetch = 0 : i64, scratch_operands = 2 : i64, tpu.core_type = #tpu.core_type<tc>} {
    %c0 = arith.constant 0 : index
    %c0_0 = arith.constant 0 : index
    %c0_1 = arith.constant 0 : index
    %0 = vector.load %arg0[%c0, %c0_0, %c0_1] : memref<8x8x128xf32, #tpu.memory_space<vmem>>, vector<8x8x128xf32>
    %1 = vector.shape_cast %0 : vector<8x8x128xf32> to vector<64x128xf32>
    %c0_2 = arith.constant 0 : index
    %c0_3 = arith.constant 0 : index
    %c0_4 = arith.constant 0 : index
    %2 = vector.load %arg1[%c0_2, %c0_3, %c0_4] : memref<2x128x512xf32, #tpu.memory_space<vmem>>, vector<1x128x512xf32>
    %3 = vector.shape_cast %2 : vector<1x128x512xf32> to vector<128x512xf32>
    %cst = arith.constant dense<0.000000e+00> : vector<64x512xf32>
    %4 = tpu.matmul %1, %3, %cst {dimension_numbers = #tpu.dot_dimension_numbers<[1], [0], [0], [1], [0, 0, 1, 1], [], []>} : vector<64x128xf32>, vector<128x512xf32>, vector<64x512xf32> -> vector<64x512xf32>
    %c0_5 = arith.constant 0 : index
    %c0_6 = arith.constant 0 : index
    %c0_7 = arith.constant 0 : index
    %5 = vector.load %arg3[%c0_5, %c0_6, %c0_7] : memref<2x1x512xf32, #tpu.memory_space<vmem>>, vector<1x1x512xf32>
    %6 = vector.shape_cast %5 : vector<1x1x512xf32> to vector<1x512xf32>
    %7 = vector.broadcast %6 : vector<1x512xf32> to vector<64x512xf32>
    %8 = arith.addf %4, %7 : vector<64x512xf32>
    %9 = vector.shape_cast %8 : vector<64x512xf32> to vector<8x8x512xf32>
    %c0_8 = arith.constant 0 : index
    %c0_9 = arith.constant 0 : index
    %c0_10 = arith.constant 0 : index
    %10 = vector.load %arg8[%c0_8, %c0_9, %c0_10] : memref<8x8x512xf32, #tpu.memory_space<vmem>>, vector<8x8x512xf32>
    tpu.vector_store %arg8[%c0_8, %c0_9, %c0_10], %9 {strides = array<i32>} : memref<8x8x512xf32, #tpu.memory_space<vmem>>, vector<8x8x512xf32>,
    %c0_11 = arith.constant 0 : index
    %c0_12 = arith.constant 0 : index
    %c0_13 = arith.constant 0 : index
    %11 = vector.load %arg2[%c0_11, %c0_12, %c0_13] : memref<2x128x512xf32, #tpu.memory_space<vmem>>, vector<1x128x512xf32>
    %12 = vector.shape_cast %11 : vector<1x128x512xf32> to vector<128x512xf32>
    %cst_14 = arith.constant 0.000000e+00 : f32
    %13 = vector.broadcast %cst_14 : f32 to vector<8x128xf32>
    %cst_15 = arith.constant 0.000000e+00 : f32
    %14 = vector.broadcast %cst_15 : f32 to vector<8x128xf32>
    %c0_i32 = arith.constant 0 : i32
    %15 = arith.index_cast %c0_i32 : i32 to index
    %c0_16 = arith.constant 0 : index
    %c0_17 = arith.constant 0 : index
    %16 = vector.load %arg8[%15, %c0_16, %c0_17] : memref<8x8x512xf32, #tpu.memory_space<vmem>>, vector<1x8x512xf32>
    %17 = vector.shape_cast %16 : vector<1x8x512xf32> to vector<8x512xf32>
    %cst_18 = arith.constant dense<0.000000e+00> : vector<8x512xf32>
    %18 = tpu.matmul %13, %12, %cst_18 {dimension_numbers = #tpu.dot_dimension_numbers<[1], [0], [0], [1], [0, 0, 1, 1], [], []>} : vector<8x128xf32>, vector<128x512xf32>, vector<8x512xf32> -> vector<8x512xf32>
    %19 = arith.addf %17, %18 : vector<8x512xf32>
    %20 = vector.extract_strided_slice %19 {offsets = [0, 0], sizes = [8, 384], strides = [1, 1]} : vector<8x512xf32> to vector<8x384xf32>
    %21 = arith.negf %20 : vector<8x384xf32>
    %22 = math.exp %21 : vector<8x384xf32>
    %cst_19 = arith.constant 1.000000e+00 : f32
    %23 = vector.broadcast %cst_19 : f32 to vector<8x384xf32>
    %24 = arith.addf %23, %22 : vector<8x384xf32>
    %25 = arith.divf %23, %24 : vector<8x384xf32>
    %26 = vector.extract_strided_slice %25 {offsets = [0, 0], sizes = [8, 128], strides = [1, 1]} : vector<8x384xf32> to vector<8x128xf32>
    %27 = vector.extract_strided_slice %25 {offsets = [0, 128], sizes = [8, 128], strides = [1, 1]} : vector<8x384xf32> to vector<8x128xf32>
    %28 = vector.extract_strided_slice %25 {offsets = [0, 256], sizes = [8, 128], strides = [1, 1]} : vector<8x384xf32> to vector<8x128xf32>
    %29 = vector.extract_strided_slice %19 {offsets = [0, 384], sizes = [8, 128], strides = [1, 1]} : vector<8x512xf32> to vector<8x128xf32>
    %30 = math.tanh %29 : vector<8x128xf32>
    %31 = arith.mulf %27, %14 : vector<8x128xf32>
    %32 = arith.mulf %26, %30 : vector<8x128xf32>
    %33 = arith.addf %31, %32 : vector<8x128xf32>
    %34 = math.tanh %33 : vector<8x128xf32>
    %35 = arith.mulf %28, %34 : vector<8x128xf32>
    %36 = arith.index_cast %c0_i32 : i32 to index
    %c0_20 = arith.constant 0 : index
    %c0_21 = arith.constant 0 : index
    %37 = vector.load %arg7[%36, %c0_20, %c0_21] : memref<8x8x128xf32, #tpu.memory_space<vmem>>, vector<1x8x128xf32>
    %38 = vector.shape_cast %37 : vector<1x8x128xf32> to vector<8x128xf32>
    %39 = vector.shape_cast %35 : vector<8x128xf32> to vector<1x8x128xf32>
    tpu.vector_store %arg7[%36, %c0_20, %c0_21], %39 {strides = array<i32>} : memref<8x8x128xf32, #tpu.memory_space<vmem>>, vector<1x8x128xf32>,
    %c1_i32 = arith.constant 1 : i32
    %40 = arith.index_cast %c1_i32 : i32 to index
    %c0_22 = arith.constant 0 : index
    %c0_23 = arith.constant 0 : index
    %41 = vector.load %arg8[%40, %c0_22, %c0_23] : memref<8x8x512xf32, #tpu.memory_space<vmem>>, vector<1x8x512xf32>
    %42 = vector.shape_cast %41 : vector<1x8x512xf32> to vector<8x512xf32>
    %cst_24 = arith.constant dense<0.000000e+00> : vector<8x512xf32>
    %43 = tpu.matmul %35, %12, %cst_24 {dimension_numbers = #tpu.dot_dimension_numbers<[1], [0], [0], [1], [0, 0, 1, 1], [], []>} : vector<8x128xf32>, vector<128x512xf32>, vector<8x512xf32> -> vector<8x512xf32>
    %44 = arith.addf %42, %43 : vector<8x512xf32>
    %45 = vector.extract_strided_slice %44 {offsets = [0, 0], sizes = [8, 384], strides = [1, 1]} : vector<8x512xf32> to vector<8x384xf32>
    %46 = arith.negf %45 : vector<8x384xf32>
    %47 = math.exp %46 : vector<8x384xf32>
    %cst_25 = arith.constant 1.000000e+00 : f32
    %48 = vector.broadcast %cst_25 : f32 to vector<8x384xf32>
    %49 = arith.addf %48, %47 : vector<8x384xf32>
    %50 = arith.divf %48, %49 : vector<8x384xf32>
    %51 = vector.extract_strided_slice %50 {offsets = [0, 0], sizes = [8, 128], strides = [1, 1]} : vector<8x384xf32> to vector<8x128xf32>
    %52 = vector.extract_strided_slice %50 {offsets = [0, 128], sizes = [8, 128], strides = [1, 1]} : vector<8x384xf32> to vector<8x128xf32>
    %53 = vector.extract_strided_slice %50 {offsets = [0, 256], sizes = [8, 128], strides = [1, 1]} : vector<8x384xf32> to vector<8x128xf32>
    %54 = vector.extract_strided_slice %44 {offsets = [0, 384], sizes = [8, 128], strides = [1, 1]} : vector<8x512xf32> to vector<8x128xf32>
    %55 = math.tanh %54 : vector<8x128xf32>
    %56 = arith.mulf %52, %33 : vector<8x128xf32>
    %57 = arith.mulf %51, %55 : vector<8x128xf32>
    %58 = arith.addf %56, %57 : vector<8x128xf32>
    %59 = math.tanh %58 : vector<8x128xf32>
    %60 = arith.mulf %53, %59 : vector<8x128xf32>
    %61 = arith.index_cast %c1_i32 : i32 to index
    %c0_26 = arith.constant 0 : index
    %c0_27 = arith.constant 0 : index
    %62 = vector.load %arg7[%61, %c0_26, %c0_27] : memref<8x8x128xf32, #tpu.memory_space<vmem>>, vector<1x8x128xf32>
    %63 = vector.shape_cast %62 : vector<1x8x128xf32> to vector<8x128xf32>
    %64 = vector.shape_cast %60 : vector<8x128xf32> to vector<1x8x128xf32>
    tpu.vector_store %arg7[%61, %c0_26, %c0_27], %64 {strides = array<i32>} : memref<8x8x128xf32, #tpu.memory_space<vmem>>, vector<1x8x128xf32>,
    %c2_i32 = arith.constant 2 : i32
    %65 = arith.index_cast %c2_i32 : i32 to index
    %c0_28 = arith.constant 0 : index
    %c0_29 = arith.constant 0 : index
    %66 = vector.load %arg8[%65, %c0_28, %c0_29] : memref<8x8x512xf32, #tpu.memory_space<vmem>>, vector<1x8x512xf32>
    %67 = vector.shape_cast %66 : vector<1x8x512xf32> to vector<8x512xf32>
    %cst_30 = arith.constant dense<0.000000e+00> : vector<8x512xf32>
    %68 = tpu.matmul %60, %12, %cst_30 {dimension_numbers = #tpu.dot_dimension_numbers<[1], [0], [0], [1], [0, 0, 1, 1], [], []>} : vector<8x128xf32>, vector<128x512xf32>, vector<8x512xf32> -> vector<8x512xf32>
    %69 = arith.addf %67, %68 : vector<8x512xf32>
    %70 = vector.extract_strided_slice %69 {offsets = [0, 0], sizes = [8, 384], strides = [1, 1]} : vector<8x512xf32> to vector<8x384xf32>
    %71 = arith.negf %70 : vector<8x384xf32>
    %72 = math.exp %71 : vector<8x384xf32>
    %cst_31 = arith.constant 1.000000e+00 : f32
    %73 = vector.broadcast %cst_31 : f32 to vector<8x384xf32>
    %74 = arith.addf %73, %72 : vector<8x384xf32>
    %75 = arith.divf %73, %74 : vector<8x384xf32>
    %76 = vector.extract_strided_slice %75 {offsets = [0, 0], sizes = [8, 128], strides = [1, 1]} : vector<8x384xf32> to vector<8x128xf32>
    %77 = vector.extract_strided_slice %75 {offsets = [0, 128], sizes = [8, 128], strides = [1, 1]} : vector<8x384xf32> to vector<8x128xf32>
    %78 = vector.extract_strided_slice %75 {offsets = [0, 256], sizes = [8, 128], strides = [1, 1]} : vector<8x384xf32> to vector<8x128xf32>
    %79 = vector.extract_strided_slice %69 {offsets = [0, 384], sizes = [8, 128], strides = [1, 1]} : vector<8x512xf32> to vector<8x128xf32>
    %80 = math.tanh %79 : vector<8x128xf32>
    %81 = arith.mulf %77, %58 : vector<8x128xf32>
    %82 = arith.mulf %76, %80 : vector<8x128xf32>
    %83 = arith.addf %81, %82 : vector<8x128xf32>
    %84 = math.tanh %83 : vector<8x128xf32>
    %85 = arith.mulf %78, %84 : vector<8x128xf32>
    %86 = arith.index_cast %c2_i32 : i32 to index
    %c0_32 = arith.constant 0 : index
    %c0_33 = arith.constant 0 : index
    %87 = vector.load %arg7[%86, %c0_32, %c0_33] : memref<8x8x128xf32, #tpu.memory_space<vmem>>, vector<1x8x128xf32>
    %88 = vector.shape_cast %87 : vector<1x8x128xf32> to vector<8x128xf32>
    %89 = vector.shape_cast %85 : vector<8x128xf32> to vector<1x8x128xf32>
    tpu.vector_store %arg7[%86, %c0_32, %c0_33], %89 {strides = array<i32>} : memref<8x8x128xf32, #tpu.memory_space<vmem>>, vector<1x8x128xf32>,
    %c3_i32 = arith.constant 3 : i32
    %90 = arith.index_cast %c3_i32 : i32 to index
    %c0_34 = arith.constant 0 : index
    %c0_35 = arith.constant 0 : index
    %91 = vector.load %arg8[%90, %c0_34, %c0_35] : memref<8x8x512xf32, #tpu.memory_space<vmem>>, vector<1x8x512xf32>
    %92 = vector.shape_cast %91 : vector<1x8x512xf32> to vector<8x512xf32>
    %cst_36 = arith.constant dense<0.000000e+00> : vector<8x512xf32>
    %93 = tpu.matmul %85, %12, %cst_36 {dimension_numbers = #tpu.dot_dimension_numbers<[1], [0], [0], [1], [0, 0, 1, 1], [], []>} : vector<8x128xf32>, vector<128x512xf32>, vector<8x512xf32> -> vector<8x512xf32>
    %94 = arith.addf %92, %93 : vector<8x512xf32>
    %95 = vector.extract_strided_slice %94 {offsets = [0, 0], sizes = [8, 384], strides = [1, 1]} : vector<8x512xf32> to vector<8x384xf32>
    %96 = arith.negf %95 : vector<8x384xf32>
    %97 = math.exp %96 : vector<8x384xf32>
    %cst_37 = arith.constant 1.000000e+00 : f32
    %98 = vector.broadcast %cst_37 : f32 to vector<8x384xf32>
    %99 = arith.addf %98, %97 : vector<8x384xf32>
    %100 = arith.divf %98, %99 : vector<8x384xf32>
    %101 = vector.extract_strided_slice %100 {offsets = [0, 0], sizes = [8, 128], strides = [1, 1]} : vector<8x384xf32> to vector<8x128xf32>
    %102 = vector.extract_strided_slice %100 {offsets = [0, 128], sizes = [8, 128], strides = [1, 1]} : vector<8x384xf32> to vector<8x128xf32>
    %103 = vector.extract_strided_slice %100 {offsets = [0, 256], sizes = [8, 128], strides = [1, 1]} : vector<8x384xf32> to vector<8x128xf32>
    %104 = vector.extract_strided_slice %94 {offsets = [0, 384], sizes = [8, 128], strides = [1, 1]} : vector<8x512xf32> to vector<8x128xf32>
    %105 = math.tanh %104 : vector<8x128xf32>
    %106 = arith.mulf %102, %83 : vector<8x128xf32>
    %107 = arith.mulf %101, %105 : vector<8x128xf32>
    %108 = arith.addf %106, %107 : vector<8x128xf32>
    %109 = math.tanh %108 : vector<8x128xf32>
    %110 = arith.mulf %103, %109 : vector<8x128xf32>
    %111 = arith.index_cast %c3_i32 : i32 to index
    %c0_38 = arith.constant 0 : index
    %c0_39 = arith.constant 0 : index
    %112 = vector.load %arg7[%111, %c0_38, %c0_39] : memref<8x8x128xf32, #tpu.memory_space<vmem>>, vector<1x8x128xf32>
    %113 = vector.shape_cast %112 : vector<1x8x128xf32> to vector<8x128xf32>
    %114 = vector.shape_cast %110 : vector<8x128xf32> to vector<1x8x128xf32>
    tpu.vector_store %arg7[%111, %c0_38, %c0_39], %114 {strides = array<i32>} : memref<8x8x128xf32, #tpu.memory_space<vmem>>, vector<1x8x128xf32>,
    %c4_i32 = arith.constant 4 : i32
    %115 = arith.index_cast %c4_i32 : i32 to index
    %c0_40 = arith.constant 0 : index
    %c0_41 = arith.constant 0 : index
    %116 = vector.load %arg8[%115, %c0_40, %c0_41] : memref<8x8x512xf32, #tpu.memory_space<vmem>>, vector<1x8x512xf32>
    %117 = vector.shape_cast %116 : vector<1x8x512xf32> to vector<8x512xf32>
    %cst_42 = arith.constant dense<0.000000e+00> : vector<8x512xf32>
    %118 = tpu.matmul %110, %12, %cst_42 {dimension_numbers = #tpu.dot_dimension_numbers<[1], [0], [0], [1], [0, 0, 1, 1], [], []>} : vector<8x128xf32>, vector<128x512xf32>, vector<8x512xf32> -> vector<8x512xf32>
    %119 = arith.addf %117, %118 : vector<8x512xf32>
    %120 = vector.extract_strided_slice %119 {offsets = [0, 0], sizes = [8, 384], strides = [1, 1]} : vector<8x512xf32> to vector<8x384xf32>
    %121 = arith.negf %120 : vector<8x384xf32>
    %122 = math.exp %121 : vector<8x384xf32>
    %cst_43 = arith.constant 1.000000e+00 : f32
    %123 = vector.broadcast %cst_43 : f32 to vector<8x384xf32>
    %124 = arith.addf %123, %122 : vector<8x384xf32>
    %125 = arith.divf %123, %124 : vector<8x384xf32>
    %126 = vector.extract_strided_slice %125 {offsets = [0, 0], sizes = [8, 128], strides = [1, 1]} : vector<8x384xf32> to vector<8x128xf32>
    %127 = vector.extract_strided_slice %125 {offsets = [0, 128], sizes = [8, 128], strides = [1, 1]} : vector<8x384xf32> to vector<8x128xf32>
    %128 = vector.extract_strided_slice %125 {offsets = [0, 256], sizes = [8, 128], strides = [1, 1]} : vector<8x384xf32> to vector<8x128xf32>
    %129 = vector.extract_strided_slice %119 {offsets = [0, 384], sizes = [8, 128], strides = [1, 1]} : vector<8x512xf32> to vector<8x128xf32>
    %130 = math.tanh %129 : vector<8x128xf32>
    %131 = arith.mulf %127, %108 : vector<8x128xf32>
    %132 = arith.mulf %126, %130 : vector<8x128xf32>
    %133 = arith.addf %131, %132 : vector<8x128xf32>
    %134 = math.tanh %133 : vector<8x128xf32>
    %135 = arith.mulf %128, %134 : vector<8x128xf32>
    %136 = arith.index_cast %c4_i32 : i32 to index
    %c0_44 = arith.constant 0 : index
    %c0_45 = arith.constant 0 : index
    %137 = vector.load %arg7[%136, %c0_44, %c0_45] : memref<8x8x128xf32, #tpu.memory_space<vmem>>, vector<1x8x128xf32>
    %138 = vector.shape_cast %137 : vector<1x8x128xf32> to vector<8x128xf32>
    %139 = vector.shape_cast %135 : vector<8x128xf32> to vector<1x8x128xf32>
    tpu.vector_store %arg7[%136, %c0_44, %c0_45], %139 {strides = array<i32>} : memref<8x8x128xf32, #tpu.memory_space<vmem>>, vector<1x8x128xf32>,
    %c5_i32 = arith.constant 5 : i32
    %140 = arith.index_cast %c5_i32 : i32 to index
    %c0_46 = arith.constant 0 : index
    %c0_47 = arith.constant 0 : index
    %141 = vector.load %arg8[%140, %c0_46, %c0_47] : memref<8x8x512xf32, #tpu.memory_space<vmem>>, vector<1x8x512xf32>
    %142 = vector.shape_cast %141 : vector<1x8x512xf32> to vector<8x512xf32>
    %cst_48 = arith.constant dense<0.000000e+00> : vector<8x512xf32>
    %143 = tpu.matmul %135, %12, %cst_48 {dimension_numbers = #tpu.dot_dimension_numbers<[1], [0], [0], [1], [0, 0, 1, 1], [], []>} : vector<8x128xf32>, vector<128x512xf32>, vector<8x512xf32> -> vector<8x512xf32>
    %144 = arith.addf %142, %143 : vector<8x512xf32>
    %145 = vector.extract_strided_slice %144 {offsets = [0, 0], sizes = [8, 384], strides = [1, 1]} : vector<8x512xf32> to vector<8x384xf32>
    %146 = arith.negf %145 : vector<8x384xf32>
    %147 = math.exp %146 : vector<8x384xf32>
    %cst_49 = arith.constant 1.000000e+00 : f32
    %148 = vector.broadcast %cst_49 : f32 to vector<8x384xf32>
    %149 = arith.addf %148, %147 : vector<8x384xf32>
    %150 = arith.divf %148, %149 : vector<8x384xf32>
    %151 = vector.extract_strided_slice %150 {offsets = [0, 0], sizes = [8, 128], strides = [1, 1]} : vector<8x384xf32> to vector<8x128xf32>
    %152 = vector.extract_strided_slice %150 {offsets = [0, 128], sizes = [8, 128], strides = [1, 1]} : vector<8x384xf32> to vector<8x128xf32>
    %153 = vector.extract_strided_slice %150 {offsets = [0, 256], sizes = [8, 128], strides = [1, 1]} : vector<8x384xf32> to vector<8x128xf32>
    %154 = vector.extract_strided_slice %144 {offsets = [0, 384], sizes = [8, 128], strides = [1, 1]} : vector<8x512xf32> to vector<8x128xf32>
    %155 = math.tanh %154 : vector<8x128xf32>
    %156 = arith.mulf %152, %133 : vector<8x128xf32>
    %157 = arith.mulf %151, %155 : vector<8x128xf32>
    %158 = arith.addf %156, %157 : vector<8x128xf32>
    %159 = math.tanh %158 : vector<8x128xf32>
    %160 = arith.mulf %153, %159 : vector<8x128xf32>
    %161 = arith.index_cast %c5_i32 : i32 to index
    %c0_50 = arith.constant 0 : index
    %c0_51 = arith.constant 0 : index
    %162 = vector.load %arg7[%161, %c0_50, %c0_51] : memref<8x8x128xf32, #tpu.memory_space<vmem>>, vector<1x8x128xf32>
    %163 = vector.shape_cast %162 : vector<1x8x128xf32> to vector<8x128xf32>
    %164 = vector.shape_cast %160 : vector<8x128xf32> to vector<1x8x128xf32>
    tpu.vector_store %arg7[%161, %c0_50, %c0_51], %164 {strides = array<i32>} : memref<8x8x128xf32, #tpu.memory_space<vmem>>, vector<1x8x128xf32>,
    %c6_i32 = arith.constant 6 : i32
    %165 = arith.index_cast %c6_i32 : i32 to index
    %c0_52 = arith.constant 0 : index
    %c0_53 = arith.constant 0 : index
    %166 = vector.load %arg8[%165, %c0_52, %c0_53] : memref<8x8x512xf32, #tpu.memory_space<vmem>>, vector<1x8x512xf32>
    %167 = vector.shape_cast %166 : vector<1x8x512xf32> to vector<8x512xf32>
    %cst_54 = arith.constant dense<0.000000e+00> : vector<8x512xf32>
    %168 = tpu.matmul %160, %12, %cst_54 {dimension_numbers = #tpu.dot_dimension_numbers<[1], [0], [0], [1], [0, 0, 1, 1], [], []>} : vector<8x128xf32>, vector<128x512xf32>, vector<8x512xf32> -> vector<8x512xf32>
    %169 = arith.addf %167, %168 : vector<8x512xf32>
    %170 = vector.extract_strided_slice %169 {offsets = [0, 0], sizes = [8, 384], strides = [1, 1]} : vector<8x512xf32> to vector<8x384xf32>
    %171 = arith.negf %170 : vector<8x384xf32>
    %172 = math.exp %171 : vector<8x384xf32>
    %cst_55 = arith.constant 1.000000e+00 : f32
    %173 = vector.broadcast %cst_55 : f32 to vector<8x384xf32>
    %174 = arith.addf %173, %172 : vector<8x384xf32>
    %175 = arith.divf %173, %174 : vector<8x384xf32>
    %176 = vector.extract_strided_slice %175 {offsets = [0, 0], sizes = [8, 128], strides = [1, 1]} : vector<8x384xf32> to vector<8x128xf32>
    %177 = vector.extract_strided_slice %175 {offsets = [0, 128], sizes = [8, 128], strides = [1, 1]} : vector<8x384xf32> to vector<8x128xf32>
    %178 = vector.extract_strided_slice %175 {offsets = [0, 256], sizes = [8, 128], strides = [1, 1]} : vector<8x384xf32> to vector<8x128xf32>
    %179 = vector.extract_strided_slice %169 {offsets = [0, 384], sizes = [8, 128], strides = [1, 1]} : vector<8x512xf32> to vector<8x128xf32>
    %180 = math.tanh %179 : vector<8x128xf32>
    %181 = arith.mulf %177, %158 : vector<8x128xf32>
    %182 = arith.mulf %176, %180 : vector<8x128xf32>
    %183 = arith.addf %181, %182 : vector<8x128xf32>
    %184 = math.tanh %183 : vector<8x128xf32>
    %185 = arith.mulf %178, %184 : vector<8x128xf32>
    %186 = arith.index_cast %c6_i32 : i32 to index
    %c0_56 = arith.constant 0 : index
    %c0_57 = arith.constant 0 : index
    %187 = vector.load %arg7[%186, %c0_56, %c0_57] : memref<8x8x128xf32, #tpu.memory_space<vmem>>, vector<1x8x128xf32>
    %188 = vector.shape_cast %187 : vector<1x8x128xf32> to vector<8x128xf32>
    %189 = vector.shape_cast %185 : vector<8x128xf32> to vector<1x8x128xf32>
    tpu.vector_store %arg7[%186, %c0_56, %c0_57], %189 {strides = array<i32>} : memref<8x8x128xf32, #tpu.memory_space<vmem>>, vector<1x8x128xf32>,
    %c7_i32 = arith.constant 7 : i32
    %190 = arith.index_cast %c7_i32 : i32 to index
    %c0_58 = arith.constant 0 : index
    %c0_59 = arith.constant 0 : index
    %191 = vector.load %arg8[%190, %c0_58, %c0_59] : memref<8x8x512xf32, #tpu.memory_space<vmem>>, vector<1x8x512xf32>
    %192 = vector.shape_cast %191 : vector<1x8x512xf32> to vector<8x512xf32>
    %cst_60 = arith.constant dense<0.000000e+00> : vector<8x512xf32>
    %193 = tpu.matmul %185, %12, %cst_60 {dimension_numbers = #tpu.dot_dimension_numbers<[1], [0], [0], [1], [0, 0, 1, 1], [], []>} : vector<8x128xf32>, vector<128x512xf32>, vector<8x512xf32> -> vector<8x512xf32>
    %194 = arith.addf %192, %193 : vector<8x512xf32>
    %195 = vector.extract_strided_slice %194 {offsets = [0, 0], sizes = [8, 384], strides = [1, 1]} : vector<8x512xf32> to vector<8x384xf32>
    %196 = arith.negf %195 : vector<8x384xf32>
    %197 = math.exp %196 : vector<8x384xf32>
    %cst_61 = arith.constant 1.000000e+00 : f32
    %198 = vector.broadcast %cst_61 : f32 to vector<8x384xf32>
    %199 = arith.addf %198, %197 : vector<8x384xf32>
    %200 = arith.divf %198, %199 : vector<8x384xf32>
    %201 = vector.extract_strided_slice %200 {offsets = [0, 0], sizes = [8, 128], strides = [1, 1]} : vector<8x384xf32> to vector<8x128xf32>
    %202 = vector.extract_strided_slice %200 {offsets = [0, 128], sizes = [8, 128], strides = [1, 1]} : vector<8x384xf32> to vector<8x128xf32>
    %203 = vector.extract_strided_slice %200 {offsets = [0, 256], sizes = [8, 128], strides = [1, 1]} : vector<8x384xf32> to vector<8x128xf32>
    %204 = vector.extract_strided_slice %194 {offsets = [0, 384], sizes = [8, 128], strides = [1, 1]} : vector<8x512xf32> to vector<8x128xf32>
    %205 = math.tanh %204 : vector<8x128xf32>
    %206 = arith.mulf %202, %183 : vector<8x128xf32>
    %207 = arith.mulf %201, %205 : vector<8x128xf32>
    %208 = arith.addf %206, %207 : vector<8x128xf32>
    %209 = math.tanh %208 : vector<8x128xf32>
    %210 = arith.mulf %203, %209 : vector<8x128xf32>
    %211 = arith.index_cast %c7_i32 : i32 to index
    %c0_62 = arith.constant 0 : index
    %c0_63 = arith.constant 0 : index
    %212 = vector.load %arg7[%211, %c0_62, %c0_63] : memref<8x8x128xf32, #tpu.memory_space<vmem>>, vector<1x8x128xf32>
    %213 = vector.shape_cast %212 : vector<1x8x128xf32> to vector<8x128xf32>
    %214 = vector.shape_cast %210 : vector<8x128xf32> to vector<1x8x128xf32>
    tpu.vector_store %arg7[%211, %c0_62, %c0_63], %214 {strides = array<i32>} : memref<8x8x128xf32, #tpu.memory_space<vmem>>, vector<1x8x128xf32>,
    %c8_i32 = arith.constant 8 : i32
    %c0_64 = arith.constant 0 : index
    %c0_65 = arith.constant 0 : index
    %c0_66 = arith.constant 0 : index
    %215 = vector.load %arg7[%c0_64, %c0_65, %c0_66] : memref<8x8x128xf32, #tpu.memory_space<vmem>>, vector<8x8x128xf32>
    %216 = vector.shape_cast %215 : vector<8x8x128xf32> to vector<64x128xf32>
    %c1 = arith.constant 1 : index
    %c0_67 = arith.constant 0 : index
    %c0_68 = arith.constant 0 : index
    %217 = vector.load %arg1[%c1, %c0_67, %c0_68] : memref<2x128x512xf32, #tpu.memory_space<vmem>>, vector<1x128x512xf32>
    %218 = vector.shape_cast %217 : vector<1x128x512xf32> to vector<128x512xf32>
    %cst_69 = arith.constant dense<0.000000e+00> : vector<64x512xf32>
    %219 = tpu.matmul %216, %218, %cst_69 {dimension_numbers = #tpu.dot_dimension_numbers<[1], [0], [0], [1], [0, 0, 1, 1], [], []>} : vector<64x128xf32>, vector<128x512xf32>, vector<64x512xf32> -> vector<64x512xf32>
    %c1_70 = arith.constant 1 : index
    %c0_71 = arith.constant 0 : index
    %c0_72 = arith.constant 0 : index
    %220 = vector.load %arg3[%c1_70, %c0_71, %c0_72] : memref<2x1x512xf32, #tpu.memory_space<vmem>>, vector<1x1x512xf32>
    %221 = vector.shape_cast %220 : vector<1x1x512xf32> to vector<1x512xf32>
    %222 = vector.broadcast %221 : vector<1x512xf32> to vector<64x512xf32>
    %223 = arith.addf %219, %222 : vector<64x512xf32>
    %224 = vector.shape_cast %223 : vector<64x512xf32> to vector<8x8x512xf32>
    %c0_73 = arith.constant 0 : index
    %c0_74 = arith.constant 0 : index
    %c0_75 = arith.constant 0 : index
    %225 = vector.load %arg8[%c0_73, %c0_74, %c0_75] : memref<8x8x512xf32, #tpu.memory_space<vmem>>, vector<8x8x512xf32>
    tpu.vector_store %arg8[%c0_73, %c0_74, %c0_75], %224 {strides = array<i32>} : memref<8x8x512xf32, #tpu.memory_space<vmem>>, vector<8x8x512xf32>,
    %c1_76 = arith.constant 1 : index
    %c0_77 = arith.constant 0 : index
    %c0_78 = arith.constant 0 : index
    %226 = vector.load %arg2[%c1_76, %c0_77, %c0_78] : memref<2x128x512xf32, #tpu.memory_space<vmem>>, vector<1x128x512xf32>
    %227 = vector.shape_cast %226 : vector<1x128x512xf32> to vector<128x512xf32>
    %cst_79 = arith.constant 0.000000e+00 : f32
    %228 = vector.broadcast %cst_79 : f32 to vector<8x128xf32>
    %cst_80 = arith.constant 0.000000e+00 : f32
    %229 = vector.broadcast %cst_80 : f32 to vector<8x128xf32>
    %c0_i32_81 = arith.constant 0 : i32
    %230 = arith.index_cast %c0_i32_81 : i32 to index
    %c0_82 = arith.constant 0 : index
    %c0_83 = arith.constant 0 : index
    %231 = vector.load %arg8[%230, %c0_82, %c0_83] : memref<8x8x512xf32, #tpu.memory_space<vmem>>, vector<1x8x512xf32>
    %232 = vector.shape_cast %231 : vector<1x8x512xf32> to vector<8x512xf32>
    %cst_84 = arith.constant dense<0.000000e+00> : vector<8x512xf32>
    %233 = tpu.matmul %228, %227, %cst_84 {dimension_numbers = #tpu.dot_dimension_numbers<[1], [0], [0], [1], [0, 0, 1, 1], [], []>} : vector<8x128xf32>, vector<128x512xf32>, vector<8x512xf32> -> vector<8x512xf32>
    %234 = arith.addf %232, %233 : vector<8x512xf32>
    %235 = vector.extract_strided_slice %234 {offsets = [0, 0], sizes = [8, 384], strides = [1, 1]} : vector<8x512xf32> to vector<8x384xf32>
    %236 = arith.negf %235 : vector<8x384xf32>
    %237 = math.exp %236 : vector<8x384xf32>
    %cst_85 = arith.constant 1.000000e+00 : f32
    %238 = vector.broadcast %cst_85 : f32 to vector<8x384xf32>
    %239 = arith.addf %238, %237 : vector<8x384xf32>
    %240 = arith.divf %238, %239 : vector<8x384xf32>
    %241 = vector.extract_strided_slice %240 {offsets = [0, 0], sizes = [8, 128], strides = [1, 1]} : vector<8x384xf32> to vector<8x128xf32>
    %242 = vector.extract_strided_slice %240 {offsets = [0, 128], sizes = [8, 128], strides = [1, 1]} : vector<8x384xf32> to vector<8x128xf32>
    %243 = vector.extract_strided_slice %240 {offsets = [0, 256], sizes = [8, 128], strides = [1, 1]} : vector<8x384xf32> to vector<8x128xf32>
    %244 = vector.extract_strided_slice %234 {offsets = [0, 384], sizes = [8, 128], strides = [1, 1]} : vector<8x512xf32> to vector<8x128xf32>
    %245 = math.tanh %244 : vector<8x128xf32>
    %246 = arith.mulf %242, %229 : vector<8x128xf32>
    %247 = arith.mulf %241, %245 : vector<8x128xf32>
    %248 = arith.addf %246, %247 : vector<8x128xf32>
    %249 = math.tanh %248 : vector<8x128xf32>
    %250 = arith.mulf %243, %249 : vector<8x128xf32>
    %251 = arith.index_cast %c0_i32_81 : i32 to index
    %c0_86 = arith.constant 0 : index
    %c0_87 = arith.constant 0 : index
    %252 = vector.load %arg7[%251, %c0_86, %c0_87] : memref<8x8x128xf32, #tpu.memory_space<vmem>>, vector<1x8x128xf32>
    %253 = vector.shape_cast %252 : vector<1x8x128xf32> to vector<8x128xf32>
    %254 = vector.shape_cast %250 : vector<8x128xf32> to vector<1x8x128xf32>
    tpu.vector_store %arg7[%251, %c0_86, %c0_87], %254 {strides = array<i32>} : memref<8x8x128xf32, #tpu.memory_space<vmem>>, vector<1x8x128xf32>,
    %c1_i32_88 = arith.constant 1 : i32
    %255 = arith.index_cast %c1_i32_88 : i32 to index
    %c0_89 = arith.constant 0 : index
    %c0_90 = arith.constant 0 : index
    %256 = vector.load %arg8[%255, %c0_89, %c0_90] : memref<8x8x512xf32, #tpu.memory_space<vmem>>, vector<1x8x512xf32>
    %257 = vector.shape_cast %256 : vector<1x8x512xf32> to vector<8x512xf32>
    %cst_91 = arith.constant dense<0.000000e+00> : vector<8x512xf32>
    %258 = tpu.matmul %250, %227, %cst_91 {dimension_numbers = #tpu.dot_dimension_numbers<[1], [0], [0], [1], [0, 0, 1, 1], [], []>} : vector<8x128xf32>, vector<128x512xf32>, vector<8x512xf32> -> vector<8x512xf32>
    %259 = arith.addf %257, %258 : vector<8x512xf32>
    %260 = vector.extract_strided_slice %259 {offsets = [0, 0], sizes = [8, 384], strides = [1, 1]} : vector<8x512xf32> to vector<8x384xf32>
    %261 = arith.negf %260 : vector<8x384xf32>
    %262 = math.exp %261 : vector<8x384xf32>
    %cst_92 = arith.constant 1.000000e+00 : f32
    %263 = vector.broadcast %cst_92 : f32 to vector<8x384xf32>
    %264 = arith.addf %263, %262 : vector<8x384xf32>
    %265 = arith.divf %263, %264 : vector<8x384xf32>
    %266 = vector.extract_strided_slice %265 {offsets = [0, 0], sizes = [8, 128], strides = [1, 1]} : vector<8x384xf32> to vector<8x128xf32>
    %267 = vector.extract_strided_slice %265 {offsets = [0, 128], sizes = [8, 128], strides = [1, 1]} : vector<8x384xf32> to vector<8x128xf32>
    %268 = vector.extract_strided_slice %265 {offsets = [0, 256], sizes = [8, 128], strides = [1, 1]} : vector<8x384xf32> to vector<8x128xf32>
    %269 = vector.extract_strided_slice %259 {offsets = [0, 384], sizes = [8, 128], strides = [1, 1]} : vector<8x512xf32> to vector<8x128xf32>
    %270 = math.tanh %269 : vector<8x128xf32>
    %271 = arith.mulf %267, %248 : vector<8x128xf32>
    %272 = arith.mulf %266, %270 : vector<8x128xf32>
    %273 = arith.addf %271, %272 : vector<8x128xf32>
    %274 = math.tanh %273 : vector<8x128xf32>
    %275 = arith.mulf %268, %274 : vector<8x128xf32>
    %276 = arith.index_cast %c1_i32_88 : i32 to index
    %c0_93 = arith.constant 0 : index
    %c0_94 = arith.constant 0 : index
    %277 = vector.load %arg7[%276, %c0_93, %c0_94] : memref<8x8x128xf32, #tpu.memory_space<vmem>>, vector<1x8x128xf32>
    %278 = vector.shape_cast %277 : vector<1x8x128xf32> to vector<8x128xf32>
    %279 = vector.shape_cast %275 : vector<8x128xf32> to vector<1x8x128xf32>
    tpu.vector_store %arg7[%276, %c0_93, %c0_94], %279 {strides = array<i32>} : memref<8x8x128xf32, #tpu.memory_space<vmem>>, vector<1x8x128xf32>,
    %c2_i32_95 = arith.constant 2 : i32
    %280 = arith.index_cast %c2_i32_95 : i32 to index
    %c0_96 = arith.constant 0 : index
    %c0_97 = arith.constant 0 : index
    %281 = vector.load %arg8[%280, %c0_96, %c0_97] : memref<8x8x512xf32, #tpu.memory_space<vmem>>, vector<1x8x512xf32>
    %282 = vector.shape_cast %281 : vector<1x8x512xf32> to vector<8x512xf32>
    %cst_98 = arith.constant dense<0.000000e+00> : vector<8x512xf32>
    %283 = tpu.matmul %275, %227, %cst_98 {dimension_numbers = #tpu.dot_dimension_numbers<[1], [0], [0], [1], [0, 0, 1, 1], [], []>} : vector<8x128xf32>, vector<128x512xf32>, vector<8x512xf32> -> vector<8x512xf32>
    %284 = arith.addf %282, %283 : vector<8x512xf32>
    %285 = vector.extract_strided_slice %284 {offsets = [0, 0], sizes = [8, 384], strides = [1, 1]} : vector<8x512xf32> to vector<8x384xf32>
    %286 = arith.negf %285 : vector<8x384xf32>
    %287 = math.exp %286 : vector<8x384xf32>
    %cst_99 = arith.constant 1.000000e+00 : f32
    %288 = vector.broadcast %cst_99 : f32 to vector<8x384xf32>
    %289 = arith.addf %288, %287 : vector<8x384xf32>
    %290 = arith.divf %288, %289 : vector<8x384xf32>
    %291 = vector.extract_strided_slice %290 {offsets = [0, 0], sizes = [8, 128], strides = [1, 1]} : vector<8x384xf32> to vector<8x128xf32>
    %292 = vector.extract_strided_slice %290 {offsets = [0, 128], sizes = [8, 128], strides = [1, 1]} : vector<8x384xf32> to vector<8x128xf32>
    %293 = vector.extract_strided_slice %290 {offsets = [0, 256], sizes = [8, 128], strides = [1, 1]} : vector<8x384xf32> to vector<8x128xf32>
    %294 = vector.extract_strided_slice %284 {offsets = [0, 384], sizes = [8, 128], strides = [1, 1]} : vector<8x512xf32> to vector<8x128xf32>
    %295 = math.tanh %294 : vector<8x128xf32>
    %296 = arith.mulf %292, %273 : vector<8x128xf32>
    %297 = arith.mulf %291, %295 : vector<8x128xf32>
    %298 = arith.addf %296, %297 : vector<8x128xf32>
    %299 = math.tanh %298 : vector<8x128xf32>
    %300 = arith.mulf %293, %299 : vector<8x128xf32>
    %301 = arith.index_cast %c2_i32_95 : i32 to index
    %c0_100 = arith.constant 0 : index
    %c0_101 = arith.constant 0 : index
    %302 = vector.load %arg7[%301, %c0_100, %c0_101] : memref<8x8x128xf32, #tpu.memory_space<vmem>>, vector<1x8x128xf32>
    %303 = vector.shape_cast %302 : vector<1x8x128xf32> to vector<8x128xf32>
    %304 = vector.shape_cast %300 : vector<8x128xf32> to vector<1x8x128xf32>
    tpu.vector_store %arg7[%301, %c0_100, %c0_101], %304 {strides = array<i32>} : memref<8x8x128xf32, #tpu.memory_space<vmem>>, vector<1x8x128xf32>,
    %c3_i32_102 = arith.constant 3 : i32
    %305 = arith.index_cast %c3_i32_102 : i32 to index
    %c0_103 = arith.constant 0 : index
    %c0_104 = arith.constant 0 : index
    %306 = vector.load %arg8[%305, %c0_103, %c0_104] : memref<8x8x512xf32, #tpu.memory_space<vmem>>, vector<1x8x512xf32>
    %307 = vector.shape_cast %306 : vector<1x8x512xf32> to vector<8x512xf32>
    %cst_105 = arith.constant dense<0.000000e+00> : vector<8x512xf32>
    %308 = tpu.matmul %300, %227, %cst_105 {dimension_numbers = #tpu.dot_dimension_numbers<[1], [0], [0], [1], [0, 0, 1, 1], [], []>} : vector<8x128xf32>, vector<128x512xf32>, vector<8x512xf32> -> vector<8x512xf32>
    %309 = arith.addf %307, %308 : vector<8x512xf32>
    %310 = vector.extract_strided_slice %309 {offsets = [0, 0], sizes = [8, 384], strides = [1, 1]} : vector<8x512xf32> to vector<8x384xf32>
    %311 = arith.negf %310 : vector<8x384xf32>
    %312 = math.exp %311 : vector<8x384xf32>
    %cst_106 = arith.constant 1.000000e+00 : f32
    %313 = vector.broadcast %cst_106 : f32 to vector<8x384xf32>
    %314 = arith.addf %313, %312 : vector<8x384xf32>
    %315 = arith.divf %313, %314 : vector<8x384xf32>
    %316 = vector.extract_strided_slice %315 {offsets = [0, 0], sizes = [8, 128], strides = [1, 1]} : vector<8x384xf32> to vector<8x128xf32>
    %317 = vector.extract_strided_slice %315 {offsets = [0, 128], sizes = [8, 128], strides = [1, 1]} : vector<8x384xf32> to vector<8x128xf32>
    %318 = vector.extract_strided_slice %315 {offsets = [0, 256], sizes = [8, 128], strides = [1, 1]} : vector<8x384xf32> to vector<8x128xf32>
    %319 = vector.extract_strided_slice %309 {offsets = [0, 384], sizes = [8, 128], strides = [1, 1]} : vector<8x512xf32> to vector<8x128xf32>
    %320 = math.tanh %319 : vector<8x128xf32>
    %321 = arith.mulf %317, %298 : vector<8x128xf32>
    %322 = arith.mulf %316, %320 : vector<8x128xf32>
    %323 = arith.addf %321, %322 : vector<8x128xf32>
    %324 = math.tanh %323 : vector<8x128xf32>
    %325 = arith.mulf %318, %324 : vector<8x128xf32>
    %326 = arith.index_cast %c3_i32_102 : i32 to index
    %c0_107 = arith.constant 0 : index
    %c0_108 = arith.constant 0 : index
    %327 = vector.load %arg7[%326, %c0_107, %c0_108] : memref<8x8x128xf32, #tpu.memory_space<vmem>>, vector<1x8x128xf32>
    %328 = vector.shape_cast %327 : vector<1x8x128xf32> to vector<8x128xf32>
    %329 = vector.shape_cast %325 : vector<8x128xf32> to vector<1x8x128xf32>
    tpu.vector_store %arg7[%326, %c0_107, %c0_108], %329 {strides = array<i32>} : memref<8x8x128xf32, #tpu.memory_space<vmem>>, vector<1x8x128xf32>,
    %c4_i32_109 = arith.constant 4 : i32
    %330 = arith.index_cast %c4_i32_109 : i32 to index
    %c0_110 = arith.constant 0 : index
    %c0_111 = arith.constant 0 : index
    %331 = vector.load %arg8[%330, %c0_110, %c0_111] : memref<8x8x512xf32, #tpu.memory_space<vmem>>, vector<1x8x512xf32>
    %332 = vector.shape_cast %331 : vector<1x8x512xf32> to vector<8x512xf32>
    %cst_112 = arith.constant dense<0.000000e+00> : vector<8x512xf32>
    %333 = tpu.matmul %325, %227, %cst_112 {dimension_numbers = #tpu.dot_dimension_numbers<[1], [0], [0], [1], [0, 0, 1, 1], [], []>} : vector<8x128xf32>, vector<128x512xf32>, vector<8x512xf32> -> vector<8x512xf32>
    %334 = arith.addf %332, %333 : vector<8x512xf32>
    %335 = vector.extract_strided_slice %334 {offsets = [0, 0], sizes = [8, 384], strides = [1, 1]} : vector<8x512xf32> to vector<8x384xf32>
    %336 = arith.negf %335 : vector<8x384xf32>
    %337 = math.exp %336 : vector<8x384xf32>
    %cst_113 = arith.constant 1.000000e+00 : f32
    %338 = vector.broadcast %cst_113 : f32 to vector<8x384xf32>
    %339 = arith.addf %338, %337 : vector<8x384xf32>
    %340 = arith.divf %338, %339 : vector<8x384xf32>
    %341 = vector.extract_strided_slice %340 {offsets = [0, 0], sizes = [8, 128], strides = [1, 1]} : vector<8x384xf32> to vector<8x128xf32>
    %342 = vector.extract_strided_slice %340 {offsets = [0, 128], sizes = [8, 128], strides = [1, 1]} : vector<8x384xf32> to vector<8x128xf32>
    %343 = vector.extract_strided_slice %340 {offsets = [0, 256], sizes = [8, 128], strides = [1, 1]} : vector<8x384xf32> to vector<8x128xf32>
    %344 = vector.extract_strided_slice %334 {offsets = [0, 384], sizes = [8, 128], strides = [1, 1]} : vector<8x512xf32> to vector<8x128xf32>
    %345 = math.tanh %344 : vector<8x128xf32>
    %346 = arith.mulf %342, %323 : vector<8x128xf32>
    %347 = arith.mulf %341, %345 : vector<8x128xf32>
    %348 = arith.addf %346, %347 : vector<8x128xf32>
    %349 = math.tanh %348 : vector<8x128xf32>
    %350 = arith.mulf %343, %349 : vector<8x128xf32>
    %351 = arith.index_cast %c4_i32_109 : i32 to index
    %c0_114 = arith.constant 0 : index
    %c0_115 = arith.constant 0 : index
    %352 = vector.load %arg7[%351, %c0_114, %c0_115] : memref<8x8x128xf32, #tpu.memory_space<vmem>>, vector<1x8x128xf32>
    %353 = vector.shape_cast %352 : vector<1x8x128xf32> to vector<8x128xf32>
    %354 = vector.shape_cast %350 : vector<8x128xf32> to vector<1x8x128xf32>
    tpu.vector_store %arg7[%351, %c0_114, %c0_115], %354 {strides = array<i32>} : memref<8x8x128xf32, #tpu.memory_space<vmem>>, vector<1x8x128xf32>,
    %c5_i32_116 = arith.constant 5 : i32
    %355 = arith.index_cast %c5_i32_116 : i32 to index
    %c0_117 = arith.constant 0 : index
    %c0_118 = arith.constant 0 : index
    %356 = vector.load %arg8[%355, %c0_117, %c0_118] : memref<8x8x512xf32, #tpu.memory_space<vmem>>, vector<1x8x512xf32>
    %357 = vector.shape_cast %356 : vector<1x8x512xf32> to vector<8x512xf32>
    %cst_119 = arith.constant dense<0.000000e+00> : vector<8x512xf32>
    %358 = tpu.matmul %350, %227, %cst_119 {dimension_numbers = #tpu.dot_dimension_numbers<[1], [0], [0], [1], [0, 0, 1, 1], [], []>} : vector<8x128xf32>, vector<128x512xf32>, vector<8x512xf32> -> vector<8x512xf32>
    %359 = arith.addf %357, %358 : vector<8x512xf32>
    %360 = vector.extract_strided_slice %359 {offsets = [0, 0], sizes = [8, 384], strides = [1, 1]} : vector<8x512xf32> to vector<8x384xf32>
    %361 = arith.negf %360 : vector<8x384xf32>
    %362 = math.exp %361 : vector<8x384xf32>
    %cst_120 = arith.constant 1.000000e+00 : f32
    %363 = vector.broadcast %cst_120 : f32 to vector<8x384xf32>
    %364 = arith.addf %363, %362 : vector<8x384xf32>
    %365 = arith.divf %363, %364 : vector<8x384xf32>
    %366 = vector.extract_strided_slice %365 {offsets = [0, 0], sizes = [8, 128], strides = [1, 1]} : vector<8x384xf32> to vector<8x128xf32>
    %367 = vector.extract_strided_slice %365 {offsets = [0, 128], sizes = [8, 128], strides = [1, 1]} : vector<8x384xf32> to vector<8x128xf32>
    %368 = vector.extract_strided_slice %365 {offsets = [0, 256], sizes = [8, 128], strides = [1, 1]} : vector<8x384xf32> to vector<8x128xf32>
    %369 = vector.extract_strided_slice %359 {offsets = [0, 384], sizes = [8, 128], strides = [1, 1]} : vector<8x512xf32> to vector<8x128xf32>
    %370 = math.tanh %369 : vector<8x128xf32>
    %371 = arith.mulf %367, %348 : vector<8x128xf32>
    %372 = arith.mulf %366, %370 : vector<8x128xf32>
    %373 = arith.addf %371, %372 : vector<8x128xf32>
    %374 = math.tanh %373 : vector<8x128xf32>
    %375 = arith.mulf %368, %374 : vector<8x128xf32>
    %376 = arith.index_cast %c5_i32_116 : i32 to index
    %c0_121 = arith.constant 0 : index
    %c0_122 = arith.constant 0 : index
    %377 = vector.load %arg7[%376, %c0_121, %c0_122] : memref<8x8x128xf32, #tpu.memory_space<vmem>>, vector<1x8x128xf32>
    %378 = vector.shape_cast %377 : vector<1x8x128xf32> to vector<8x128xf32>
    %379 = vector.shape_cast %375 : vector<8x128xf32> to vector<1x8x128xf32>
    tpu.vector_store %arg7[%376, %c0_121, %c0_122], %379 {strides = array<i32>} : memref<8x8x128xf32, #tpu.memory_space<vmem>>, vector<1x8x128xf32>,
    %c6_i32_123 = arith.constant 6 : i32
    %380 = arith.index_cast %c6_i32_123 : i32 to index
    %c0_124 = arith.constant 0 : index
    %c0_125 = arith.constant 0 : index
    %381 = vector.load %arg8[%380, %c0_124, %c0_125] : memref<8x8x512xf32, #tpu.memory_space<vmem>>, vector<1x8x512xf32>
    %382 = vector.shape_cast %381 : vector<1x8x512xf32> to vector<8x512xf32>
    %cst_126 = arith.constant dense<0.000000e+00> : vector<8x512xf32>
    %383 = tpu.matmul %375, %227, %cst_126 {dimension_numbers = #tpu.dot_dimension_numbers<[1], [0], [0], [1], [0, 0, 1, 1], [], []>} : vector<8x128xf32>, vector<128x512xf32>, vector<8x512xf32> -> vector<8x512xf32>
    %384 = arith.addf %382, %383 : vector<8x512xf32>
    %385 = vector.extract_strided_slice %384 {offsets = [0, 0], sizes = [8, 384], strides = [1, 1]} : vector<8x512xf32> to vector<8x384xf32>
    %386 = arith.negf %385 : vector<8x384xf32>
    %387 = math.exp %386 : vector<8x384xf32>
    %cst_127 = arith.constant 1.000000e+00 : f32
    %388 = vector.broadcast %cst_127 : f32 to vector<8x384xf32>
    %389 = arith.addf %388, %387 : vector<8x384xf32>
    %390 = arith.divf %388, %389 : vector<8x384xf32>
    %391 = vector.extract_strided_slice %390 {offsets = [0, 0], sizes = [8, 128], strides = [1, 1]} : vector<8x384xf32> to vector<8x128xf32>
    %392 = vector.extract_strided_slice %390 {offsets = [0, 128], sizes = [8, 128], strides = [1, 1]} : vector<8x384xf32> to vector<8x128xf32>
    %393 = vector.extract_strided_slice %390 {offsets = [0, 256], sizes = [8, 128], strides = [1, 1]} : vector<8x384xf32> to vector<8x128xf32>
    %394 = vector.extract_strided_slice %384 {offsets = [0, 384], sizes = [8, 128], strides = [1, 1]} : vector<8x512xf32> to vector<8x128xf32>
    %395 = math.tanh %394 : vector<8x128xf32>
    %396 = arith.mulf %392, %373 : vector<8x128xf32>
    %397 = arith.mulf %391, %395 : vector<8x128xf32>
    %398 = arith.addf %396, %397 : vector<8x128xf32>
    %399 = math.tanh %398 : vector<8x128xf32>
    %400 = arith.mulf %393, %399 : vector<8x128xf32>
    %401 = arith.index_cast %c6_i32_123 : i32 to index
    %c0_128 = arith.constant 0 : index
    %c0_129 = arith.constant 0 : index
    %402 = vector.load %arg7[%401, %c0_128, %c0_129] : memref<8x8x128xf32, #tpu.memory_space<vmem>>, vector<1x8x128xf32>
    %403 = vector.shape_cast %402 : vector<1x8x128xf32> to vector<8x128xf32>
    %404 = vector.shape_cast %400 : vector<8x128xf32> to vector<1x8x128xf32>
    tpu.vector_store %arg7[%401, %c0_128, %c0_129], %404 {strides = array<i32>} : memref<8x8x128xf32, #tpu.memory_space<vmem>>, vector<1x8x128xf32>,
    %c7_i32_130 = arith.constant 7 : i32
    %405 = arith.index_cast %c7_i32_130 : i32 to index
    %c0_131 = arith.constant 0 : index
    %c0_132 = arith.constant 0 : index
    %406 = vector.load %arg8[%405, %c0_131, %c0_132] : memref<8x8x512xf32, #tpu.memory_space<vmem>>, vector<1x8x512xf32>
    %407 = vector.shape_cast %406 : vector<1x8x512xf32> to vector<8x512xf32>
    %cst_133 = arith.constant dense<0.000000e+00> : vector<8x512xf32>
    %408 = tpu.matmul %400, %227, %cst_133 {dimension_numbers = #tpu.dot_dimension_numbers<[1], [0], [0], [1], [0, 0, 1, 1], [], []>} : vector<8x128xf32>, vector<128x512xf32>, vector<8x512xf32> -> vector<8x512xf32>
    %409 = arith.addf %407, %408 : vector<8x512xf32>
    %410 = vector.extract_strided_slice %409 {offsets = [0, 0], sizes = [8, 384], strides = [1, 1]} : vector<8x512xf32> to vector<8x384xf32>
    %411 = arith.negf %410 : vector<8x384xf32>
    %412 = math.exp %411 : vector<8x384xf32>
    %cst_134 = arith.constant 1.000000e+00 : f32
    %413 = vector.broadcast %cst_134 : f32 to vector<8x384xf32>
    %414 = arith.addf %413, %412 : vector<8x384xf32>
    %415 = arith.divf %413, %414 : vector<8x384xf32>
    %416 = vector.extract_strided_slice %415 {offsets = [0, 0], sizes = [8, 128], strides = [1, 1]} : vector<8x384xf32> to vector<8x128xf32>
    %417 = vector.extract_strided_slice %415 {offsets = [0, 128], sizes = [8, 128], strides = [1, 1]} : vector<8x384xf32> to vector<8x128xf32>
    %418 = vector.extract_strided_slice %415 {offsets = [0, 256], sizes = [8, 128], strides = [1, 1]} : vector<8x384xf32> to vector<8x128xf32>
    %419 = vector.extract_strided_slice %409 {offsets = [0, 384], sizes = [8, 128], strides = [1, 1]} : vector<8x512xf32> to vector<8x128xf32>
    %420 = math.tanh %419 : vector<8x128xf32>
    %421 = arith.mulf %417, %398 : vector<8x128xf32>
    %422 = arith.mulf %416, %420 : vector<8x128xf32>
    %423 = arith.addf %421, %422 : vector<8x128xf32>
    %424 = math.tanh %423 : vector<8x128xf32>
    %425 = arith.mulf %418, %424 : vector<8x128xf32>
    %426 = arith.index_cast %c7_i32_130 : i32 to index
    %c0_135 = arith.constant 0 : index
    %c0_136 = arith.constant 0 : index
    %427 = vector.load %arg7[%426, %c0_135, %c0_136] : memref<8x8x128xf32, #tpu.memory_space<vmem>>, vector<1x8x128xf32>
    %428 = vector.shape_cast %427 : vector<1x8x128xf32> to vector<8x128xf32>
    %429 = vector.shape_cast %425 : vector<8x128xf32> to vector<1x8x128xf32>
    tpu.vector_store %arg7[%426, %c0_135, %c0_136], %429 {strides = array<i32>} : memref<8x8x128xf32, #tpu.memory_space<vmem>>, vector<1x8x128xf32>,
    %c8_i32_137 = arith.constant 8 : i32
    %c0_138 = arith.constant 0 : index
    %c0_139 = arith.constant 0 : index
    %c0_140 = arith.constant 0 : index
    %430 = vector.load %arg7[%c0_138, %c0_139, %c0_140] : memref<8x8x128xf32, #tpu.memory_space<vmem>>, vector<8x8x128xf32>
    %431 = vector.shape_cast %430 : vector<8x8x128xf32> to vector<64x128xf32>
    %c0_141 = arith.constant 0 : index
    %c0_142 = arith.constant 0 : index
    %432 = vector.load %arg4[%c0_141, %c0_142] : memref<128x128xf32, #tpu.memory_space<vmem>>, vector<128x128xf32>
    %cst_143 = arith.constant dense<0.000000e+00> : vector<64x128xf32>
    %433 = tpu.matmul %431, %432, %cst_143 {dimension_numbers = #tpu.dot_dimension_numbers<[1], [0], [0], [1], [0, 0, 1, 1], [], []>} : vector<64x128xf32>, vector<128x128xf32>, vector<64x128xf32> -> vector<64x128xf32>
    %c0_144 = arith.constant 0 : index
    %c0_145 = arith.constant 0 : index
    %434 = vector.load %arg5[%c0_144, %c0_145] : memref<1x128xf32, #tpu.memory_space<vmem>>, vector<1x128xf32>
    %435 = vector.broadcast %434 : vector<1x128xf32> to vector<64x128xf32>
    %436 = arith.addf %433, %435 : vector<64x128xf32>
    %437 = vector.shape_cast %436 : vector<64x128xf32> to vector<8x8x128xf32>
    %c0_146 = arith.constant 0 : index
    %c0_147 = arith.constant 0 : index
    %c0_148 = arith.constant 0 : index
    %438 = vector.load %arg6[%c0_146, %c0_147, %c0_148] : memref<8x8x128xf32, #tpu.memory_space<vmem>>, vector<8x8x128xf32>
    tpu.vector_store %arg6[%c0_146, %c0_147, %c0_148], %437 {strides = array<i32>} : memref<8x8x128xf32, #tpu.memory_space<vmem>>, vector<8x8x128xf32>,
    return
  }
}

</mosaic_0001>

<bundles_post_ra>
// kernel: tpu_custom_call.1
= control target key start
LH: loop header
LB: loop body
LE: loop exit
PB: predicated region body
PF: predicated region fallthrough
CT: control target
= control target key end

     0   :  { %11 = vsyncpa [#allocation5], 0  ;;  %s6833_s0 = inlined_call_operand.hbm [shape: f32[8,8,128], index: 0, kind: input, shape index: {}]   ;;  %s6834_s1 = inlined_call_operand.hbm [shape: f32[2,128,512], index: 1, kind: input, shape index: {}]   ;;  %s6835_s2 = inlined_call_operand.hbm [shape: f32[2,128,512], index: 2, kind: input, shape index: {}]   ;;  %s6836_s3 = inlined_call_operand.vmem [shape: f32[2,1,512], index: 3, kind: input, shape index: {}]   ;;  %s6837_s4 = inlined_call_operand.hbm [shape: f32[128,128], index: 4, kind: input, shape index: {}]   ;;  %s6838_s5 = inlined_call_operand.vmem [shape: f32[1,128], index: 5, kind: input, shape index: {}]   ;;  %s6839_s6 = inlined_call_operand.hbm [shape: f32[8,8,128], index: 6, kind: output, shape index: {}]  }
   0x1   :  { %12 = vsyncpa [#allocation8], 0 }
   0x2   :  { %13 = vsyncpa [#allocation11], 0 }
   0x3   :  { %14 = vsyncpa [#allocation6], 0  ;;  %s5705_s21 = smov [#allocation7]   ;;  %s5587_s25 = scalar_lea.hbm %s6834_s1, 16384 }
   0x4   :  { %s32_s22 = sshll.u32 %s5705_s21, 4  ;;  %p5588_p0 = scmp.ne.s32.totalorder %s6834_s1, %s5587_s25  ;;  %s33_s22 = int_to_ptr.vmem [resolvable:$true] %s32_s22 }
   0x5   :  { %p5591_p1 = scmp.lt.u32.totalorder %s5587_s25, %s6834_s1 }
   0x7   :  { %p5593_p2 = pnand %p5591_p1, %p5588_p0 }
   0x9   :  { %5596 = shalt.err (!%p5593_p2)
}
   0xa   :  { %s5597_s30 = scalar_lea.vmem %s33_s22, 16384  ;;  %p5602_p4 = scmp.lt.s32.totalorder %s33_s22, %s33_s22 }
   0xb   :  { %p5598_p3 = scmp.ne.s32.totalorder %s33_s22, %s5597_s30  ;;  %p5603_p5 = scmp.lt.s32.totalorder %s5597_s30, %s5597_s30 }
   0xd   :  { %p5604_p6 = por %p5603_p5, %p5602_p4 }
   0xf   :  { %p5605_p7 = pnand %p5604_p6, %p5598_p3 }
  0x11   :  { %5608 = shalt.err (!%p5605_p7)
}
  0x12   :  { %s5706_s7 = smov 512   ;;  %s5707_s8 = smov 32  }
  0x13   :  { %38 = dma.hbm_to_vmem [thread:$0]  %s6834_s1, 16384, %s33_s22, [#allocation8], %s5706_s7, %s5706_s7, %s5707_s8  }
  0x14   :  { %s5708_s11 = smov [#allocation4]   ;;  %s5609_s15 = scalar_lea.hbm %s6833_s0, 1024 }
  0x15   :  { %s20_s12 = sshll.u32 %s5708_s11, 4  ;;  %p5610_p8 = scmp.ne.s32.totalorder %s6833_s0, %s5609_s15  ;;  %s21_s12 = int_to_ptr.vmem [resolvable:$true] %s20_s12 }
  0x16   :  { %p5613_p9 = scmp.lt.u32.totalorder %s5609_s15, %s6833_s0 }
  0x18   :  { %p5615_p10 = pnand %p5613_p9, %p5610_p8 }
  0x1a   :  { %5618 = shalt.err (!%p5615_p10)
}
  0x1b   :  { %s5619_s20 = scalar_lea.vmem %s21_s12, 1024  ;;  %p5624_p12 = scmp.lt.s32.totalorder %s21_s12, %s21_s12 }
  0x1c   :  { %p5620_p11 = scmp.ne.s32.totalorder %s21_s12, %s5619_s20  ;;  %p5625_p13 = scmp.lt.s32.totalorder %s5619_s20, %s5619_s20 }
  0x1e   :  { %p5626_p0 = por %p5625_p13, %p5624_p12 }
  0x20   :  { %p5627_p1 = pnand %p5626_p0, %p5620_p11 }
  0x22   :  { %5630 = shalt.err (!%p5627_p1)
}
  0x23   :  { %s5709_s1 = smov 128   ;;  %s5710_s21 = smov 8  }
  0x24   :  { %26 = dma.hbm_to_vmem [thread:$0]  %s6833_s0, 1024, %s21_s12, [#allocation5], %s5709_s1, %s5709_s1, %s5710_s21  }
  0x25   :  { %s5711_s24 = smov [#allocation9]   ;;  %s5712_s26 = smov [#allocation10]  }
  0x26   :  { %s44_s25 = sshll.u32 %s5711_s24, 4  ;;  %s58_s27 = sshll.u32 %s5712_s26, 4  ;;  %s45_s25 = int_to_ptr.vmem [resolvable:$true] %s44_s25  ;;  %s5780_s27 = int_to_ptr.vmem [resolvable:$true] %s58_s27 }
  0x27   :  { %s5631_s30 = scalar_lea.hbm %s6835_s2, 16384 }
  0x28   :  { %p5632_p2 = scmp.ne.s32.totalorder %s6835_s2, %s5631_s30  ;;  %p5635_p3 = scmp.lt.u32.totalorder %s5631_s30, %s6835_s2 }
  0x2a   :  { %p5637_p4 = pnand %p5635_p3, %p5632_p2 }
  0x2c   :  { %5640 = shalt.err (!%p5637_p4)
}
  0x2d   :  { %s5641_s0 = scalar_lea.vmem %s45_s25, 16384  ;;  %p5646_p6 = scmp.lt.s32.totalorder %s45_s25, %s45_s25 }
  0x2e   :  { %p5642_p5 = scmp.ne.s32.totalorder %s45_s25, %s5641_s0  ;;  %p5647_p7 = scmp.lt.s32.totalorder %s5641_s0, %s5641_s0 }
  0x30   :  { %p5648_p8 = por %p5647_p7, %p5646_p6 }
  0x32   :  { %p5649_p9 = pnand %p5648_p8, %p5642_p5 }
  0x34   :  { %5652 = shalt.err (!%p5649_p9)
}
  0x35   :  { %50 = dma.hbm_to_vmem [thread:$0]  %s6835_s2, 16384, %s45_s25, [#allocation8], %s5706_s7, %s5706_s7, %s5707_s8  }
  0x36   :  { %s5653_s17 = scalar_lea.hbm %s6837_s4, 2048 }
  0x37   :  { %p5654_p10 = scmp.ne.s32.totalorder %s6837_s4, %s5653_s17  ;;  %p5657_p11 = scmp.lt.u32.totalorder %s5653_s17, %s6837_s4 }
  0x39   :  { %p5659_p12 = pnand %p5657_p11, %p5654_p10 }
  0x3b   :  { %5662 = shalt.err (!%p5659_p12)
}
  0x3c   :  { %s5663_s23 = scalar_lea.vmem %s5780_s27, 2048  ;;  %p5668_p0 = scmp.lt.s32.totalorder %s5780_s27, %s5780_s27 }
  0x3d   :  { %p5664_p13 = scmp.ne.s32.totalorder %s5780_s27, %s5663_s23  ;;  %p5669_p1 = scmp.lt.s32.totalorder %s5663_s23, %s5663_s23 }
  0x3f   :  { %p5670_p2 = por %p5669_p1, %p5668_p0 }
  0x41   :  { %p5671_p3 = pnand %p5670_p2, %p5664_p13 }
  0x43   :  { %5674 = shalt.err (!%p5671_p3)
}
  0x44   :  { %64 = dma.hbm_to_vmem [thread:$0]  %s6837_s4, 2048, %s5780_s27, [#allocation11], %s5709_s1, %s5709_s1, %s5710_s21  }
  0x45   :  { %5697 = dma.done.wait [#allocation5], 1024  }
  0x46   :  { %5698 = vsyncadd [#allocation5], 4294966272 }
  0x47   :  { %5699 = dma.done.wait [#allocation8], 32768  }
  0x48   :  { %5700 = vsyncadd [#allocation8], 4294934528 }
  0x49   :  { %5701 = dma.done.wait [#allocation11], 2048  }
  0x4a   :  { %5702 = vsyncadd [#allocation11], 4294965248  ;;  %v6843_v0 = vmov 0.0   ;;  %v88_v1 = vld [vmem:[#allocation7 + $0x8] sm:$0xff]  ;;  %v87_v3 = vld [vmem:[#allocation7] sm:$0xff] }
  0x4b   :  { %237 = vmatprep.mubr.f32.mxu1 %v6843_v0  ;;  %563 = vmatprep.mubr.f32.mxu0 %v6843_v0  ;;  %v92_v2 = vld [vmem:[#allocation7 + $0x28] sm:$0xff]  ;;  %v91_v5 = vld [vmem:[#allocation7 + $0x20] sm:$0xff] }
  0x4c   :  { %v4009_v4 = vpack.c.bf16 %v92_v2, %v88_v1  ;;  %v432_v6 = vld [vmem:[#allocation9 + $0x8] sm:$0xff]  ;;  %v4011_v8 = vpack.c.bf16 %v91_v5, %v87_v3  ;;  %v431_v10 = vld [vmem:[#allocation9] sm:$0xff] }
  0x4d   :  { %v436_v7 = vld [vmem:[#allocation9 + $0x28] sm:$0xff]  ;;  %v435_v11 = vld [vmem:[#allocation9 + $0x20] sm:$0xff] }
  0x4e   :  { %v5819_v9 = vpack.c.bf16 %v436_v7, %v432_v6  ;;  %v96_v12 = vld [vmem:[#allocation7 + $0x48] sm:$0xff]  ;;  %4010 = vmatprep.subr.bf16.mxu1 %v4009_v4  ;;  %v5821_v13 = vpack.c.bf16 %v435_v11, %v431_v10  ;;  %v95_v15 = vld [vmem:[#allocation7 + $0x40] sm:$0xff] }
  0x4f   :  { %v100_v14 = vld [vmem:[#allocation7 + $0x68] sm:$0xff]  ;;  %v99_v16 = vld [vmem:[#allocation7 + $0x60] sm:$0xff]  ;;  %4012 = vmatpush1.bf16.msra.mxu1 %v4011_v8 }
  0x50   :  { %4074 = vmatprep.subr.bf16.mxu0 %v5819_v9  ;;  %v4013_v17 = vpack.c.bf16 %v100_v14, %v96_v12  ;;  %v4015_v18 = vpack.c.bf16 %v99_v16, %v95_v15  ;;  %v440_v19 = vld [vmem:[#allocation9 + $0x48] sm:$0xff]  ;;  %v439_v21 = vld [vmem:[#allocation9 + $0x40] sm:$0xff] }
  0x51   :  { %v444_v20 = vld [vmem:[#allocation9 + $0x68] sm:$0xff]  ;;  %4076 = vmatpush1.bf16.msra.mxu0 %v5821_v13  ;;  %v443_v23 = vld [vmem:[#allocation9 + $0x60] sm:$0xff] }
  0x52   :  { %v5825_v22 = vpack.c.bf16 %v444_v20, %v440_v19  ;;  %v104_v24 = vld [vmem:[#allocation7 + $0x88] sm:$0xff]  ;;  %4014 = vmatprep.subr.bf16.mxu1 %v4013_v17  ;;  %v5827_v26 = vpack.c.bf16 %v443_v23, %v439_v21  ;;  %v103_v28 = vld [vmem:[#allocation7 + $0x80] sm:$0xff] }
  0x53   :  { %v108_v25 = vld [vmem:[#allocation7 + $0xa8] sm:$0xff]  ;;  %v107_v29 = vld [vmem:[#allocation7 + $0xa0] sm:$0xff]  ;;  %4016 = vmatpush1.bf16.msra.mxu1 %v4015_v18 }
  0x54   :  { %v4017_v27 = vpack.c.bf16 %v108_v25, %v104_v24  ;;  %v448_v30 = vld [vmem:[#allocation9 + $0x88] sm:$0xff]  ;;  %4078 = vmatprep.subr.bf16.mxu0 %v5825_v22  ;;  %v447_v32 = vld [vmem:[#allocation9 + $0x80] sm:$0xff]  ;;  %v4019_v34 = vpack.c.bf16 %v107_v29, %v103_v28 }
  0x55   :  { %v452_v31 = vld [vmem:[#allocation9 + $0xa8] sm:$0xff]  ;;  %v451_v33 = vld [vmem:[#allocation9 + $0xa0] sm:$0xff]  ;;  %4080 = vmatpush1.bf16.msra.mxu0 %v5827_v26 }
  0x56   :  { %v5830_v35 = vpack.c.bf16 %v452_v31, %v448_v30  ;;  %v112_v36 = vld [vmem:[#allocation7 + $0xc8] sm:$0xff]  ;;  %v111_v38 = vld [vmem:[#allocation7 + $0xc0] sm:$0xff]  ;;  %4018 = vmatprep.subr.bf16.mxu1 %v4017_v27  ;;  %v5833_v39 = vpack.c.bf16 %v451_v33, %v447_v32 }
  0x57   :  { %v116_v37 = vld [vmem:[#allocation7 + $0xe8] sm:$0xff]  ;;  %v115_v41 = vld [vmem:[#allocation7 + $0xe0] sm:$0xff]  ;;  %4020 = vmatpush1.bf16.msra.mxu1 %v4019_v34 }
  0x58   :  { %v4021_v40 = vpack.c.bf16 %v116_v37, %v112_v36  ;;  %v456_v42 = vld [vmem:[#allocation9 + $0xc8] sm:$0xff]  ;;  %4082 = vmatprep.subr.bf16.mxu0 %v5830_v35  ;;  %v455_v45 = vld [vmem:[#allocation9 + $0xc0] sm:$0xff]  ;;  %v4023_v49 = vpack.c.bf16 %v115_v41, %v111_v38  ;;  %v90_v37 = vld [vmem:[#allocation7 + $0x18] sm:$0xff] }
  0x59   :  { %v460_v43 = vld [vmem:[#allocation9 + $0xe8] sm:$0xff]  ;;  %v459_v46 = vld [vmem:[#allocation9 + $0xe0] sm:$0xff]  ;;  %4084 = vmatpush1.bf16.msra.mxu0 %v5833_v39  ;;  %v94_v38 = vld [vmem:[#allocation7 + $0x38] sm:$0xff] }
  0x5a   :  { %v5836_v44 = vpack.c.bf16 %v460_v43, %v456_v42  ;;  %v120_v47 = vld [vmem:[#allocation7 + $0x108] sm:$0xff]  ;;  %4022 = vmatprep.subr.bf16.mxu1 %v4021_v40  ;;  %v5839_v52 = vpack.c.bf16 %v459_v46, %v455_v45  ;;  %v119_v54 = vld [vmem:[#allocation7 + $0x100] sm:$0xff]  ;;  %v4041_v42 = vpack.c.bf16 %v94_v38, %v90_v37  ;;  %v89_v43 = vld [vmem:[#allocation7 + $0x10] sm:$0xff] }
  0x5b   :  { %v124_v48 = vld [vmem:[#allocation7 + $0x128] sm:$0xff]  ;;  %v123_v55 = vld [vmem:[#allocation7 + $0x120] sm:$0xff]  ;;  %4024 = vmatpush1.bf16.msra.mxu1 %v4023_v49  ;;  %v93_v45 = vld [vmem:[#allocation7 + $0x30] sm:$0xff] }
  0x5c   :  { %v464_v50 = vld [vmem:[#allocation9 + $0x108] sm:$0xff]  ;;  %v4025_v53 = vpack.c.bf16 %v124_v48, %v120_v47  ;;  %v463_v56 = vld [vmem:[#allocation9 + $0x100] sm:$0xff]  ;;  %4086 = vmatprep.subr.bf16.mxu0 %v5836_v44  ;;  %v4027_v63 = vpack.c.bf16 %v123_v55, %v119_v54  ;;  %v98_v46 = vld [vmem:[#allocation7 + $0x58] sm:$0xff]  ;;  %v4043_v49 = vpack.c.bf16 %v93_v45, %v89_v43 }
  0x5d   :  { %v468_v51 = vld [vmem:[#allocation9 + $0x128] sm:$0xff]  ;;  %v467_v58 = vld [vmem:[#allocation9 + $0x120] sm:$0xff]  ;;  %4088 = vmatpush1.bf16.msra.mxu0 %v5839_v52  ;;  %v102_v47 = vld [vmem:[#allocation7 + $0x78] sm:$0xff] }
  0x5e   :  { %v5842_v57 = vpack.c.bf16 %v468_v51, %v464_v50  ;;  %v128_v59 = vld [vmem:[#allocation7 + $0x148] sm:$0xff]  ;;  %4026 = vmatprep.subr.bf16.mxu1 %v4025_v53  ;;  %v5845_v1 = vpack.c.bf16 %v467_v58, %v463_v56  ;;  %v127_v3 = vld [vmem:[#allocation7 + $0x140] sm:$0xff]  ;;  %v4045_v50 = vpack.c.bf16 %v102_v47, %v98_v46  ;;  %v97_v51 = vld [vmem:[#allocation7 + $0x50] sm:$0xff] }
  0x5f   :  { %v132_v60 = vld [vmem:[#allocation7 + $0x168] sm:$0xff]  ;;  %v131_v4 = vld [vmem:[#allocation7 + $0x160] sm:$0xff]  ;;  %4028 = vmatpush1.bf16.msra.mxu1 %v4027_v63  ;;  %v101_v53 = vld [vmem:[#allocation7 + $0x70] sm:$0xff] }
  0x60   :  { %v472_v61 = vld [vmem:[#allocation9 + $0x148] sm:$0xff]  ;;  %v4029_v2 = vpack.c.bf16 %v132_v60, %v128_v59  ;;  %v471_v5 = vld [vmem:[#allocation9 + $0x140] sm:$0xff]  ;;  %4090 = vmatprep.subr.bf16.mxu0 %v5842_v57  ;;  %v4031_v14 = vpack.c.bf16 %v131_v4, %v127_v3  ;;  %v106_v54 = vld [vmem:[#allocation7 + $0x98] sm:$0xff]  ;;  %v4047_v58 = vpack.c.bf16 %v101_v53, %v97_v51 }
  0x61   :  { %v476_v62 = vld [vmem:[#allocation9 + $0x168] sm:$0xff]  ;;  %v475_v7 = vld [vmem:[#allocation9 + $0x160] sm:$0xff]  ;;  %4092 = vmatpush1.bf16.msra.mxu0 %v5845_v1  ;;  %v110_v55 = vld [vmem:[#allocation7 + $0xb8] sm:$0xff] }
  0x62   :  { %v5848_v6 = vpack.c.bf16 %v476_v62, %v472_v61  ;;  %v136_v8 = vld [vmem:[#allocation7 + $0x188] sm:$0xff]  ;;  %4030 = vmatprep.subr.bf16.mxu1 %v4029_v2  ;;  %v5851_v15 = vpack.c.bf16 %v475_v7, %v471_v5  ;;  %v135_v17 = vld [vmem:[#allocation7 + $0x180] sm:$0xff]  ;;  %v4049_v59 = vpack.c.bf16 %v110_v55, %v106_v54  ;;  %v105_v60 = vld [vmem:[#allocation7 + $0x90] sm:$0xff] }
  0x63   :  { %v140_v10 = vld [vmem:[#allocation7 + $0x1a8] sm:$0xff]  ;;  %v139_v18 = vld [vmem:[#allocation7 + $0x1a0] sm:$0xff]  ;;  %4032 = vmatpush1.bf16.msra.mxu1 %v4031_v14  ;;  %v109_v61 = vld [vmem:[#allocation7 + $0xb0] sm:$0xff] }
  0x64   :  { %v480_v11 = vld [vmem:[#allocation9 + $0x188] sm:$0xff]  ;;  %v4033_v16 = vpack.c.bf16 %v140_v10, %v136_v8  ;;  %v479_v19 = vld [vmem:[#allocation9 + $0x180] sm:$0xff]  ;;  %4094 = vmatprep.subr.bf16.mxu0 %v5848_v6  ;;  %v4035_v28 = vpack.c.bf16 %v139_v18, %v135_v17  ;;  %v114_v62 = vld [vmem:[#allocation7 + $0xd8] sm:$0xff]  ;;  %v4051_v3 = vpack.c.bf16 %v109_v61, %v105_v60 }
  0x65   :  { %v484_v12 = vld [vmem:[#allocation9 + $0x1a8] sm:$0xff]  ;;  %v483_v21 = vld [vmem:[#allocation9 + $0x1a0] sm:$0xff]  ;;  %4096 = vmatpush1.bf16.msra.mxu0 %v5851_v15  ;;  %v118_v63 = vld [vmem:[#allocation7 + $0xf8] sm:$0xff] }
  0x66   :  { %v5854_v20 = vpack.c.bf16 %v484_v12, %v480_v11  ;;  %v144_v23 = vld [vmem:[#allocation7 + $0x1c8] sm:$0xff]  ;;  %4034 = vmatprep.subr.bf16.mxu1 %v4033_v16  ;;  %v5857_v29 = vpack.c.bf16 %v483_v21, %v479_v19  ;;  %v143_v31 = vld [vmem:[#allocation7 + $0x1c0] sm:$0xff]  ;;  %v5880_v2 = vld [vmem:[#allocation4 + $0x10] sm:$0xff]  ;;  %v4053_v4 = vpack.c.bf16 %v118_v63, %v114_v62 }
  0x67   :  { %v148_v24 = vld [vmem:[#allocation7 + $0x1e8] sm:$0xff]  ;;  %v147_v32 = vld [vmem:[#allocation7 + $0x1e0] sm:$0xff]  ;;  %4036 = vmatpush1.bf16.msra.mxu1 %v4035_v28  ;;  %v113_v5 = vld [vmem:[#allocation7 + $0xd0] sm:$0xff] }
  0x68   :  { %v488_v25 = vld [vmem:[#allocation9 + $0x1c8] sm:$0xff]  ;;  %v4037_v30 = vpack.c.bf16 %v148_v24, %v144_v23  ;;  %v487_v33 = vld [vmem:[#allocation9 + $0x1c0] sm:$0xff]  ;;  %4098 = vmatprep.subr.bf16.mxu0 %v5854_v20  ;;  %v4039_v40 = vpack.c.bf16 %v147_v32, %v143_v31  ;;  %v117_v7 = vld [vmem:[#allocation7 + $0xf0] sm:$0xff] }
  0x69   :  { %v492_v27 = vld [vmem:[#allocation9 + $0x1e8] sm:$0xff]  ;;  %v491_v36 = vld [vmem:[#allocation9 + $0x1e0] sm:$0xff]  ;;  %4100 = vmatpush1.bf16.msra.mxu0 %v5857_v29  ;;  %v122_v8 = vld [vmem:[#allocation7 + $0x118] sm:$0xff]  ;;  %v4055_v12 = vpack.c.bf16 %v117_v7, %v113_v5 }
  0x6a   :  { %v5860_v34 = vpack.c.bf16 %v492_v27, %v488_v25  ;;  %4038 = vmatprep.subr.bf16.mxu1 %v4037_v30  ;;  %v5863_v41 = vpack.c.bf16 %v491_v36, %v487_v33  ;;  %v5866_v48 = vld [vmem:[#allocation4] sm:$0xff]  ;;  %v5872_v56 = vld [vmem:[#allocation4 + $0x8] sm:$0xff]  ;;  %v126_v10 = vld [vmem:[#allocation7 + $0x138] sm:$0xff] }
  0x6b   :  { %4040 = vmatpush1.bf16.msra.mxu1 %v4039_v40  ;;  %v5886_v11 = vld [vmem:[#allocation4 + $0x18] sm:$0xff]  ;;  %v4057_v14 = vpack.c.bf16 %v126_v10, %v122_v8  ;;  %v121_v16 = vld [vmem:[#allocation7 + $0x110] sm:$0xff]  ;;  %v5892_v21 = vld [vmem:[#allocation4 + $0x20] sm:$0xff] }
  0x6c   :  { %4102 = vmatprep.subr.bf16.mxu0 %v5860_v34  ;;  %4042 = vmatprep.subr.bf16.mxu1 %v4041_v42  ;;  %v125_v17 = vld [vmem:[#allocation7 + $0x130] sm:$0xff]  ;;  %v130_v18 = vld [vmem:[#allocation7 + $0x158] sm:$0xff]  ;;  %v5898_v31 = vld [vmem:[#allocation4 + $0x28] sm:$0xff] }
  0x6d   :  { %4104 = vmatpush1.bf16.msra.mxu0 %v5863_v41  ;;  %v134_v19 = vld [vmem:[#allocation7 + $0x178] sm:$0xff]  ;;  %v4059_v23 = vpack.c.bf16 %v125_v17, %v121_v16  ;;  %v129_v25 = vld [vmem:[#allocation7 + $0x150] sm:$0xff] }
  0x6e   :  { %4138 = vmatprep.subr.bf16.mxu0 %v5819_v9  ;;  %238 = vmatmul.mubr.f32.vlgmr.msra.gmra.mrb[0].mxu1 %v5866_v48  ;;  %v4061_v24 = vpack.c.bf16 %v134_v19, %v130_v18  ;;  %v133_v27 = vld [vmem:[#allocation7 + $0x170] sm:$0xff]  ;;  %v138_v28 = vld [vmem:[#allocation7 + $0x198] sm:$0xff] }
  0x6f   :  { %4044 = vmatpush1.bf16.msra.mxu1 %v4043_v49  ;;  %243 = vmatprep.mubr.f32.mxu1 %v6843_v0  ;;  %v142_v30 = vld [vmem:[#allocation7 + $0x1b8] sm:$0xff]  ;;  %v4063_v32 = vpack.c.bf16 %v133_v27, %v129_v25  ;;  %v137_v36 = vld [vmem:[#allocation7 + $0x190] sm:$0xff] }
  0x70   :  { %564 = vmatmul.mubr.f32.vlgmr.msra.gmra.mrb[0].mxu0 %v6843_v0  ;;  %4046 = vmatprep.subr.bf16.mxu1 %v4045_v50  ;;  %v4065_v33 = vpack.c.bf16 %v142_v30, %v138_v28  ;;  %v141_v37 = vld [vmem:[#allocation7 + $0x1b0] sm:$0xff]  ;;  %v146_v38 = vld [vmem:[#allocation7 + $0x1d8] sm:$0xff] }
  0x71   :  { %4140 = vmatpush1.bf16.msra.mxu0 %v5821_v13  ;;  %739 = vmatprep.mubr.f32.mxu0 %v6843_v0  ;;  %v150_v40 = vld [vmem:[#allocation7 + $0x1f8] sm:$0xff]  ;;  %v5904_v42 = vld [vmem:[#allocation4 + $0x30] sm:$0xff]  ;;  %v4067_v43 = vpack.c.bf16 %v141_v37, %v137_v36 }
  0x72   :  { %244 = vmatmul.mubr.f32.gmra.mrb[2].mxu1 %v5872_v56  ;;  %4142 = vmatprep.subr.bf16.mxu0 %v5825_v22  ;;  %v4069_v45 = vpack.c.bf16 %v150_v40, %v146_v38  ;;  %v145_v46 = vld [vmem:[#allocation7 + $0x1d0] sm:$0xff]  ;;  %v434_v49 = vld [vmem:[#allocation9 + $0x18] sm:$0xff] }
  0x73   :  { %4048 = vmatpush1.bf16.msra.mxu1 %v4047_v58  ;;  %249 = vmatprep.mubr.f32.mxu1 %v6843_v0  ;;  %v149_v47 = vld [vmem:[#allocation7 + $0x1f0] sm:$0xff]  ;;  %v438_v50 = vld [vmem:[#allocation9 + $0x38] sm:$0xff] }
  0x74   :  { %4050 = vmatprep.subr.bf16.mxu1 %v4049_v59  ;;  %v5910_v51 = vld [vmem:[#allocation4 + $0x38] sm:$0xff]  ;;  %v4071_v53 = vpack.c.bf16 %v149_v47, %v145_v46  ;;  %v5912_v54 = vpack.c.bf16 %v438_v50, %v434_v49  ;;  %v433_v55 = vld [vmem:[#allocation9 + $0x10] sm:$0xff] }
  0x75   :  { %4144 = vmatpush1.bf16.msra.mxu0 %v5827_v26  ;;  %v437_v58 = vld [vmem:[#allocation9 + $0x30] sm:$0xff]  ;;  %v442_v59 = vld [vmem:[#allocation9 + $0x58] sm:$0xff] }
  0x76   :  { %250 = vmatmul.mubr.f32.gmra.mrb[4].mxu1 %v5880_v2  ;;  %4146 = vmatprep.subr.bf16.mxu0 %v5830_v35  ;;  %v446_v60 = vld [vmem:[#allocation9 + $0x78] sm:$0xff]  ;;  %v5918_v61 = vpack.c.bf16 %v437_v58, %v433_v55  ;;  %v441_v63 = vld [vmem:[#allocation9 + $0x50] sm:$0xff] }
  0x77   :  { %4052 = vmatpush1.bf16.msra.mxu1 %v4051_v3  ;;  %255 = vmatprep.mubr.f32.mxu1 %v6843_v0  ;;  %v5921_v62 = vpack.c.bf16 %v446_v60, %v442_v59  ;;  %v445_v3 = vld [vmem:[#allocation9 + $0x70] sm:$0xff]  ;;  %v454_v5 = vld [vmem:[#allocation9 + $0xb8] sm:$0xff]  ;;  %v151_v59 = vld [vmem:[%s6836_s3] sm:$0xf] }
  0x78   :  { %4054 = vmatprep.subr.bf16.mxu1 %v4053_v4  ;;  %v450_v4 = vld [vmem:[#allocation9 + $0x98] sm:$0xff]  ;;  %v5928_v7 = vpack.c.bf16 %v445_v3, %v441_v63  ;;  %v449_v10 = vld [vmem:[#allocation9 + $0x90] sm:$0xff] }
  0x79   :  { %4148 = vmatpush1.bf16.msra.mxu0 %v5833_v39  ;;  %v5931_v8 = vpack.c.bf16 %v454_v5, %v450_v4  ;;  %v462_v16 = vld [vmem:[#allocation9 + $0xf8] sm:$0xff]  ;;  %v457_v18 = vld [vmem:[#allocation9 + $0xd0] sm:$0xff] }
  0x7a   :  { %256 = vmatmul.mubr.f32.gmra.mrb[6].mxu1 %v5886_v11  ;;  %4150 = vmatprep.subr.bf16.mxu0 %v5836_v44  ;;  %v461_v19 = vld [vmem:[#allocation9 + $0xf0] sm:$0xff]  ;;  %v474_v30 = vld [vmem:[#allocation9 + $0x158] sm:$0xff] }
  0x7b   :  { %4056 = vmatpush1.bf16.msra.mxu1 %v4055_v12  ;;  %261 = vmatprep.mubr.f32.mxu1 %v6843_v0  ;;  %v453_v12 = vld [vmem:[#allocation9 + $0xb0] sm:$0xff]  ;;  %v482_v38 = vld [vmem:[#allocation9 + $0x198] sm:$0xff] }
  0x7c   :  { %4058 = vmatprep.subr.bf16.mxu1 %v4057_v14  ;;  %v458_v14 = vld [vmem:[#allocation9 + $0xd8] sm:$0xff]  ;;  %v465_v27 = vld [vmem:[#allocation9 + $0x110] sm:$0xff] }
  0x7d   :  { %4152 = vmatpush1.bf16.msra.mxu0 %v5839_v52  ;;  %v5939_v17 = vpack.c.bf16 %v462_v16, %v458_v14  ;;  %v469_v28 = vld [vmem:[#allocation9 + $0x130] sm:$0xff]  ;;  %v486_v40 = vld [vmem:[#allocation9 + $0x1b8] sm:$0xff] }
  0x7e   :  { %262 = vmatmul.mubr.f32.gmra.mrb[8].mxu1 %v5892_v21  ;;  %4154 = vmatprep.subr.bf16.mxu0 %v5842_v57  ;;  %v473_v36 = vld [vmem:[#allocation9 + $0x150] sm:$0xff]  ;;  %v490_v47 = vld [vmem:[#allocation9 + $0x1d8] sm:$0xff] }
  0x7f   :  { %4060 = vmatpush1.bf16.msra.mxu1 %v4059_v23  ;;  %267 = vmatprep.mubr.f32.mxu1 %v6843_v0  ;;  %v466_v23 = vld [vmem:[#allocation9 + $0x118] sm:$0xff]  ;;  %v477_v37 = vld [vmem:[#allocation9 + $0x170] sm:$0xff] }
  0x80   :  { %4062 = vmatprep.subr.bf16.mxu1 %v4061_v24  ;;  %v470_v24 = vld [vmem:[#allocation9 + $0x138] sm:$0xff]  ;;  %v485_v46 = vld [vmem:[#allocation9 + $0x1b0] sm:$0xff] }
  0x81   :  { %4156 = vmatpush1.bf16.msra.mxu0 %v5845_v1  ;;  %v5947_v25 = vpack.c.bf16 %v470_v24, %v466_v23  ;;  %v494_v49 = vld [vmem:[#allocation9 + $0x1f8] sm:$0xff]  ;;  %v493_v55 = vld [vmem:[#allocation9 + $0x1f0] sm:$0xff] }
  0x82   :  { %268 = vmatmul.mubr.f32.gmra.mrb[10].mxu1 %v5898_v31  ;;  %4158 = vmatprep.subr.bf16.mxu0 %v5848_v6  ;;  %v5971_v50 = vpack.c.bf16 %v494_v49, %v490_v47 }
  0x83   :  { %4064 = vmatpush1.bf16.msra.mxu1 %v4063_v32  ;;  %273 = vmatprep.mubr.f32.mxu1 %v6843_v0  ;;  %v478_v32 = vld [vmem:[#allocation9 + $0x178] sm:$0xff] }
  0x84   :  { %4066 = vmatprep.subr.bf16.mxu1 %v4065_v33  ;;  %v5955_v33 = vpack.c.bf16 %v478_v32, %v474_v30 }
  0x85   :  { %4160 = vmatpush1.bf16.msra.mxu0 %v5851_v15 }
  0x86   :  { %274 = vmatmul.mubr.f32.gmra.mrb[12].mxu1 %v5904_v42  ;;  %4162 = vmatprep.subr.bf16.mxu0 %v5854_v20 }
  0x87   :  { %4068 = vmatpush1.bf16.msra.mxu1 %v4067_v43  ;;  %279 = vmatprep.mubr.f32.mxu1 %v6843_v0  ;;  %v5963_v43 = vpack.c.bf16 %v486_v40, %v482_v38 }
  0x88   :  { %4070 = vmatprep.subr.bf16.mxu1 %v4069_v45  ;;  %v481_v45 = vld [vmem:[#allocation9 + $0x190] sm:$0xff] }
  0x89   :  { %4164 = vmatpush1.bf16.msra.mxu0 %v5857_v29 }
  0x8a   :  { %280 = vmatmul.mubr.f32.gmra.mrb[14].mxu1 %v5910_v51  ;;  %4166 = vmatprep.subr.bf16.mxu0 %v5860_v34 }
  0x8b   :  { %4072 = vmatpush1.bf16.msra.mxu1 %v4071_v53  ;;  %350 = vmatprep.mubr.f32.mxu1 %v6843_v0  ;;  %v489_v53 = vld [vmem:[#allocation9 + $0x1d0] sm:$0xff] }
  0x8c   :  { %4106 = vmatprep.subr.bf16.mxu1 %v5912_v54  ;;  %v5976_v58 = vpack.c.bf16 %v493_v55, %v489_v53 }
  0x8d   :  { %4168 = vmatpush1.bf16.msra.mxu0 %v5863_v41 }
  0x8e   :  { %351 = vmatmul.mubr.f32.vlgmr.msra.gmra.mrb[16].mxu1 %v5866_v48  ;;  %4202 = vmatprep.subr.bf16.mxu0 %v5819_v9  ;;  %v5936_v48 = vpack.c.bf16 %v453_v12, %v449_v10 }
  0x8f   :  { %4108 = vmatpush1.bf16.msra.mxu1 %v5918_v61  ;;  %356 = vmatprep.mubr.f32.mxu1 %v6843_v0 }
  0x90   :  { %4110 = vmatprep.subr.bf16.mxu1 %v5921_v62 }
  0x92   :  { %357 = vmatmul.mubr.f32.gmra.mrb[18].mxu1 %v5872_v56  ;;  %v5944_v56 = vpack.c.bf16 %v461_v19, %v457_v18 }
  0x93   :  { %4112 = vmatpush1.bf16.msra.mxu1 %v5928_v7  ;;  %362 = vmatprep.mubr.f32.mxu1 %v6843_v0 }
  0x94   :  { %4114 = vmatprep.subr.bf16.mxu1 %v5931_v8 }
  0x96   :  { %363 = vmatmul.mubr.f32.gmra.mrb[20].mxu1 %v5880_v2  ;;  %v5952_v2 = vpack.c.bf16 %v469_v28, %v465_v27 }
  0x97   :  { %4116 = vmatpush1.bf16.msra.mxu1 %v5936_v48  ;;  %368 = vmatprep.mubr.f32.mxu1 %v6843_v0 }
  0x98   :  { %4118 = vmatprep.subr.bf16.mxu1 %v5939_v17 }
  0x9a   :  { %369 = vmatmul.mubr.f32.gmra.mrb[22].mxu1 %v5886_v11  ;;  %v5960_v11 = vpack.c.bf16 %v477_v37, %v473_v36 }
  0x9b   :  { %4120 = vmatpush1.bf16.msra.mxu1 %v5944_v56  ;;  %374 = vmatprep.mubr.f32.mxu1 %v6843_v0 }
  0x9c   :  { %4122 = vmatprep.subr.bf16.mxu1 %v5947_v25 }
  0x9e   :  { %375 = vmatmul.mubr.f32.gmra.mrb[24].mxu1 %v5892_v21  ;;  %v5968_v21 = vpack.c.bf16 %v485_v46, %v481_v45 }
  0x9f   :  { %4124 = vmatpush1.bf16.msra.mxu1 %v5952_v2  ;;  %380 = vmatprep.mubr.f32.mxu1 %v6843_v0 }
  0xa0   :  { %4126 = vmatprep.subr.bf16.mxu1 %v5955_v33 }
  0xa2   :  { %381 = vmatmul.mubr.f32.gmra.mrb[26].mxu1 %v5898_v31  ;;  %v153_v31 = vlaneseq }
  0xa3   :  { %4128 = vmatpush1.bf16.msra.mxu1 %v5960_v11  ;;  %386 = vmatprep.mubr.f32.mxu1 %v6843_v0 }
  0xa4   :  { %4130 = vmatprep.subr.bf16.mxu1 %v5963_v43 }
  0xa6   :  { %387 = vmatmul.mubr.f32.gmra.mrb[28].mxu1 %v5904_v42  ;;  %v6001_v42 = vshrl.u32 %v153_v31, 7 }
  0xa7   :  { %4132 = vmatpush1.bf16.msra.mxu1 %v5968_v21  ;;  %392 = vmatprep.mubr.f32.mxu1 %v6843_v0 }
  0xa8   :  { %4134 = vmatprep.subr.bf16.mxu1 %v5971_v50  ;;  %6848 = vst [vmem:[#allocation17_spill] sm:$0xff] %v6001_v42  ;;  %v6840_v60 = vsub.s32 1, %v6001_v42 }
  0xaa   :  { %393 = vmatmul.mubr.f32.gmra.mrb[30].mxu1 %v5910_v51  ;;  %v6842_v51 = vsub.s32 0, %v6001_v42  ;;  %v160_v3 = vrot.slane %v151_v59, %v6840_v60 }
  0xab   :  { %4136 = vmatpush1.bf16.msra.mxu1 %v5976_v58  ;;  %634 = vmatprep.mubr.f32.mxu1 %v6843_v0 }
  0xac   :  { %4170 = vmatprep.subr.bf16.mxu1 %v5912_v54  ;;  %v156_v63 = vrot.slane %v151_v59, %v6842_v51 }
  0xae   :  { %635 = vmatmul.mubr.f32.vlgmr.msra.gmra.mrb[16].mxu1 %v6843_v0 }
  0xaf   :  { %4172 = vmatpush1.bf16.msra.mxu1 %v5918_v61  ;;  %810 = vmatprep.mubr.f32.mxu1 %v6843_v0 }
  0xb0   :  { %4174 = vmatprep.subr.bf16.mxu1 %v5921_v62 }
  0xb3   :  { %4176 = vmatpush1.bf16.msra.mxu1 %v5928_v7 }
  0xb4   :  { %4178 = vmatprep.subr.bf16.mxu1 %v5931_v8 }
  0xb7   :  { %4180 = vmatpush1.bf16.msra.mxu1 %v5936_v48 }
  0xb8   :  { %4182 = vmatprep.subr.bf16.mxu1 %v5939_v17 }
  0xbb   :  { %4184 = vmatpush1.bf16.msra.mxu1 %v5944_v56 }
  0xbc   :  { %4186 = vmatprep.subr.bf16.mxu1 %v5947_v25 }
  0xbf   :  { %4188 = vmatpush1.bf16.msra.mxu1 %v5952_v2 }
  0xc0   :  { %4190 = vmatprep.subr.bf16.mxu1 %v5955_v33 }
  0xc3   :  { %4192 = vmatpush1.bf16.msra.mxu1 %v5960_v11 }
  0xc4   :  { %4194 = vmatprep.subr.bf16.mxu1 %v5963_v43 }
  0xc7   :  { %4196 = vmatpush1.bf16.msra.mxu1 %v5968_v21 }
  0xc8   :  { %4198 = vmatprep.subr.bf16.mxu1 %v5971_v50 }
  0xcb   :  { %4200 = vmatpush1.bf16.msra.mxu1 %v5976_v58 }
  0xcc   :  { %4234 = vmatprep.subr.bf16.mxu1 %v5912_v54 }
 0x141   :  { %v239_v4 = vpop.f32.mrb[0].mxu1 }
 0x142   :  { %v240_v5 = vadd.f32 %v239_v4, %v156_v63  ;;  %v241_v10 = vpop.f32.mrb[1].mxu1 }
 0x143   :  { %v565_v12 = vpop.f32.mrb[0].mxu0  ;;  %v242_v14 = vadd.f32 %v241_v10, %v160_v3 }
 0x144   :  { %v567_v16 = vpop.f32.mrb[1].mxu0  ;;  %v641_v18 = vadd.f32 %v565_v12, %v240_v5 }
 0x145   :  { %v642_v19 = vadd.f32 %v567_v16, %v242_v14  ;;  %v245_v23 = vpop.f32.mrb[2].mxu1 }
 0x146   :  { %v6012_v24 = vadd.f32 %v245_v23, %v156_v63  ;;  %v247_v27 = vpop.f32.mrb[3].mxu1 }
 0x147   :  { %v6014_v28 = vadd.f32 %v247_v27, %v160_v3 }
 0x149   :  { %v251_v30 = vpop.f32.mrb[4].mxu1 }
 0x14a   :  { %v6016_v32 = vadd.f32 %v251_v30, %v156_v63  ;;  %v253_v36 = vpop.f32.mrb[5].mxu1 }
 0x14b   :  { %v6018_v37 = vadd.f32 %v253_v36, %v160_v3 }
 0x14d   :  { %v257_v38 = vpop.f32.mrb[6].mxu1 }
 0x14e   :  { %v6020_v40 = vadd.f32 %v257_v38, %v156_v63  ;;  %v259_v45 = vpop.f32.mrb[7].mxu1 }
 0x14f   :  { %v6022_v46 = vadd.f32 %v259_v45, %v160_v3  ;;  %v3892_v45 = vmul.f32 -1.442695, %v642_v19 }
 0x151   :  { %v263_v47 = vpop.f32.mrb[8].mxu1  ;;  %5331 = vpow2.f32 %v3892_v45 }
 0x152   :  { %v6024_v49 = vadd.f32 %v263_v47, %v156_v63  ;;  %v265_v53 = vpop.f32.mrb[9].mxu1  ;;  %v3891_v47 = vmul.f32 -1.442695, %v641_v18 }
 0x153   :  { %v6026_v55 = vadd.f32 %v265_v53, %v160_v3  ;;  %v6841_v53 = vsub.s32 2, %v6001_v42 }
 0x154   :  { %5333 = vpow2.f32 %v3891_v47 }
 0x155   :  { %v269_v31 = vpop.f32.mrb[10].mxu1 }
 0x156   :  { %v6028_v4 = vadd.f32 %v269_v31, %v156_v63  ;;  %v271_v5 = vpop.f32.mrb[11].mxu1  ;;  %v6847_v31 = vsub.s32 3, %v6001_v42 }
 0x157   :  { %v6030_v10 = vadd.f32 %v271_v5, %v160_v3 }
 0x159   :  { %v275_v12 = vpop.f32.mrb[12].mxu1 }
 0x15a   :  { %v6032_v14 = vadd.f32 %v275_v12, %v156_v63  ;;  %v277_v16 = vpop.f32.mrb[13].mxu1 }
 0x15b   :  { %v6034_v23 = vadd.f32 %v277_v16, %v160_v3  ;;  %v5332_v5 = vpop.eup %5331  ;;  %v6044_v16 = vrot.slane %v151_v59, %v6841_v53 }
 0x15c   :  { %v655_v60 = vadd.f32 1.0, %v5332_v5 }
 0x15d   :  { %v281_v27 = vpop.f32.mrb[14].mxu1 }
 0x15e   :  { %v6036_v30 = vadd.f32 %v281_v27, %v156_v63  ;;  %v283_v36 = vpop.f32.mrb[15].mxu1  ;;  %v5334_v12 = vpop.eup %5333  ;;  %v6048_v63 = vrot.slane %v151_v59, %v6847_v31  ;;  %5335 = vrcp.f32 %v655_v60 }
 0x15f   :  { %v6038_v38 = vadd.f32 %v283_v36, %v160_v3  ;;  %v654_v3 = vadd.f32 1.0, %v5334_v12 }
 0x160   :  { %6849 = vst [vmem:[#allocation18_spill] sm:$0xff] %v6036_v30 }
 0x161   :  { %6850 = vst [vmem:[#allocation19_spill] sm:$0xff] %v6038_v38  ;;  %5337 = vrcp.f32 %v654_v3 }
 0x168   :  { %v5336_v47 = vpop.eup %5335 }
 0x169   :  { %v664_v0 = vmul.f32 0.0, %v5336_v47 }
 0x16b   :  { %v5338_v53 = vpop.eup %5337 }
 0x181   :  { %v636_v19 = vpop.f32.mrb[16].mxu1 }
 0x182   :  { %v5225_v18 = vadd.f32 %v636_v19, %v6044_v16  ;;  %v638_v27 = vpop.f32.mrb[17].mxu1 }
 0x183   :  { %v5226_v36 = vadd.f32 %v638_v27, %v6048_v63 }
 0x184   :  { %v3893_v45 = vmul.f32 -1.442695, %v5225_v18 }
 0x185   :  { %5339 = vtanh.f32 %v5226_v36 }
 0x186   :  { %5341 = vpow2.f32 %v3893_v45 }
 0x18f   :  { %v5340_v51 = vpop.eup %5339 }
 0x190   :  { %v5342_v5 = vpop.eup %5341  ;;  %v665_v42 = vmul.f32 %v5340_v51, %v5338_v53 }
 0x191   :  { %v656_v59 = vadd.f32 1.0, %v5342_v5 }
 0x192   :  { %v6052_v31 = vadd.f32 %v665_v42, %v664_v0  ;;  %v6851_v0 = vmov 0.0  }
 0x193   :  { %5343 = vrcp.f32 %v656_v59 }
 0x194   :  { %5345 = vtanh.f32 %v6052_v31 }
 0x19d   :  { %v5344_v12 = vpop.eup %5343 }
 0x19e   :  { %v5346_v60 = vpop.eup %5345 }
 0x19f   :  { %v6055_v19 = vmul.f32 %v5346_v60, %v5344_v12 }
 0x1a1   :  { %740 = vmatmul.mubr.f32.vlgmr.msra.gmra.mrb[2].mxu0 %v6055_v19  ;;  %811 = vmatmul.mubr.f32.vlgmr.msra.gmra.mrb[18].mxu1 %v6055_v19 }
 0x1a2   :  { %4204 = vmatpush1.bf16.msra.mxu0 %v5821_v13  ;;  %4236 = vmatpush1.bf16.msra.mxu1 %v5918_v61 }
 0x1a3   :  { %4206 = vmatprep.subr.bf16.mxu0 %v5825_v22  ;;  %4238 = vmatprep.subr.bf16.mxu1 %v5921_v62 }
 0x1a4   :  { %916 = vmatprep.mubr.f32.mxu0 %v6851_v0  ;;  %987 = vmatprep.mubr.f32.mxu1 %v6851_v0 }
 0x1a6   :  { %4208 = vmatpush1.bf16.msra.mxu0 %v5827_v26  ;;  %4240 = vmatpush1.bf16.msra.mxu1 %v5928_v7 }
 0x1a7   :  { %4210 = vmatprep.subr.bf16.mxu0 %v5830_v35  ;;  %4242 = vmatprep.subr.bf16.mxu1 %v5931_v8 }
 0x1aa   :  { %4212 = vmatpush1.bf16.msra.mxu0 %v5833_v39  ;;  %4244 = vmatpush1.bf16.msra.mxu1 %v5936_v48 }
 0x1ab   :  { %4214 = vmatprep.subr.bf16.mxu0 %v5836_v44  ;;  %4246 = vmatprep.subr.bf16.mxu1 %v5939_v17 }
 0x1ae   :  { %4216 = vmatpush1.bf16.msra.mxu0 %v5839_v52  ;;  %4248 = vmatpush1.bf16.msra.mxu1 %v5944_v56 }
 0x1af   :  { %4218 = vmatprep.subr.bf16.mxu0 %v5842_v57  ;;  %4250 = vmatprep.subr.bf16.mxu1 %v5947_v25 }
 0x1b2   :  { %4220 = vmatpush1.bf16.msra.mxu0 %v5845_v1  ;;  %4252 = vmatpush1.bf16.msra.mxu1 %v5952_v2 }
 0x1b3   :  { %4222 = vmatprep.subr.bf16.mxu0 %v5848_v6  ;;  %4254 = vmatprep.subr.bf16.mxu1 %v5955_v33 }
 0x1b6   :  { %4224 = vmatpush1.bf16.msra.mxu0 %v5851_v15  ;;  %4256 = vmatpush1.bf16.msra.mxu1 %v5960_v11 }
 0x1b7   :  { %4226 = vmatprep.subr.bf16.mxu0 %v5854_v20  ;;  %4258 = vmatprep.subr.bf16.mxu1 %v5963_v43 }
 0x1ba   :  { %4228 = vmatpush1.bf16.msra.mxu0 %v5857_v29  ;;  %4260 = vmatpush1.bf16.msra.mxu1 %v5968_v21 }
 0x1bb   :  { %4230 = vmatprep.subr.bf16.mxu0 %v5860_v34  ;;  %4262 = vmatprep.subr.bf16.mxu1 %v5971_v50 }
 0x1be   :  { %4232 = vmatpush1.bf16.msra.mxu0 %v5863_v41  ;;  %4264 = vmatpush1.bf16.msra.mxu1 %v5976_v58 }
 0x1bf   :  { %4266 = vmatprep.subr.bf16.mxu0 %v5819_v9  ;;  %4298 = vmatprep.subr.bf16.mxu1 %v5912_v54 }
 0x274   :  { %v741_v42 = vpop.f32.mrb[2].mxu0  ;;  %v812_v51 = vpop.f32.mrb[18].mxu1 }
 0x275   :  { %v817_v53 = vadd.f32 %v741_v42, %v6012_v24  ;;  %v743_v3 = vpop.f32.mrb[3].mxu0  ;;  %v814_v18 = vpop.f32.mrb[19].mxu1  ;;  %v5227_v47 = vadd.f32 %v812_v51, %v6044_v16 }
 0x276   :  { %v818_v27 = vadd.f32 %v743_v3, %v6014_v28  ;;  %v5228_v5 = vadd.f32 %v814_v18, %v6048_v63 }
 0x277   :  { %v3894_v36 = vmul.f32 -1.442695, %v817_v53  ;;  %v3896_v59 = vmul.f32 -1.442695, %v5227_v47 }
 0x278   :  { %v3895_v45 = vmul.f32 -1.442695, %v818_v27 }
 0x279   :  { %5347 = vpow2.f32 %v3894_v36 }
 0x27a   :  { %5349 = vpow2.f32 %v3895_v45 }
 0x27b   :  { %5351 = vtanh.f32 %v5228_v5 }
 0x27c   :  { %5353 = vpow2.f32 %v3896_v59 }
 0x283   :  { %v5348_v12 = vpop.eup %5347 }
 0x284   :  { %v830_v60 = vadd.f32 1.0, %v5348_v12  ;;  %v5350_v38 = vpop.eup %5349 }
 0x285   :  { %v831_v24 = vadd.f32 1.0, %v5350_v38  ;;  %v5352_v42 = vpop.eup %5351 }
 0x286   :  { %5355 = vrcp.f32 %v830_v60  ;;  %v5354_v30 = vpop.eup %5353 }
 0x287   :  { %5357 = vrcp.f32 %v831_v24  ;;  %v832_v27 = vadd.f32 1.0, %v5354_v30 }
 0x289   :  { %5359 = vrcp.f32 %v832_v27 }
 0x290   :  { %v5356_v28 = vpop.eup %5355 }
 0x291   :  { %v841_v53 = vmul.f32 %v5356_v28, %v5352_v42  ;;  %v5358_v3 = vpop.eup %5357 }
 0x292   :  { %v840_v36 = vmul.f32 %v5358_v3, %v6052_v31 }
 0x293   :  { %v5360_v18 = vpop.eup %5359 }
 0x294   :  { %v6098_v51 = vadd.f32 %v841_v53, %v840_v36 }
 0x296   :  { %5361 = vtanh.f32 %v6098_v51 }
 0x2a0   :  { %v5362_v45 = vpop.eup %5361 }
 0x2a1   :  { %v6101_v47 = vmul.f32 %v5362_v45, %v5360_v18 }
 0x2a3   :  { %917 = vmatmul.mubr.f32.vlgmr.msra.gmra.mrb[4].mxu0 %v6101_v47  ;;  %988 = vmatmul.mubr.f32.vlgmr.msra.gmra.mrb[20].mxu1 %v6101_v47 }
 0x2a4   :  { %4268 = vmatpush1.bf16.msra.mxu0 %v5821_v13  ;;  %4300 = vmatpush1.bf16.msra.mxu1 %v5918_v61 }
 0x2a5   :  { %4270 = vmatprep.subr.bf16.mxu0 %v5825_v22  ;;  %4302 = vmatprep.subr.bf16.mxu1 %v5921_v62 }
 0x2a6   :  { %1093 = vmatprep.mubr.f32.mxu0 %v6851_v0  ;;  %1164 = vmatprep.mubr.f32.mxu1 %v6851_v0 }
 0x2a8   :  { %4272 = vmatpush1.bf16.msra.mxu0 %v5827_v26  ;;  %4304 = vmatpush1.bf16.msra.mxu1 %v5928_v7 }
 0x2a9   :  { %4274 = vmatprep.subr.bf16.mxu0 %v5830_v35  ;;  %4306 = vmatprep.subr.bf16.mxu1 %v5931_v8 }
 0x2ac   :  { %4276 = vmatpush1.bf16.msra.mxu0 %v5833_v39  ;;  %4308 = vmatpush1.bf16.msra.mxu1 %v5936_v48 }
 0x2ad   :  { %4278 = vmatprep.subr.bf16.mxu0 %v5836_v44  ;;  %4310 = vmatprep.subr.bf16.mxu1 %v5939_v17 }
 0x2b0   :  { %4280 = vmatpush1.bf16.msra.mxu0 %v5839_v52  ;;  %4312 = vmatpush1.bf16.msra.mxu1 %v5944_v56 }
 0x2b1   :  { %4282 = vmatprep.subr.bf16.mxu0 %v5842_v57  ;;  %4314 = vmatprep.subr.bf16.mxu1 %v5947_v25 }
 0x2b4   :  { %4284 = vmatpush1.bf16.msra.mxu0 %v5845_v1  ;;  %4316 = vmatpush1.bf16.msra.mxu1 %v5952_v2 }
 0x2b5   :  { %4286 = vmatprep.subr.bf16.mxu0 %v5848_v6  ;;  %4318 = vmatprep.subr.bf16.mxu1 %v5955_v33 }
 0x2b8   :  { %4288 = vmatpush1.bf16.msra.mxu0 %v5851_v15  ;;  %4320 = vmatpush1.bf16.msra.mxu1 %v5960_v11 }
 0x2b9   :  { %4290 = vmatprep.subr.bf16.mxu0 %v5854_v20  ;;  %4322 = vmatprep.subr.bf16.mxu1 %v5963_v43 }
 0x2bc   :  { %4292 = vmatpush1.bf16.msra.mxu0 %v5857_v29  ;;  %4324 = vmatpush1.bf16.msra.mxu1 %v5968_v21 }
 0x2bd   :  { %4294 = vmatprep.subr.bf16.mxu0 %v5860_v34  ;;  %4326 = vmatprep.subr.bf16.mxu1 %v5971_v50 }
 0x2c0   :  { %4296 = vmatpush1.bf16.msra.mxu0 %v5863_v41  ;;  %4328 = vmatpush1.bf16.msra.mxu1 %v5976_v58 }
 0x2c1   :  { %4330 = vmatprep.subr.bf16.mxu0 %v5819_v9  ;;  %4362 = vmatprep.subr.bf16.mxu1 %v5912_v54 }
 0x376   :  { %v918_v30 = vpop.f32.mrb[4].mxu0  ;;  %v989_v38 = vpop.f32.mrb[20].mxu1 }
 0x377   :  { %v994_v31 = vadd.f32 %v918_v30, %v6016_v32  ;;  %v920_v5 = vpop.f32.mrb[5].mxu0  ;;  %v991_v59 = vpop.f32.mrb[21].mxu1  ;;  %v5229_v42 = vadd.f32 %v989_v38, %v6044_v16 }
 0x378   :  { %v995_v12 = vadd.f32 %v920_v5, %v6018_v37  ;;  %v5230_v28 = vadd.f32 %v991_v59, %v6048_v63 }
 0x379   :  { %v3897_v60 = vmul.f32 -1.442695, %v994_v31  ;;  %v3899_v53 = vmul.f32 -1.442695, %v5229_v42 }
 0x37a   :  { %v3898_v24 = vmul.f32 -1.442695, %v995_v12 }
 0x37b   :  { %5363 = vpow2.f32 %v3897_v60 }
 0x37c   :  { %5365 = vpow2.f32 %v3898_v24 }
 0x37d   :  { %5367 = vtanh.f32 %v5230_v28 }
 0x37e   :  { %5369 = vpow2.f32 %v3899_v53 }
 0x385   :  { %v5364_v3 = vpop.eup %5363 }
 0x386   :  { %v1007_v27 = vadd.f32 1.0, %v5364_v3  ;;  %v5366_v36 = vpop.eup %5365 }
 0x387   :  { %v1008_v32 = vadd.f32 1.0, %v5366_v36  ;;  %v5368_v18 = vpop.eup %5367 }
 0x388   :  { %5371 = vrcp.f32 %v1007_v27  ;;  %v5370_v45 = vpop.eup %5369 }
 0x389   :  { %5373 = vrcp.f32 %v1008_v32  ;;  %v1009_v5 = vadd.f32 1.0, %v5370_v45 }
 0x38b   :  { %5375 = vrcp.f32 %v1009_v5 }
 0x392   :  { %v5372_v37 = vpop.eup %5371 }
 0x393   :  { %v1018_v30 = vmul.f32 %v5372_v37, %v5368_v18  ;;  %v5374_v31 = vpop.eup %5373 }
 0x394   :  { %v1017_v12 = vmul.f32 %v5374_v31, %v6098_v51 }
 0x395   :  { %v5376_v59 = vpop.eup %5375 }
 0x396   :  { %v6144_v38 = vadd.f32 %v1018_v30, %v1017_v12 }
 0x398   :  { %5377 = vtanh.f32 %v6144_v38 }
 0x3a2   :  { %v5378_v60 = vpop.eup %5377 }
 0x3a3   :  { %v6147_v24 = vmul.f32 %v5378_v60, %v5376_v59 }
 0x3a5   :  { %1094 = vmatmul.mubr.f32.vlgmr.msra.gmra.mrb[6].mxu0 %v6147_v24  ;;  %1165 = vmatmul.mubr.f32.vlgmr.msra.gmra.mrb[22].mxu1 %v6147_v24 }
 0x3a6   :  { %4332 = vmatpush1.bf16.msra.mxu0 %v5821_v13  ;;  %4364 = vmatpush1.bf16.msra.mxu1 %v5918_v61 }
 0x3a7   :  { %4334 = vmatprep.subr.bf16.mxu0 %v5825_v22  ;;  %4366 = vmatprep.subr.bf16.mxu1 %v5921_v62 }
 0x3a8   :  { %1270 = vmatprep.mubr.f32.mxu0 %v6851_v0  ;;  %1341 = vmatprep.mubr.f32.mxu1 %v6851_v0 }
 0x3aa   :  { %4336 = vmatpush1.bf16.msra.mxu0 %v5827_v26  ;;  %4368 = vmatpush1.bf16.msra.mxu1 %v5928_v7 }
 0x3ab   :  { %4338 = vmatprep.subr.bf16.mxu0 %v5830_v35  ;;  %4370 = vmatprep.subr.bf16.mxu1 %v5931_v8 }
 0x3ae   :  { %4340 = vmatpush1.bf16.msra.mxu0 %v5833_v39  ;;  %4372 = vmatpush1.bf16.msra.mxu1 %v5936_v48 }
 0x3af   :  { %4342 = vmatprep.subr.bf16.mxu0 %v5836_v44  ;;  %4374 = vmatprep.subr.bf16.mxu1 %v5939_v17 }
 0x3b2   :  { %4344 = vmatpush1.bf16.msra.mxu0 %v5839_v52  ;;  %4376 = vmatpush1.bf16.msra.mxu1 %v5944_v56 }
 0x3b3   :  { %4346 = vmatprep.subr.bf16.mxu0 %v5842_v57  ;;  %4378 = vmatprep.subr.bf16.mxu1 %v5947_v25 }
 0x3b6   :  { %4348 = vmatpush1.bf16.msra.mxu0 %v5845_v1  ;;  %4380 = vmatpush1.bf16.msra.mxu1 %v5952_v2 }
 0x3b7   :  { %4350 = vmatprep.subr.bf16.mxu0 %v5848_v6  ;;  %4382 = vmatprep.subr.bf16.mxu1 %v5955_v33 }
 0x3ba   :  { %4352 = vmatpush1.bf16.msra.mxu0 %v5851_v15  ;;  %4384 = vmatpush1.bf16.msra.mxu1 %v5960_v11 }
 0x3bb   :  { %4354 = vmatprep.subr.bf16.mxu0 %v5854_v20  ;;  %4386 = vmatprep.subr.bf16.mxu1 %v5963_v43 }
 0x3be   :  { %4356 = vmatpush1.bf16.msra.mxu0 %v5857_v29  ;;  %4388 = vmatpush1.bf16.msra.mxu1 %v5968_v21 }
 0x3bf   :  { %4358 = vmatprep.subr.bf16.mxu0 %v5860_v34  ;;  %4390 = vmatprep.subr.bf16.mxu1 %v5971_v50 }
 0x3c2   :  { %4360 = vmatpush1.bf16.msra.mxu0 %v5863_v41  ;;  %4392 = vmatpush1.bf16.msra.mxu1 %v5976_v58 }
 0x3c3   :  { %4394 = vmatprep.subr.bf16.mxu0 %v5819_v9  ;;  %4426 = vmatprep.subr.bf16.mxu1 %v5912_v54 }
 0x478   :  { %v1095_v51 = vpop.f32.mrb[6].mxu0  ;;  %v1166_v42 = vpop.f32.mrb[22].mxu1 }
 0x479   :  { %v1171_v28 = vadd.f32 %v1095_v51, %v6020_v40  ;;  %v1097_v53 = vpop.f32.mrb[7].mxu0  ;;  %v1168_v3 = vpop.f32.mrb[23].mxu1  ;;  %v5231_v18 = vadd.f32 %v1166_v42, %v6044_v16 }
 0x47a   :  { %v1172_v27 = vadd.f32 %v1097_v53, %v6022_v46  ;;  %v5232_v45 = vadd.f32 %v1168_v3, %v6048_v63 }
 0x47b   :  { %v3900_v36 = vmul.f32 -1.442695, %v1171_v28  ;;  %v3902_v37 = vmul.f32 -1.442695, %v5231_v18 }
 0x47c   :  { %v3901_v32 = vmul.f32 -1.442695, %v1172_v27 }
 0x47d   :  { %5379 = vpow2.f32 %v3900_v36 }
 0x47e   :  { %5381 = vpow2.f32 %v3901_v32 }
 0x47f   :  { %5383 = vtanh.f32 %v5232_v45 }
 0x480   :  { %5385 = vpow2.f32 %v3902_v37 }
 0x487   :  { %v5380_v30 = vpop.eup %5379 }
 0x488   :  { %v1184_v31 = vadd.f32 1.0, %v5380_v30  ;;  %v5382_v5 = vpop.eup %5381 }
 0x489   :  { %v1185_v40 = vadd.f32 1.0, %v5382_v5  ;;  %v5384_v12 = vpop.eup %5383 }
 0x48a   :  { %5387 = vrcp.f32 %v1184_v31  ;;  %v5386_v59 = vpop.eup %5385 }
 0x48b   :  { %5389 = vrcp.f32 %v1185_v40  ;;  %v1186_v28 = vadd.f32 1.0, %v5386_v59 }
 0x48d   :  { %5391 = vrcp.f32 %v1186_v28 }
 0x494   :  { %v5388_v46 = vpop.eup %5387 }
 0x495   :  { %v1195_v60 = vmul.f32 %v5388_v46, %v5384_v12  ;;  %v5390_v51 = vpop.eup %5389 }
 0x496   :  { %v1194_v53 = vmul.f32 %v5390_v51, %v6144_v38 }
 0x497   :  { %v5392_v3 = vpop.eup %5391 }
 0x498   :  { %v6190_v42 = vadd.f32 %v1195_v60, %v1194_v53 }
 0x49a   :  { %5393 = vtanh.f32 %v6190_v42 }
 0x4a4   :  { %v5394_v27 = vpop.eup %5393 }
 0x4a5   :  { %v6193_v36 = vmul.f32 %v5394_v27, %v5392_v3 }
 0x4a7   :  { %1271 = vmatmul.mubr.f32.vlgmr.msra.gmra.mrb[8].mxu0 %v6193_v36  ;;  %1342 = vmatmul.mubr.f32.vlgmr.msra.gmra.mrb[24].mxu1 %v6193_v36 }
 0x4a8   :  { %4396 = vmatpush1.bf16.msra.mxu0 %v5821_v13  ;;  %4428 = vmatpush1.bf16.msra.mxu1 %v5918_v61 }
 0x4a9   :  { %4398 = vmatprep.subr.bf16.mxu0 %v5825_v22  ;;  %4430 = vmatprep.subr.bf16.mxu1 %v5921_v62 }
 0x4aa   :  { %1447 = vmatprep.mubr.f32.mxu0 %v6851_v0  ;;  %1518 = vmatprep.mubr.f32.mxu1 %v6851_v0 }
 0x4ac   :  { %4400 = vmatpush1.bf16.msra.mxu0 %v5827_v26  ;;  %4432 = vmatpush1.bf16.msra.mxu1 %v5928_v7 }
 0x4ad   :  { %4402 = vmatprep.subr.bf16.mxu0 %v5830_v35  ;;  %4434 = vmatprep.subr.bf16.mxu1 %v5931_v8 }
 0x4b0   :  { %4404 = vmatpush1.bf16.msra.mxu0 %v5833_v39  ;;  %4436 = vmatpush1.bf16.msra.mxu1 %v5936_v48 }
 0x4b1   :  { %4406 = vmatprep.subr.bf16.mxu0 %v5836_v44  ;;  %4438 = vmatprep.subr.bf16.mxu1 %v5939_v17 }
 0x4b4   :  { %4408 = vmatpush1.bf16.msra.mxu0 %v5839_v52  ;;  %4440 = vmatpush1.bf16.msra.mxu1 %v5944_v56 }
 0x4b5   :  { %4410 = vmatprep.subr.bf16.mxu0 %v5842_v57  ;;  %4442 = vmatprep.subr.bf16.mxu1 %v5947_v25 }
 0x4b8   :  { %4412 = vmatpush1.bf16.msra.mxu0 %v5845_v1  ;;  %4444 = vmatpush1.bf16.msra.mxu1 %v5952_v2 }
 0x4b9   :  { %4414 = vmatprep.subr.bf16.mxu0 %v5848_v6  ;;  %4446 = vmatprep.subr.bf16.mxu1 %v5955_v33 }
 0x4bc   :  { %4416 = vmatpush1.bf16.msra.mxu0 %v5851_v15  ;;  %4448 = vmatpush1.bf16.msra.mxu1 %v5960_v11 }
 0x4bd   :  { %4418 = vmatprep.subr.bf16.mxu0 %v5854_v20  ;;  %4450 = vmatprep.subr.bf16.mxu1 %v5963_v43 }
 0x4c0   :  { %4420 = vmatpush1.bf16.msra.mxu0 %v5857_v29  ;;  %4452 = vmatpush1.bf16.msra.mxu1 %v5968_v21 }
 0x4c1   :  { %4422 = vmatprep.subr.bf16.mxu0 %v5860_v34  ;;  %4454 = vmatprep.subr.bf16.mxu1 %v5971_v50 }
 0x4c4   :  { %4424 = vmatpush1.bf16.msra.mxu0 %v5863_v41  ;;  %4456 = vmatpush1.bf16.msra.mxu1 %v5976_v58 }
 0x4c5   :  { %4458 = vmatprep.subr.bf16.mxu0 %v5819_v9  ;;  %4490 = vmatprep.subr.bf16.mxu1 %v5912_v54 }
 0x57a   :  { %v1272_v38 = vpop.f32.mrb[8].mxu0  ;;  %v1343_v32 = vpop.f32.mrb[24].mxu1 }
 0x57b   :  { %v1348_v18 = vadd.f32 %v1272_v38, %v6024_v49  ;;  %v1274_v45 = vpop.f32.mrb[9].mxu0  ;;  %v1345_v37 = vpop.f32.mrb[25].mxu1  ;;  %v5233_v40 = vadd.f32 %v1343_v32, %v6044_v16 }
 0x57c   :  { %v1349_v30 = vadd.f32 %v1274_v45, %v6026_v55  ;;  %v5234_v12 = vadd.f32 %v1345_v37, %v6048_v63 }
 0x57d   :  { %v3903_v31 = vmul.f32 -1.442695, %v1348_v18  ;;  %v3905_v59 = vmul.f32 -1.442695, %v5233_v40 }
 0x57e   :  { %v3904_v5 = vmul.f32 -1.442695, %v1349_v30 }
 0x57f   :  { %5395 = vpow2.f32 %v3903_v31 }
 0x580   :  { %5397 = vpow2.f32 %v3904_v5 }
 0x581   :  { %5399 = vtanh.f32 %v5234_v12 }
 0x582   :  { %5401 = vpow2.f32 %v3905_v59 }
 0x589   :  { %v5396_v46 = vpop.eup %5395 }
 0x58a   :  { %v1361_v60 = vadd.f32 1.0, %v5396_v46  ;;  %v5398_v51 = vpop.eup %5397 }
 0x58b   :  { %v1362_v49 = vadd.f32 1.0, %v5398_v51  ;;  %v5400_v28 = vpop.eup %5399 }
 0x58c   :  { %5403 = vrcp.f32 %v1361_v60  ;;  %v5402_v53 = vpop.eup %5401 }
 0x58d   :  { %5405 = vrcp.f32 %v1362_v49  ;;  %v1363_v38 = vadd.f32 1.0, %v5402_v53 }
 0x58f   :  { %5407 = vrcp.f32 %v1363_v38 }
 0x596   :  { %v5404_v55 = vpop.eup %5403 }
 0x597   :  { %v1372_v3 = vmul.f32 %v5404_v55, %v5400_v28  ;;  %v5406_v27 = vpop.eup %5405 }
 0x598   :  { %v1371_v18 = vmul.f32 %v5406_v27, %v6190_v42 }
 0x599   :  { %v5408_v45 = vpop.eup %5407 }
 0x59a   :  { %v6236_v32 = vadd.f32 %v1372_v3, %v1371_v18 }
 0x59c   :  { %5409 = vtanh.f32 %v6236_v32 }
 0x5a6   :  { %v5410_v37 = vpop.eup %5409 }
 0x5a7   :  { %v6239_v30 = vmul.f32 %v5410_v37, %v5408_v45 }
 0x5a9   :  { %1448 = vmatmul.mubr.f32.vlgmr.msra.gmra.mrb[10].mxu0 %v6239_v30  ;;  %1519 = vmatmul.mubr.f32.vlgmr.msra.gmra.mrb[26].mxu1 %v6239_v30 }
 0x5aa   :  { %4460 = vmatpush1.bf16.msra.mxu0 %v5821_v13  ;;  %4492 = vmatpush1.bf16.msra.mxu1 %v5918_v61 }
 0x5ab   :  { %4462 = vmatprep.subr.bf16.mxu0 %v5825_v22  ;;  %4494 = vmatprep.subr.bf16.mxu1 %v5921_v62 }
 0x5ac   :  { %1624 = vmatprep.mubr.f32.mxu0 %v6851_v0  ;;  %1695 = vmatprep.mubr.f32.mxu1 %v6851_v0 }
 0x5ae   :  { %4464 = vmatpush1.bf16.msra.mxu0 %v5827_v26  ;;  %4496 = vmatpush1.bf16.msra.mxu1 %v5928_v7 }
 0x5af   :  { %4466 = vmatprep.subr.bf16.mxu0 %v5830_v35  ;;  %4498 = vmatprep.subr.bf16.mxu1 %v5931_v8 }
 0x5b2   :  { %4468 = vmatpush1.bf16.msra.mxu0 %v5833_v39  ;;  %4500 = vmatpush1.bf16.msra.mxu1 %v5936_v48 }
 0x5b3   :  { %4470 = vmatprep.subr.bf16.mxu0 %v5836_v44  ;;  %4502 = vmatprep.subr.bf16.mxu1 %v5939_v17 }
 0x5b6   :  { %4472 = vmatpush1.bf16.msra.mxu0 %v5839_v52  ;;  %4504 = vmatpush1.bf16.msra.mxu1 %v5944_v56 }
 0x5b7   :  { %4474 = vmatprep.subr.bf16.mxu0 %v5842_v57  ;;  %4506 = vmatprep.subr.bf16.mxu1 %v5947_v25 }
 0x5ba   :  { %4476 = vmatpush1.bf16.msra.mxu0 %v5845_v1  ;;  %4508 = vmatpush1.bf16.msra.mxu1 %v5952_v2 }
 0x5bb   :  { %4478 = vmatprep.subr.bf16.mxu0 %v5848_v6  ;;  %4510 = vmatprep.subr.bf16.mxu1 %v5955_v33 }
 0x5be   :  { %4480 = vmatpush1.bf16.msra.mxu0 %v5851_v15  ;;  %4512 = vmatpush1.bf16.msra.mxu1 %v5960_v11 }
 0x5bf   :  { %4482 = vmatprep.subr.bf16.mxu0 %v5854_v20  ;;  %4514 = vmatprep.subr.bf16.mxu1 %v5963_v43 }
 0x5c2   :  { %4484 = vmatpush1.bf16.msra.mxu0 %v5857_v29  ;;  %4516 = vmatpush1.bf16.msra.mxu1 %v5968_v21 }
 0x5c3   :  { %4486 = vmatprep.subr.bf16.mxu0 %v5860_v34  ;;  %4518 = vmatprep.subr.bf16.mxu1 %v5971_v50 }
 0x5c6   :  { %4488 = vmatpush1.bf16.msra.mxu0 %v5863_v41  ;;  %4520 = vmatpush1.bf16.msra.mxu1 %v5976_v58 }
 0x5c7   :  { %4522 = vmatprep.subr.bf16.mxu0 %v5819_v9  ;;  %4554 = vmatprep.subr.bf16.mxu1 %v5912_v54 }
 0x67c   :  { %v1449_v42 = vpop.f32.mrb[10].mxu0  ;;  %v1520_v31 = vpop.f32.mrb[26].mxu1 }
 0x67d   :  { %v1525_v5 = vadd.f32 %v1449_v42, %v6028_v4  ;;  %v1451_v40 = vpop.f32.mrb[11].mxu0  ;;  %v1522_v12 = vpop.f32.mrb[27].mxu1  ;;  %v5235_v51 = vadd.f32 %v1520_v31, %v6044_v16 }
 0x67e   :  { %v1526_v59 = vadd.f32 %v1451_v40, %v6030_v10  ;;  %v5236_v49 = vadd.f32 %v1522_v12, %v6048_v63  ;;  %v1927_v40 = vld [vmem:[#allocation7 + $0x248] sm:$0xff] }
 0x67f   :  { %v3906_v46 = vmul.f32 -1.442695, %v1525_v5  ;;  %v3908_v28 = vmul.f32 -1.442695, %v5235_v51  ;;  %v1931_v12 = vld [vmem:[#allocation7 + $0x268] sm:$0xff] }
 0x680   :  { %v3907_v60 = vmul.f32 -1.442695, %v1526_v59  ;;  %v1929_v59 = vld [vmem:[#allocation7 + $0x258] sm:$0xff] }
 0x681   :  { %5411 = vpow2.f32 %v3906_v46  ;;  %v1933_v46 = vld [vmem:[#allocation7 + $0x278] sm:$0xff] }
 0x682   :  { %5413 = vpow2.f32 %v3907_v60 }
 0x683   :  { %5415 = vtanh.f32 %v5236_v49 }
 0x684   :  { %5417 = vpow2.f32 %v3908_v28 }
 0x68b   :  { %v5412_v9 = vpop.eup %5411 }
 0x68c   :  { %v1538_v53 = vadd.f32 1.0, %v5412_v9  ;;  %v5414_v54 = vpop.eup %5413  ;;  %v1926_v9 = vld [vmem:[#allocation7 + $0x240] sm:$0xff] }
 0x68d   :  { %v1539_v4 = vadd.f32 1.0, %v5414_v54  ;;  %v5416_v55 = vpop.eup %5415 }
 0x68e   :  { %5419 = vrcp.f32 %v1538_v53  ;;  %v5418_v3 = vpop.eup %5417  ;;  %v1930_v53 = vld [vmem:[#allocation7 + $0x260] sm:$0xff] }
 0x68f   :  { %5421 = vrcp.f32 %v1539_v4  ;;  %v1540_v18 = vadd.f32 1.0, %v5418_v3  ;;  %v4589_v4 = vpack.c.bf16 %v1931_v12, %v1927_v40  ;;  %v1928_v3 = vld [vmem:[#allocation7 + $0x250] sm:$0xff]  ;;  %v1965_v40 = vld [vmem:[#allocation7 + $0x378] sm:$0xff] }
 0x691   :  { %5423 = vrcp.f32 %v1540_v18  ;;  %v1937_v18 = vld [vmem:[#allocation7 + $0x298] sm:$0xff] }
 0x698   :  { %v5420_v10 = vpop.eup %5419 }
 0x699   :  { %v1549_v27 = vmul.f32 %v5420_v10, %v5416_v55  ;;  %v5422_v38 = vpop.eup %5421  ;;  %v4621_v55 = vpack.c.bf16 %v1933_v46, %v1929_v59  ;;  %v1932_v10 = vld [vmem:[#allocation7 + $0x270] sm:$0xff]  ;;  %v1958_v46 = vld [vmem:[#allocation7 + $0x340] sm:$0xff] }
 0x69a   :  { %v1548_v45 = vmul.f32 %v5422_v38, %v6236_v32  ;;  %v1924_v32 = vld [vmem:[#allocation7 + $0x230] sm:$0xff]  ;;  %v1939_v38 = vld [vmem:[#allocation7 + $0x2a8] sm:$0xff] }
 0x69b   :  { %v5424_v42 = vpop.eup %5423 }
 0x69c   :  { %v6282_v37 = vadd.f32 %v1549_v27, %v1548_v45  ;;  %v1935_v27 = vld [vmem:[#allocation7 + $0x288] sm:$0xff]  ;;  %v1941_v45 = vld [vmem:[#allocation7 + $0x2b8] sm:$0xff] }
 0x69e   :  { %5425 = vtanh.f32 %v6282_v37 }
 0x6a8   :  { %v5426_v31 = vpop.eup %5425 }
 0x6a9   :  { %v6285_v5 = vmul.f32 %v5426_v31, %v5424_v42  ;;  %v4623_v42 = vpack.c.bf16 %v1932_v10, %v1928_v3  ;;  %v1934_v31 = vld [vmem:[#allocation7 + $0x280] sm:$0xff]  ;;  %v1973_v3 = vld [vmem:[#allocation7 + $0x3b8] sm:$0xff] }
 0x6ab   :  { %1625 = vmatmul.mubr.f32.vlgmr.msra.gmra.mrb[12].mxu0 %v6285_v5  ;;  %1696 = vmatmul.mubr.f32.vlgmr.msra.gmra.mrb[28].mxu1 %v6285_v5 }
 0x6ac   :  { %4524 = vmatpush1.bf16.msra.mxu0 %v5821_v13  ;;  %4556 = vmatpush1.bf16.msra.mxu1 %v5918_v61  ;;  %v1919_v13 = vld [vmem:[#allocation7 + $0x208] sm:$0xff] }
 0x6ad   :  { %4526 = vmatprep.subr.bf16.mxu0 %v5825_v22  ;;  %4558 = vmatprep.subr.bf16.mxu1 %v5921_v62  ;;  %v1923_v22 = vld [vmem:[#allocation7 + $0x228] sm:$0xff] }
 0x6ae   :  { %1801 = vmatprep.mubr.f32.mxu0 %v6851_v0  ;;  %1872 = vmatprep.mubr.f32.mxu1 %v6851_v0 }
 0x6b0   :  { %4528 = vmatpush1.bf16.msra.mxu0 %v5827_v26  ;;  %4560 = vmatpush1.bf16.msra.mxu1 %v5928_v7  ;;  %v1921_v26 = vld [vmem:[#allocation7 + $0x218] sm:$0xff] }
 0x6b1   :  { %4530 = vmatprep.subr.bf16.mxu0 %v5830_v35  ;;  %4562 = vmatprep.subr.bf16.mxu1 %v5931_v8  ;;  %v4585_v35 = vpack.c.bf16 %v1923_v22, %v1919_v13  ;;  %v1938_v13 = vld [vmem:[#allocation7 + $0x2a0] sm:$0xff]  ;;  %v4593_v22 = vpack.c.bf16 %v1939_v38, %v1935_v27 }
 0x6b2   :  { %v1966_v38 = vld [vmem:[#allocation7 + $0x380] sm:$0xff] }
 0x6b4   :  { %4532 = vmatpush1.bf16.msra.mxu0 %v5833_v39  ;;  %4564 = vmatpush1.bf16.msra.mxu1 %v5936_v48  ;;  %v1925_v39 = vld [vmem:[#allocation7 + $0x238] sm:$0xff] }
 0x6b5   :  { %4534 = vmatprep.subr.bf16.mxu0 %v5836_v44  ;;  %4566 = vmatprep.subr.bf16.mxu1 %v5939_v17  ;;  %v4617_v44 = vpack.c.bf16 %v1925_v39, %v1921_v26  ;;  %v4625_v26 = vpack.c.bf16 %v1941_v45, %v1937_v18  ;;  %v1940_v39 = vld [vmem:[#allocation7 + $0x2b0] sm:$0xff]  ;;  %v1970_v18 = vld [vmem:[#allocation7 + $0x3a0] sm:$0xff] }
 0x6b8   :  { %4536 = vmatpush1.bf16.msra.mxu0 %v5839_v52  ;;  %4568 = vmatpush1.bf16.msra.mxu1 %v5944_v56 }
 0x6b9   :  { %4538 = vmatprep.subr.bf16.mxu0 %v5842_v57  ;;  %4570 = vmatprep.subr.bf16.mxu1 %v5947_v25 }
 0x6bc   :  { %4540 = vmatpush1.bf16.msra.mxu0 %v5845_v1  ;;  %4572 = vmatpush1.bf16.msra.mxu1 %v5952_v2 }
 0x6bd   :  { %4542 = vmatprep.subr.bf16.mxu0 %v5848_v6  ;;  %4574 = vmatprep.subr.bf16.mxu1 %v5955_v33 }
 0x6c0   :  { %4544 = vmatpush1.bf16.msra.mxu0 %v5851_v15  ;;  %4576 = vmatpush1.bf16.msra.mxu1 %v5960_v11 }
 0x6c1   :  { %4546 = vmatprep.subr.bf16.mxu0 %v5854_v20  ;;  %4578 = vmatprep.subr.bf16.mxu1 %v5963_v43 }
 0x6c4   :  { %4548 = vmatpush1.bf16.msra.mxu0 %v5857_v29  ;;  %4580 = vmatpush1.bf16.msra.mxu1 %v5968_v21 }
 0x6c5   :  { %4550 = vmatprep.subr.bf16.mxu0 %v5860_v34  ;;  %4582 = vmatprep.subr.bf16.mxu1 %v5971_v50 }
 0x6c8   :  { %4552 = vmatpush1.bf16.msra.mxu0 %v5863_v41  ;;  %4584 = vmatpush1.bf16.msra.mxu1 %v5976_v58  ;;  %v1918_v58 = vld [vmem:[#allocation7 + $0x200] sm:$0xff] }
 0x6c9   :  { %4586 = vmatprep.subr.bf16.mxu0 %v4585_v35  ;;  %4618 = vmatprep.subr.bf16.mxu1 %v4617_v44  ;;  %v1936_v35 = vld [vmem:[#allocation7 + $0x290] sm:$0xff]  ;;  %v1943_v44 = vld [vmem:[#allocation7 + $0x2c8] sm:$0xff] }
 0x77e   :  { %v1626_v52 = vpop.f32.mrb[12].mxu0  ;;  %v1697_v57 = vpop.f32.mrb[28].mxu1 }
 0x77f   :  { %v1702_v1 = vadd.f32 %v1626_v52, %v6032_v14  ;;  %v1628_v6 = vpop.f32.mrb[13].mxu0  ;;  %v1699_v15 = vpop.f32.mrb[29].mxu1  ;;  %v5237_v41 = vadd.f32 %v1697_v57, %v6044_v16  ;;  %v1922_v14 = vld [vmem:[#allocation7 + $0x220] sm:$0xff]  ;;  %v1947_v52 = vld [vmem:[#allocation7 + $0x2e8] sm:$0xff]  ;;  %v1945_v57 = vld [vmem:[#allocation7 + $0x2d8] sm:$0xff] }
 0x780   :  { %v1703_v20 = vadd.f32 %v1628_v6, %v6034_v23  ;;  %v5238_v61 = vadd.f32 %v1699_v15, %v6048_v63  ;;  %v1920_v23 = vld [vmem:[#allocation7 + $0x210] sm:$0xff]  ;;  %v4587_v49 = vpack.c.bf16 %v1922_v14, %v1918_v58  ;;  %v4595_v6 = vpack.c.bf16 %v1938_v13, %v1934_v31  ;;  %v1959_v14 = vld [vmem:[#allocation7 + $0x348] sm:$0xff] }
 0x781   :  { %v3909_v29 = vmul.f32 -1.442695, %v1702_v1  ;;  %v3911_v62 = vmul.f32 -1.442695, %v5237_v41  ;;  %v4619_v28 = vpack.c.bf16 %v1924_v32, %v1920_v23  ;;  %v1949_v1 = vld [vmem:[#allocation7 + $0x2f8] sm:$0xff]  ;;  %v4627_v15 = vpack.c.bf16 %v1940_v39, %v1936_v35  ;;  %v1956_v58 = vld [vmem:[#allocation7 + $0x330] sm:$0xff] }
 0x782   :  { %v3910_v34 = vmul.f32 -1.442695, %v1703_v20  ;;  %v1942_v20 = vld [vmem:[#allocation7 + $0x2c0] sm:$0xff]  ;;  %v4629_v41 = vpack.c.bf16 %v1949_v1, %v1945_v57  ;;  %v1963_v23 = vld [vmem:[#allocation7 + $0x368] sm:$0xff]  ;;  %v1961_v32 = vld [vmem:[#allocation7 + $0x358] sm:$0xff]  ;;  %v4611_v39 = vpack.c.bf16 %v1970_v18, %v1966_v38 }
 0x783   :  { %5427 = vpow2.f32 %v3909_v29  ;;  %v1946_v29 = vld [vmem:[#allocation7 + $0x2e0] sm:$0xff]  ;;  %v1972_v31 = vld [vmem:[#allocation7 + $0x3b0] sm:$0xff]  ;;  %v1975_v13 = vld [vmem:[#allocation7 + $0x3c8] sm:$0xff] }
 0x784   :  { %5429 = vpow2.f32 %v3910_v34  ;;  %v4597_v34 = vpack.c.bf16 %v1947_v52, %v1943_v44  ;;  %v1981_v35 = vld [vmem:[#allocation7 + $0x3f8] sm:$0xff]  ;;  %v1974_v52 = vld [vmem:[#allocation7 + $0x3c0] sm:$0xff] }
 0x785   :  { %5431 = vtanh.f32 %v5238_v61  ;;  %v1944_v61 = vld [vmem:[#allocation7 + $0x2d0] sm:$0xff]  ;;  %v2295_v38 = vld [vmem:[#allocation9 + $0x2f8] sm:$0xff]  ;;  %v2288_v18 = vld [vmem:[#allocation9 + $0x2c0] sm:$0xff] }
 0x786   :  { %5433 = vpow2.f32 %v3911_v62  ;;  %v1948_v62 = vld [vmem:[#allocation7 + $0x2f0] sm:$0xff] }
 0x78d   :  { %v5428_v7 = vpop.eup %5427 }
 0x78e   :  { %v1715_v8 = vadd.f32 1.0, %v5428_v7  ;;  %v5430_v48 = vpop.eup %5429  ;;  %v1951_v7 = vld [vmem:[#allocation7 + $0x308] sm:$0xff] }
 0x78f   :  { %v1716_v17 = vadd.f32 1.0, %v5430_v48  ;;  %v5432_v56 = vpop.eup %5431  ;;  %v1953_v48 = vld [vmem:[#allocation7 + $0x318] sm:$0xff] }
 0x790   :  { %5435 = vrcp.f32 %v1715_v8  ;;  %v5434_v25 = vpop.eup %5433  ;;  %v1955_v8 = vld [vmem:[#allocation7 + $0x328] sm:$0xff] }
 0x791   :  { %5437 = vrcp.f32 %v1716_v17  ;;  %v1717_v43 = vadd.f32 1.0, %v5434_v25  ;;  %v1957_v17 = vld [vmem:[#allocation7 + $0x338] sm:$0xff]  ;;  %v4631_v25 = vpack.c.bf16 %v1948_v62, %v1944_v61 }
 0x793   :  { %5439 = vrcp.f32 %v1717_v43  ;;  %v4633_v43 = vpack.c.bf16 %v1957_v17, %v1953_v48  ;;  %v2273_v48 = vld [vmem:[#allocation9 + $0x248] sm:$0xff] }
 0x794   :  { %v2277_v17 = vld [vmem:[#allocation9 + $0x268] sm:$0xff] }
 0x79a   :  { %v5436_v2 = vpop.eup %5435 }
 0x79b   :  { %v1726_v33 = vmul.f32 %v5436_v2, %v5432_v56  ;;  %v5438_v11 = vpop.eup %5437  ;;  %v4599_v56 = vpack.c.bf16 %v1946_v29, %v1942_v20  ;;  %v1950_v2 = vld [vmem:[#allocation7 + $0x300] sm:$0xff]  ;;  %v1980_v20 = vld [vmem:[#allocation7 + $0x3f0] sm:$0xff] }
 0x79c   :  { %v1725_v21 = vmul.f32 %v5438_v11, %v6282_v37  ;;  %v4591_v37 = vpack.c.bf16 %v1930_v53, %v1926_v9  ;;  %v4601_v11 = vpack.c.bf16 %v1955_v8, %v1951_v7  ;;  %v1964_v9 = vld [vmem:[#allocation7 + $0x370] sm:$0xff]  ;;  %v1967_v53 = vld [vmem:[#allocation7 + $0x388] sm:$0xff] }
 0x79d   :  { %v5440_v60 = vpop.eup %5439  ;;  %v2266_v7 = vld [vmem:[#allocation9 + $0x210] sm:$0xff] }
 0x79e   :  { %v6326_v50 = vadd.f32 %v1726_v33, %v1725_v21  ;;  %v1954_v33 = vld [vmem:[#allocation7 + $0x320] sm:$0xff]  ;;  %v1952_v21 = vld [vmem:[#allocation7 + $0x310] sm:$0xff] }
 0x79f   :  { %v4603_v12 = vpack.c.bf16 %v1954_v33, %v1950_v2  ;;  %v4635_v59 = vpack.c.bf16 %v1956_v58, %v1952_v21  ;;  %v2270_v8 = vld [vmem:[#allocation9 + $0x230] sm:$0xff]  ;;  %v2279_v2 = vld [vmem:[#allocation9 + $0x278] sm:$0xff]  ;;  %v2272_v33 = vld [vmem:[#allocation9 + $0x240] sm:$0xff] }
 0x7a0   :  { %5441 = vtanh.f32 %v6326_v50  ;;  %v2274_v58 = vld [vmem:[#allocation9 + $0x250] sm:$0xff] }
 0x7aa   :  { %v5442_v51 = vpop.eup %5441 }
 0x7ab   :  { %v6329_v54 = vmul.f32 %v5442_v51, %v5440_v60  ;;  %v1962_v60 = vld [vmem:[#allocation7 + $0x360] sm:$0xff]  ;;  %v4605_v51 = vpack.c.bf16 %v1963_v23, %v1959_v14  ;;  %v2278_v14 = vld [vmem:[#allocation9 + $0x270] sm:$0xff] }
 0x7ac   :  { %v4607_v10 = vpack.c.bf16 %v1962_v60, %v1958_v46  ;;  %v6382_v23 = vpack.c.bf16 %v2278_v14, %v2274_v58  ;;  %v2287_v46 = vld [vmem:[#allocation9 + $0x2b8] sm:$0xff]  ;;  %v2280_v60 = vld [vmem:[#allocation9 + $0x280] sm:$0xff] }
 0x7ad   :  { %1802 = vmatmul.mubr.f32.vlgmr.msra.gmra.mrb[14].mxu0 %v6329_v54  ;;  %1873 = vmatmul.mubr.f32.vlgmr.msra.gmra.mrb[30].mxu1 %v6329_v54  ;;  %v2315_v14 = vld [vmem:[#allocation9 + $0x398] sm:$0xff] }
 0x7ae   :  { %4588 = vmatpush1.bf16.msra.mxu0 %v4587_v49  ;;  %4620 = vmatpush1.bf16.msra.mxu1 %v4619_v28  ;;  %v4637_v49 = vpack.c.bf16 %v1965_v40, %v1961_v32  ;;  %v1960_v28 = vld [vmem:[#allocation7 + $0x350] sm:$0xff]  ;;  %v2281_v32 = vld [vmem:[#allocation9 + $0x288] sm:$0xff] }
 0x7af   :  { %4590 = vmatprep.subr.bf16.mxu0 %v4589_v4  ;;  %4622 = vmatprep.subr.bf16.mxu1 %v4621_v55  ;;  %v1971_v4 = vld [vmem:[#allocation7 + $0x3a8] sm:$0xff]  ;;  %v1969_v55 = vld [vmem:[#allocation7 + $0x398] sm:$0xff]  ;;  %v4639_v27 = vpack.c.bf16 %v1964_v9, %v1960_v28  ;;  %v2282_v9 = vld [vmem:[#allocation9 + $0x290] sm:$0xff] }
 0x7b0   :  { %2069 = vmatprep.mubr.f32.mxu0 %v6851_v0  ;;  %2182 = vmatprep.mubr.f32.mxu1 %v6851_v0  ;;  %v4609_v45 = vpack.c.bf16 %v1971_v4, %v1967_v53  ;;  %v2285_v40 = vld [vmem:[#allocation9 + $0x2a8] sm:$0xff]  ;;  %v2286_v53 = vld [vmem:[#allocation9 + $0x2b0] sm:$0xff] }
 0x7b1   :  { %v6394_v4 = vpack.c.bf16 %v2286_v53, %v2282_v9 }
 0x7b2   :  { %4592 = vmatpush1.bf16.msra.mxu0 %v4591_v37  ;;  %4624 = vmatpush1.bf16.msra.mxu1 %v4623_v42  ;;  %v4641_v37 = vpack.c.bf16 %v1973_v3, %v1969_v55  ;;  %v1968_v42 = vld [vmem:[#allocation7 + $0x390] sm:$0xff]  ;;  %v2289_v55 = vld [vmem:[#allocation9 + $0x2c8] sm:$0xff] }
 0x7b3   :  { %4594 = vmatprep.subr.bf16.mxu0 %v4593_v22  ;;  %4626 = vmatprep.subr.bf16.mxu1 %v4625_v26  ;;  %v1979_v22 = vld [vmem:[#allocation7 + $0x3e8] sm:$0xff]  ;;  %v1977_v26 = vld [vmem:[#allocation7 + $0x3d8] sm:$0xff]  ;;  %v4643_v44 = vpack.c.bf16 %v1972_v31, %v1968_v42  ;;  %v2290_v31 = vld [vmem:[#allocation9 + $0x2d0] sm:$0xff] }
 0x7b4   :  { %v4613_v57 = vpack.c.bf16 %v1979_v22, %v1975_v13  ;;  %v4645_v1 = vpack.c.bf16 %v1981_v35, %v1977_v26  ;;  %v2293_v3 = vld [vmem:[#allocation9 + $0x2e8] sm:$0xff]  ;;  %v2294_v13 = vld [vmem:[#allocation9 + $0x2f0] sm:$0xff] }
 0x7b5   :  { %v6406_v22 = vpack.c.bf16 %v2294_v13, %v2290_v31  ;;  %v2297_v26 = vld [vmem:[#allocation9 + $0x308] sm:$0xff]  ;;  %v2324_v31 = vld [vmem:[#allocation9 + $0x3e0] sm:$0xff] }
 0x7b6   :  { %4596 = vmatpush1.bf16.msra.mxu0 %v4595_v6  ;;  %4628 = vmatpush1.bf16.msra.mxu1 %v4627_v15  ;;  %v1978_v6 = vld [vmem:[#allocation7 + $0x3e0] sm:$0xff]  ;;  %v1976_v15 = vld [vmem:[#allocation7 + $0x3d0] sm:$0xff]  ;;  %v2301_v35 = vld [vmem:[#allocation9 + $0x328] sm:$0xff] }
 0x7b7   :  { %4598 = vmatprep.subr.bf16.mxu0 %v4597_v34  ;;  %4630 = vmatprep.subr.bf16.mxu1 %v4629_v41  ;;  %v4615_v29 = vpack.c.bf16 %v1978_v6, %v1974_v52  ;;  %v4647_v34 = vpack.c.bf16 %v1980_v20, %v1976_v15  ;;  %v2264_v41 = vld [vmem:[#allocation9 + $0x200] sm:$0xff]  ;;  %v2303_v52 = vld [vmem:[#allocation9 + $0x338] sm:$0xff]  ;;  %v2298_v20 = vld [vmem:[#allocation9 + $0x310] sm:$0xff] }
 0x7ba   :  { %4600 = vmatpush1.bf16.msra.mxu0 %v4599_v56  ;;  %4632 = vmatpush1.bf16.msra.mxu1 %v4631_v25  ;;  %v2275_v56 = vld [vmem:[#allocation9 + $0x258] sm:$0xff]  ;;  %v6375_v25 = vpack.c.bf16 %v2277_v17, %v2273_v48  ;;  %v2306_v48 = vld [vmem:[#allocation9 + $0x350] sm:$0xff] }
 0x7bb   :  { %4602 = vmatprep.subr.bf16.mxu0 %v4601_v11  ;;  %4634 = vmatprep.subr.bf16.mxu1 %v4633_v43  ;;  %v2276_v11 = vld [vmem:[#allocation9 + $0x260] sm:$0xff]  ;;  %v6377_v43 = vpack.c.bf16 %v2279_v2, %v2275_v56  ;;  %v2310_v56 = vld [vmem:[#allocation9 + $0x370] sm:$0xff]  ;;  %v2313_v2 = vld [vmem:[#allocation9 + $0x388] sm:$0xff] }
 0x7bc   :  { %v6379_v21 = vpack.c.bf16 %v2276_v11, %v2272_v33  ;;  %v2317_v33 = vld [vmem:[#allocation9 + $0x3a8] sm:$0xff]  ;;  %v6431_v11 = vpack.c.bf16 %v2310_v56, %v2306_v48 }
 0x7bd   :  { %v6433_v58 = vpack.c.bf16 %v2317_v33, %v2313_v2 }
 0x7be   :  { %4604 = vmatpush1.bf16.msra.mxu0 %v4603_v12  ;;  %4636 = vmatpush1.bf16.msra.mxu1 %v4635_v59  ;;  %v2283_v12 = vld [vmem:[#allocation9 + $0x298] sm:$0xff]  ;;  %v6387_v59 = vpack.c.bf16 %v2285_v40, %v2281_v32  ;;  %v2312_v40 = vld [vmem:[#allocation9 + $0x380] sm:$0xff] }
 0x7bf   :  { %4606 = vmatprep.subr.bf16.mxu0 %v4605_v51  ;;  %4638 = vmatprep.subr.bf16.mxu1 %v4637_v49  ;;  %v2284_v51 = vld [vmem:[#allocation9 + $0x2a0] sm:$0xff]  ;;  %v6389_v49 = vpack.c.bf16 %v2287_v46, %v2283_v12  ;;  %v2319_v32 = vld [vmem:[#allocation9 + $0x3b8] sm:$0xff] }
 0x7c0   :  { %v6391_v28 = vpack.c.bf16 %v2284_v51, %v2280_v60  ;;  %v6435_v12 = vpack.c.bf16 %v2319_v32, %v2315_v14  ;;  %v2316_v46 = vld [vmem:[#allocation9 + $0x3a0] sm:$0xff]  ;;  %v2314_v60 = vld [vmem:[#allocation9 + $0x390] sm:$0xff] }
 0x7c1   :  { %v2318_v51 = vld [vmem:[#allocation9 + $0x3b0] sm:$0xff]  ;;  %v6438_v9 = vpack.c.bf16 %v2316_v46, %v2312_v40 }
 0x7c2   :  { %4608 = vmatpush1.bf16.msra.mxu0 %v4607_v10  ;;  %4640 = vmatpush1.bf16.msra.mxu1 %v4639_v27  ;;  %v2291_v10 = vld [vmem:[#allocation9 + $0x2d8] sm:$0xff]  ;;  %v6399_v27 = vpack.c.bf16 %v2293_v3, %v2289_v55  ;;  %v6442_v53 = vpack.c.bf16 %v2318_v51, %v2314_v60  ;;  %v2321_v55 = vld [vmem:[#allocation9 + $0x3c8] sm:$0xff] }
 0x7c3   :  { %4610 = vmatprep.subr.bf16.mxu0 %v4609_v45  ;;  %4642 = vmatprep.subr.bf16.mxu1 %v4641_v37  ;;  %v2292_v45 = vld [vmem:[#allocation9 + $0x2e0] sm:$0xff]  ;;  %v6401_v37 = vpack.c.bf16 %v2295_v38, %v2291_v10  ;;  %v2325_v3 = vld [vmem:[#allocation9 + $0x3e8] sm:$0xff]  ;;  %v2323_v10 = vld [vmem:[#allocation9 + $0x3d8] sm:$0xff] }
 0x7c4   :  { %v6403_v42 = vpack.c.bf16 %v2292_v45, %v2288_v18  ;;  %v6447_v38 = vpack.c.bf16 %v2325_v3, %v2321_v55  ;;  %v2327_v18 = vld [vmem:[#allocation9 + $0x3f8] sm:$0xff]  ;;  %v2320_v45 = vld [vmem:[#allocation9 + $0x3c0] sm:$0xff] }
 0x7c5   :  { %v6449_v13 = vpack.c.bf16 %v2327_v18, %v2323_v10 }
 0x7c6   :  { %4612 = vmatpush1.bf16.msra.mxu0 %v4611_v39  ;;  %4644 = vmatpush1.bf16.msra.mxu1 %v4643_v44  ;;  %v2299_v39 = vld [vmem:[#allocation9 + $0x318] sm:$0xff]  ;;  %v6411_v44 = vpack.c.bf16 %v2301_v35, %v2297_v26  ;;  %v6451_v26 = vpack.c.bf16 %v2324_v31, %v2320_v45  ;;  %v2322_v35 = vld [vmem:[#allocation9 + $0x3d0] sm:$0xff] }
 0x7c7   :  { %4614 = vmatprep.subr.bf16.mxu0 %v4613_v57  ;;  %4646 = vmatprep.subr.bf16.mxu1 %v4645_v1  ;;  %v2296_v57 = vld [vmem:[#allocation9 + $0x300] sm:$0xff]  ;;  %v6413_v6 = vpack.c.bf16 %v2303_v52, %v2299_v39  ;;  %v2326_v39 = vld [vmem:[#allocation9 + $0x3f0] sm:$0xff] }
 0x7c8   :  { %v2300_v1 = vld [vmem:[#allocation9 + $0x320] sm:$0xff]  ;;  %v6454_v52 = vpack.c.bf16 %v2326_v39, %v2322_v35 }
 0x7c9   :  { %v6415_v15 = vpack.c.bf16 %v2300_v1, %v2296_v57  ;;  %v6854_v35 = vld [vmem:[#allocation17_spill] sm:$0xff] }
 0x7ca   :  { %4616 = vmatpush1.bf16.msra.mxu0 %v4615_v29  ;;  %4648 = vmatpush1.bf16.msra.mxu1 %v4647_v34  ;;  %v2302_v29 = vld [vmem:[#allocation9 + $0x330] sm:$0xff]  ;;  %v2305_v34 = vld [vmem:[#allocation9 + $0x348] sm:$0xff]  ;;  %v6855_v39 = vsub.s32 0, %v6854_v35 }
 0x7cd   :  { %2070 = vmatmul.mubr.f32.vlgmr.msra.gmra.mrb[16].mxu0 %v6055_v19  ;;  %2183 = vmatmul.mubr.f32.vlgmr.msra.gmra.mrb[32].mxu1 %v6055_v19  ;;  %v2265_v19 = vld [vmem:[#allocation9 + $0x208] sm:$0xff] }
 0x7ce   :  { %2075 = vmatprep.mubr.f32.mxu0 %v6851_v0  ;;  %2188 = vmatprep.mubr.f32.mxu1 %v6851_v0 }
 0x7d1   :  { %2076 = vmatmul.mubr.f32.gmra.mrb[18].mxu0 %v6101_v47  ;;  %2189 = vmatmul.mubr.f32.gmra.mrb[34].mxu1 %v6101_v47  ;;  %v2269_v47 = vld [vmem:[#allocation9 + $0x228] sm:$0xff] }
 0x7d2   :  { %2081 = vmatprep.mubr.f32.mxu0 %v6851_v0  ;;  %2194 = vmatprep.mubr.f32.mxu1 %v6851_v0 }
 0x7d5   :  { %2082 = vmatmul.mubr.f32.gmra.mrb[20].mxu0 %v6147_v24  ;;  %2195 = vmatmul.mubr.f32.gmra.mrb[36].mxu1 %v6147_v24  ;;  %v2267_v24 = vld [vmem:[#allocation9 + $0x218] sm:$0xff] }
 0x7d6   :  { %2087 = vmatprep.mubr.f32.mxu0 %v6851_v0  ;;  %2200 = vmatprep.mubr.f32.mxu1 %v6851_v0 }
 0x7d9   :  { %2088 = vmatmul.mubr.f32.gmra.mrb[22].mxu0 %v6193_v36  ;;  %2201 = vmatmul.mubr.f32.gmra.mrb[38].mxu1 %v6193_v36  ;;  %v6363_v36 = vpack.c.bf16 %v2269_v47, %v2265_v19  ;;  %v6418_v19 = vpack.c.bf16 %v2302_v29, %v2298_v20  ;;  %v2309_v47 = vld [vmem:[#allocation9 + $0x368] sm:$0xff] }
 0x7da   :  { %2093 = vmatprep.mubr.f32.mxu0 %v6851_v0  ;;  %2206 = vmatprep.mubr.f32.mxu1 %v6851_v0  ;;  %v6852_v20 = vld [vmem:[#allocation18_spill] sm:$0xff] }
 0x7db   :  { %4650 = vmatprep.subr.bf16.mxu0 %v6363_v36 }
 0x7dd   :  { %2094 = vmatmul.mubr.f32.gmra.mrb[24].mxu0 %v6239_v30  ;;  %2207 = vmatmul.mubr.f32.gmra.mrb[40].mxu1 %v6239_v30  ;;  %v2271_v30 = vld [vmem:[#allocation9 + $0x238] sm:$0xff] }
 0x7de   :  { %2099 = vmatprep.mubr.f32.mxu0 %v6851_v0  ;;  %2212 = vmatprep.mubr.f32.mxu1 %v6851_v0  ;;  %v6365_v61 = vpack.c.bf16 %v2271_v30, %v2267_v24  ;;  %v2307_v24 = vld [vmem:[#allocation9 + $0x358] sm:$0xff] }
 0x7df   :  { %v2311_v30 = vld [vmem:[#allocation9 + $0x378] sm:$0xff] }
 0x7e0   :  { %4682 = vmatprep.subr.bf16.mxu1 %v6365_v61 }
 0x7e1   :  { %2100 = vmatmul.mubr.f32.gmra.mrb[26].mxu0 %v6285_v5  ;;  %2213 = vmatmul.mubr.f32.gmra.mrb[42].mxu1 %v6285_v5  ;;  %v2268_v5 = vld [vmem:[#allocation9 + $0x220] sm:$0xff] }
 0x7e2   :  { %2105 = vmatprep.mubr.f32.mxu0 %v6851_v0  ;;  %2218 = vmatprep.mubr.f32.mxu1 %v6851_v0  ;;  %v6367_v62 = vpack.c.bf16 %v2268_v5, %v2264_v41  ;;  %v6422_v41 = vpack.c.bf16 %v2309_v47, %v2305_v34  ;;  %v6424_v5 = vpack.c.bf16 %v2311_v30, %v2307_v24  ;;  %v6853_v24 = vld [vmem:[#allocation19_spill] sm:$0xff] }
 0x7e4   :  { %4652 = vmatpush1.bf16.msra.mxu0 %v6367_v62 }
 0x7e5   :  { %2106 = vmatmul.mubr.f32.gmra.mrb[28].mxu0 %v6329_v54  ;;  %2219 = vmatmul.mubr.f32.gmra.mrb[44].mxu1 %v6329_v54  ;;  %v6370_v54 = vpack.c.bf16 %v2270_v8, %v2266_v7  ;;  %v2304_v7 = vld [vmem:[#allocation9 + $0x340] sm:$0xff] }
 0x7e6   :  { %2111 = vmatprep.mubr.f32.mxu0 %v6851_v0  ;;  %2224 = vmatprep.mubr.f32.mxu1 %v6851_v0  ;;  %v2308_v8 = vld [vmem:[#allocation9 + $0x360] sm:$0xff] }
 0x7e7   :  { %4684 = vmatpush1.bf16.msra.mxu1 %v6370_v54  ;;  %4654 = vmatprep.subr.bf16.mxu0 %v6375_v25  ;;  %v6427_v17 = vpack.c.bf16 %v2308_v8, %v2304_v7 }
 0x7e8   :  { %4686 = vmatprep.subr.bf16.mxu1 %v6377_v43  ;;  %4656 = vmatpush1.bf16.msra.mxu0 %v6379_v21 }
 0x7e9   :  { %4658 = vmatprep.subr.bf16.mxu0 %v6387_v59 }
 0x7eb   :  { %4688 = vmatpush1.bf16.msra.mxu1 %v6382_v23 }
 0x7ec   :  { %4690 = vmatprep.subr.bf16.mxu1 %v6389_v49  ;;  %4660 = vmatpush1.bf16.msra.mxu0 %v6391_v28 }
 0x7ed   :  { %4662 = vmatprep.subr.bf16.mxu0 %v6399_v27 }
 0x7ef   :  { %4692 = vmatpush1.bf16.msra.mxu1 %v6394_v4 }
 0x7f0   :  { %4694 = vmatprep.subr.bf16.mxu1 %v6401_v37  ;;  %4664 = vmatpush1.bf16.msra.mxu0 %v6403_v42 }
 0x7f1   :  { %4666 = vmatprep.subr.bf16.mxu0 %v6411_v44 }
 0x7f3   :  { %4696 = vmatpush1.bf16.msra.mxu1 %v6406_v22 }
 0x7f4   :  { %4698 = vmatprep.subr.bf16.mxu1 %v6413_v6  ;;  %4668 = vmatpush1.bf16.msra.mxu0 %v6415_v15 }
 0x7f5   :  { %4670 = vmatprep.subr.bf16.mxu0 %v6422_v41 }
 0x7f7   :  { %4700 = vmatpush1.bf16.msra.mxu1 %v6418_v19 }
 0x7f8   :  { %4702 = vmatprep.subr.bf16.mxu1 %v6424_v5  ;;  %4672 = vmatpush1.bf16.msra.mxu0 %v6427_v17 }
 0x7f9   :  { %4674 = vmatprep.subr.bf16.mxu0 %v6433_v58 }
 0x7fb   :  { %4704 = vmatpush1.bf16.msra.mxu1 %v6431_v11 }
 0x7fc   :  { %4706 = vmatprep.subr.bf16.mxu1 %v6435_v12  ;;  %4676 = vmatpush1.bf16.msra.mxu0 %v6438_v9 }
 0x7fd   :  { %4678 = vmatprep.subr.bf16.mxu0 %v6447_v38 }
 0x7ff   :  { %4708 = vmatpush1.bf16.msra.mxu1 %v6442_v53 }
 0x800   :  { %4710 = vmatprep.subr.bf16.mxu1 %v6449_v13  ;;  %4680 = vmatpush1.bf16.msra.mxu0 %v6451_v26 }
 0x801   :  { %4714 = vmatprep.subr.bf16.mxu0 %v6363_v36 }
 0x803   :  { %4712 = vmatpush1.bf16.msra.mxu1 %v6454_v52 }
 0x804   :  { %4746 = vmatprep.subr.bf16.mxu1 %v6365_v61 }
 0x880   :  { %v1803_v57 = vpop.f32.mrb[14].mxu0  ;;  %v1874_v1 = vpop.f32.mrb[30].mxu1 }
 0x881   :  { %v1879_v29 = vadd.f32 %v1803_v57, %v6852_v20  ;;  %v1805_v34 = vpop.f32.mrb[15].mxu0  ;;  %v1876_v47 = vpop.f32.mrb[31].mxu1  ;;  %v5239_v48 = vadd.f32 %v1874_v1, %v6044_v16  ;;  %v6856_v1 = vsub.s32 1, %v6854_v35 }
 0x882   :  { %v1880_v30 = vadd.f32 %v1805_v34, %v6853_v24  ;;  %v5240_v56 = vadd.f32 %v1876_v47, %v6048_v63 }
 0x883   :  { %v3912_v7 = vmul.f32 -1.442695, %v1879_v29  ;;  %v3914_v2 = vmul.f32 -1.442695, %v5239_v48 }
 0x884   :  { %v3913_v8 = vmul.f32 -1.442695, %v1880_v30 }
 0x885   :  { %5443 = vpow2.f32 %v3912_v7 }
 0x886   :  { %5445 = vpow2.f32 %v3913_v8 }
 0x887   :  { %5447 = vtanh.f32 %v5240_v56  ;;  %v6857_v56 = vsub.s32 2, %v6854_v35 }
 0x888   :  { %5449 = vpow2.f32 %v3914_v2 }
 0x88f   :  { %v5444_v33 = vpop.eup %5443 }
 0x890   :  { %v1892_v14 = vadd.f32 1.0, %v5444_v33  ;;  %v5446_v32 = vpop.eup %5445  ;;  %v6858_v33 = vsub.s32 3, %v6854_v35 }
 0x891   :  { %v1893_v40 = vadd.f32 1.0, %v5446_v32  ;;  %v5448_v46 = vpop.eup %5447 }
 0x892   :  { %5451 = vrcp.f32 %v1892_v14  ;;  %v5450_v60 = vpop.eup %5449 }
 0x893   :  { %5453 = vrcp.f32 %v1893_v40  ;;  %v1894_v10 = vadd.f32 1.0, %v5450_v60 }
 0x895   :  { %5455 = vrcp.f32 %v1894_v10 }
 0x89c   :  { %v5452_v51 = vpop.eup %5451 }
 0x89d   :  { %v1903_v55 = vmul.f32 %v5452_v51, %v5448_v46  ;;  %v5454_v3 = vpop.eup %5453 }
 0x89e   :  { %v1902_v18 = vmul.f32 %v5454_v3, %v6326_v50  ;;  %v3915_v50 = vld [vmem:[%s6836_s3 + $0x4] sm:$0xf] }
 0x89f   :  { %v5456_v63 = vpop.eup %5455  ;;  %v6509_v57 = vrot.slane %v3915_v50, %v6855_v39  ;;  %v6513_v20 = vrot.slane %v3915_v50, %v6856_v1  ;;  %v6519_v2 = vrot.slane %v3915_v50, %v6857_v56  ;;  %v6523_v14 = vrot.slane %v3915_v50, %v6858_v33 }
 0x8a0   :  { %v1904_v16 = vadd.f32 %v1903_v55, %v1902_v18 }
 0x8a2   :  { %5457 = vtanh.f32 %v1904_v16 }
 0x8ac   :  { %v5458_v45 = vpop.eup %5457 }
 0x8ad   :  { %v1906_v31 = vmul.f32 %v5458_v45, %v5456_v63 }
 0x8af   :  { %2112 = vmatmul.mubr.f32.gmra.mrb[30].mxu0 %v1906_v31  ;;  %2225 = vmatmul.mubr.f32.gmra.mrb[46].mxu1 %v1906_v31 }
 0x8b0   :  { %2396 = vmatprep.mubr.f32.mxu0 %v6851_v0  ;;  %2467 = vmatprep.mubr.f32.mxu1 %v6851_v0 }
 0x8b3   :  { %2397 = vmatmul.mubr.f32.vlgmr.msra.gmra.mrb[16].mxu0 %v6851_v0  ;;  %2468 = vmatmul.mubr.f32.vlgmr.msra.gmra.mrb[32].mxu1 %v6851_v0 }
 0x8b4   :  { %4716 = vmatpush1.bf16.msra.mxu0 %v6367_v62  ;;  %4748 = vmatpush1.bf16.msra.mxu1 %v6370_v54 }
 0x8b5   :  { %4718 = vmatprep.subr.bf16.mxu0 %v6375_v25  ;;  %4750 = vmatprep.subr.bf16.mxu1 %v6377_v43 }
 0x8b6   :  { %2571 = vmatprep.mubr.f32.mxu0 %v6851_v0  ;;  %2642 = vmatprep.mubr.f32.mxu1 %v6851_v0 }
 0x8b8   :  { %4720 = vmatpush1.bf16.msra.mxu0 %v6379_v21  ;;  %4752 = vmatpush1.bf16.msra.mxu1 %v6382_v23 }
 0x8b9   :  { %4722 = vmatprep.subr.bf16.mxu0 %v6387_v59  ;;  %4754 = vmatprep.subr.bf16.mxu1 %v6389_v49 }
 0x8bc   :  { %4724 = vmatpush1.bf16.msra.mxu0 %v6391_v28  ;;  %4756 = vmatpush1.bf16.msra.mxu1 %v6394_v4 }
 0x8bd   :  { %4726 = vmatprep.subr.bf16.mxu0 %v6399_v27  ;;  %4758 = vmatprep.subr.bf16.mxu1 %v6401_v37 }
 0x8c0   :  { %4728 = vmatpush1.bf16.msra.mxu0 %v6403_v42  ;;  %4760 = vmatpush1.bf16.msra.mxu1 %v6406_v22 }
 0x8c1   :  { %4730 = vmatprep.subr.bf16.mxu0 %v6411_v44  ;;  %4762 = vmatprep.subr.bf16.mxu1 %v6413_v6 }
 0x8c4   :  { %4732 = vmatpush1.bf16.msra.mxu0 %v6415_v15  ;;  %4764 = vmatpush1.bf16.msra.mxu1 %v6418_v19 }
 0x8c5   :  { %4734 = vmatprep.subr.bf16.mxu0 %v6422_v41  ;;  %4766 = vmatprep.subr.bf16.mxu1 %v6424_v5 }
 0x8c8   :  { %4736 = vmatpush1.bf16.msra.mxu0 %v6427_v17  ;;  %4768 = vmatpush1.bf16.msra.mxu1 %v6431_v11 }
 0x8c9   :  { %4738 = vmatprep.subr.bf16.mxu0 %v6433_v58  ;;  %4770 = vmatprep.subr.bf16.mxu1 %v6435_v12 }
 0x8cc   :  { %4740 = vmatpush1.bf16.msra.mxu0 %v6438_v9  ;;  %4772 = vmatpush1.bf16.msra.mxu1 %v6442_v53 }
 0x8cd   :  { %4742 = vmatprep.subr.bf16.mxu0 %v6447_v38  ;;  %4774 = vmatprep.subr.bf16.mxu1 %v6449_v13 }
 0x8d0   :  { %4744 = vmatpush1.bf16.msra.mxu0 %v6451_v26  ;;  %4776 = vmatpush1.bf16.msra.mxu1 %v6454_v52 }
 0x8d1   :  { %4778 = vmatprep.subr.bf16.mxu0 %v6363_v36  ;;  %4810 = vmatprep.subr.bf16.mxu1 %v6365_v61 }
 0x986   :  { %v2398_v29 = vpop.f32.mrb[16].mxu0  ;;  %v2469_v34 = vpop.f32.mrb[32].mxu1 }
 0x987   :  { %v5241_v47 = vadd.f32 %v2398_v29, %v6509_v57  ;;  %v2400_v24 = vpop.f32.mrb[17].mxu0  ;;  %v2471_v30 = vpop.f32.mrb[33].mxu1  ;;  %v5257_v32 = vadd.f32 %v2469_v34, %v6519_v2 }
 0x988   :  { %v5242_v7 = vadd.f32 %v2400_v24, %v6513_v20  ;;  %v5258_v40 = vadd.f32 %v2471_v30, %v6523_v14 }
 0x989   :  { %v3916_v8 = vmul.f32 -1.442695, %v5241_v47  ;;  %v3918_v46 = vmul.f32 -1.442695, %v5257_v32 }
 0x98a   :  { %v3917_v48 = vmul.f32 -1.442695, %v5242_v7 }
 0x98b   :  { %5459 = vpow2.f32 %v3916_v8 }
 0x98c   :  { %5461 = vpow2.f32 %v3917_v48 }
 0x98d   :  { %5463 = vtanh.f32 %v5258_v40 }
 0x98e   :  { %5465 = vpow2.f32 %v3918_v46 }
 0x995   :  { %v5460_v60 = vpop.eup %5459 }
 0x996   :  { %v2487_v51 = vadd.f32 1.0, %v5460_v60  ;;  %v5462_v55 = vpop.eup %5461 }
 0x997   :  { %v2488_v3 = vadd.f32 1.0, %v5462_v55  ;;  %v5464_v10 = vpop.eup %5463 }
 0x998   :  { %5467 = vrcp.f32 %v2487_v51  ;;  %v5466_v18 = vpop.eup %5465 }
 0x999   :  { %5469 = vrcp.f32 %v2488_v3  ;;  %v2489_v31 = vadd.f32 1.0, %v5466_v18 }
 0x99b   :  { %5471 = vrcp.f32 %v2489_v31 }
 0x9a2   :  { %v5468_v16 = vpop.eup %5467 }
 0x9a3   :  { %v2498_v63 = vmul.f32 %v5468_v16, %v5464_v10  ;;  %v5470_v45 = vpop.eup %5469 }
 0x9a4   :  { %v2497_v50 = vmul.f32 0.0, %v5470_v45 }
 0x9a5   :  { %v5472_v39 = vpop.eup %5471 }
 0x9a6   :  { %v6527_v35 = vadd.f32 %v2498_v63, %v2497_v50 }
 0x9a8   :  { %5473 = vtanh.f32 %v6527_v35 }
 0x9b2   :  { %v5474_v1 = vpop.eup %5473 }
 0x9b3   :  { %v6530_v29 = vmul.f32 %v5474_v1, %v5472_v39 }
 0x9b5   :  { %2572 = vmatmul.mubr.f32.vlgmr.msra.gmra.mrb[18].mxu0 %v6530_v29  ;;  %2643 = vmatmul.mubr.f32.vlgmr.msra.gmra.mrb[34].mxu1 %v6530_v29 }
 0x9b6   :  { %4780 = vmatpush1.bf16.msra.mxu0 %v6367_v62  ;;  %4812 = vmatpush1.bf16.msra.mxu1 %v6370_v54 }
 0x9b7   :  { %4782 = vmatprep.subr.bf16.mxu0 %v6375_v25  ;;  %4814 = vmatprep.subr.bf16.mxu1 %v6377_v43 }
 0x9b8   :  { %2746 = vmatprep.mubr.f32.mxu0 %v6851_v0  ;;  %2817 = vmatprep.mubr.f32.mxu1 %v6851_v0 }
 0x9ba   :  { %4784 = vmatpush1.bf16.msra.mxu0 %v6379_v21  ;;  %4816 = vmatpush1.bf16.msra.mxu1 %v6382_v23 }
 0x9bb   :  { %4786 = vmatprep.subr.bf16.mxu0 %v6387_v59  ;;  %4818 = vmatprep.subr.bf16.mxu1 %v6389_v49 }
 0x9be   :  { %4788 = vmatpush1.bf16.msra.mxu0 %v6391_v28  ;;  %4820 = vmatpush1.bf16.msra.mxu1 %v6394_v4 }
 0x9bf   :  { %4790 = vmatprep.subr.bf16.mxu0 %v6399_v27  ;;  %4822 = vmatprep.subr.bf16.mxu1 %v6401_v37 }
 0x9c2   :  { %4792 = vmatpush1.bf16.msra.mxu0 %v6403_v42  ;;  %4824 = vmatpush1.bf16.msra.mxu1 %v6406_v22 }
 0x9c3   :  { %4794 = vmatprep.subr.bf16.mxu0 %v6411_v44  ;;  %4826 = vmatprep.subr.bf16.mxu1 %v6413_v6 }
 0x9c6   :  { %4796 = vmatpush1.bf16.msra.mxu0 %v6415_v15  ;;  %4828 = vmatpush1.bf16.msra.mxu1 %v6418_v19 }
 0x9c7   :  { %4798 = vmatprep.subr.bf16.mxu0 %v6422_v41  ;;  %4830 = vmatprep.subr.bf16.mxu1 %v6424_v5 }
 0x9ca   :  { %4800 = vmatpush1.bf16.msra.mxu0 %v6427_v17  ;;  %4832 = vmatpush1.bf16.msra.mxu1 %v6431_v11 }
 0x9cb   :  { %4802 = vmatprep.subr.bf16.mxu0 %v6433_v58  ;;  %4834 = vmatprep.subr.bf16.mxu1 %v6435_v12 }
 0x9ce   :  { %4804 = vmatpush1.bf16.msra.mxu0 %v6438_v9  ;;  %4836 = vmatpush1.bf16.msra.mxu1 %v6442_v53 }
 0x9cf   :  { %4806 = vmatprep.subr.bf16.mxu0 %v6447_v38  ;;  %4838 = vmatprep.subr.bf16.mxu1 %v6449_v13 }
 0x9d2   :  { %4808 = vmatpush1.bf16.msra.mxu0 %v6451_v26  ;;  %4840 = vmatpush1.bf16.msra.mxu1 %v6454_v52 }
 0x9d3   :  { %4842 = vmatprep.subr.bf16.mxu0 %v6363_v36  ;;  %4874 = vmatprep.subr.bf16.mxu1 %v6365_v61 }
 0xa88   :  { %v2573_v34 = vpop.f32.mrb[18].mxu0  ;;  %v2644_v47 = vpop.f32.mrb[34].mxu1 }
 0xa89   :  { %v5243_v24 = vadd.f32 %v2573_v34, %v6509_v57  ;;  %v2575_v30 = vpop.f32.mrb[19].mxu0  ;;  %v2646_v7 = vpop.f32.mrb[35].mxu1  ;;  %v5259_v33 = vadd.f32 %v2644_v47, %v6519_v2 }
 0xa8a   :  { %v5244_v8 = vadd.f32 %v2575_v30, %v6513_v20  ;;  %v5260_v32 = vadd.f32 %v2646_v7, %v6523_v14 }
 0xa8b   :  { %v3919_v48 = vmul.f32 -1.442695, %v5243_v24  ;;  %v3921_v40 = vmul.f32 -1.442695, %v5259_v33 }
 0xa8c   :  { %v3920_v56 = vmul.f32 -1.442695, %v5244_v8 }
 0xa8d   :  { %5475 = vpow2.f32 %v3919_v48 }
 0xa8e   :  { %5477 = vpow2.f32 %v3920_v56 }
 0xa8f   :  { %5479 = vtanh.f32 %v5260_v32 }
 0xa90   :  { %5481 = vpow2.f32 %v3921_v40 }
 0xa97   :  { %v5476_v46 = vpop.eup %5475 }
 0xa98   :  { %v2662_v60 = vadd.f32 1.0, %v5476_v46  ;;  %v5478_v51 = vpop.eup %5477 }
 0xa99   :  { %v2663_v55 = vadd.f32 1.0, %v5478_v51  ;;  %v5480_v3 = vpop.eup %5479 }
 0xa9a   :  { %5483 = vrcp.f32 %v2662_v60  ;;  %v5482_v10 = vpop.eup %5481 }
 0xa9b   :  { %5485 = vrcp.f32 %v2663_v55  ;;  %v2664_v45 = vadd.f32 1.0, %v5482_v10 }
 0xa9d   :  { %5487 = vrcp.f32 %v2664_v45 }
 0xaa4   :  { %v5484_v18 = vpop.eup %5483 }
 0xaa5   :  { %v2673_v16 = vmul.f32 %v5484_v18, %v5480_v3  ;;  %v5486_v63 = vpop.eup %5485 }
 0xaa6   :  { %v2672_v31 = vmul.f32 %v5486_v63, %v6527_v35 }
 0xaa7   :  { %v5488_v39 = vpop.eup %5487 }
 0xaa8   :  { %v6573_v50 = vadd.f32 %v2673_v16, %v2672_v31 }
 0xaaa   :  { %5489 = vtanh.f32 %v6573_v50 }
 0xab4   :  { %v5490_v1 = vpop.eup %5489 }
 0xab5   :  { %v6576_v34 = vmul.f32 %v5490_v1, %v5488_v39 }
 0xab7   :  { %2747 = vmatmul.mubr.f32.vlgmr.msra.gmra.mrb[20].mxu0 %v6576_v34  ;;  %2818 = vmatmul.mubr.f32.vlgmr.msra.gmra.mrb[36].mxu1 %v6576_v34 }
 0xab8   :  { %4844 = vmatpush1.bf16.msra.mxu0 %v6367_v62  ;;  %4876 = vmatpush1.bf16.msra.mxu1 %v6370_v54 }
 0xab9   :  { %4846 = vmatprep.subr.bf16.mxu0 %v6375_v25  ;;  %4878 = vmatprep.subr.bf16.mxu1 %v6377_v43 }
 0xaba   :  { %2921 = vmatprep.mubr.f32.mxu0 %v6851_v0  ;;  %2992 = vmatprep.mubr.f32.mxu1 %v6851_v0 }
 0xabc   :  { %4848 = vmatpush1.bf16.msra.mxu0 %v6379_v21  ;;  %4880 = vmatpush1.bf16.msra.mxu1 %v6382_v23 }
 0xabd   :  { %4850 = vmatprep.subr.bf16.mxu0 %v6387_v59  ;;  %4882 = vmatprep.subr.bf16.mxu1 %v6389_v49 }
 0xac0   :  { %4852 = vmatpush1.bf16.msra.mxu0 %v6391_v28  ;;  %4884 = vmatpush1.bf16.msra.mxu1 %v6394_v4 }
 0xac1   :  { %4854 = vmatprep.subr.bf16.mxu0 %v6399_v27  ;;  %4886 = vmatprep.subr.bf16.mxu1 %v6401_v37 }
 0xac4   :  { %4856 = vmatpush1.bf16.msra.mxu0 %v6403_v42  ;;  %4888 = vmatpush1.bf16.msra.mxu1 %v6406_v22 }
 0xac5   :  { %4858 = vmatprep.subr.bf16.mxu0 %v6411_v44  ;;  %4890 = vmatprep.subr.bf16.mxu1 %v6413_v6 }
 0xac8   :  { %4860 = vmatpush1.bf16.msra.mxu0 %v6415_v15  ;;  %4892 = vmatpush1.bf16.msra.mxu1 %v6418_v19 }
 0xac9   :  { %4862 = vmatprep.subr.bf16.mxu0 %v6422_v41  ;;  %4894 = vmatprep.subr.bf16.mxu1 %v6424_v5 }
 0xacc   :  { %4864 = vmatpush1.bf16.msra.mxu0 %v6427_v17  ;;  %4896 = vmatpush1.bf16.msra.mxu1 %v6431_v11 }
 0xacd   :  { %4866 = vmatprep.subr.bf16.mxu0 %v6433_v58  ;;  %4898 = vmatprep.subr.bf16.mxu1 %v6435_v12 }
 0xad0   :  { %4868 = vmatpush1.bf16.msra.mxu0 %v6438_v9  ;;  %4900 = vmatpush1.bf16.msra.mxu1 %v6442_v53 }
 0xad1   :  { %4870 = vmatprep.subr.bf16.mxu0 %v6447_v38  ;;  %4902 = vmatprep.subr.bf16.mxu1 %v6449_v13 }
 0xad4   :  { %4872 = vmatpush1.bf16.msra.mxu0 %v6451_v26  ;;  %4904 = vmatpush1.bf16.msra.mxu1 %v6454_v52 }
 0xad5   :  { %4906 = vmatprep.subr.bf16.mxu0 %v6363_v36  ;;  %4938 = vmatprep.subr.bf16.mxu1 %v6365_v61 }
 0xb8a   :  { %v2748_v35 = vpop.f32.mrb[20].mxu0  ;;  %v2819_v47 = vpop.f32.mrb[36].mxu1 }
 0xb8b   :  { %v5245_v24 = vadd.f32 %v2748_v35, %v6509_v57  ;;  %v2750_v30 = vpop.f32.mrb[21].mxu0  ;;  %v2821_v7 = vpop.f32.mrb[37].mxu1  ;;  %v5261_v33 = vadd.f32 %v2819_v47, %v6519_v2 }
 0xb8c   :  { %v5246_v8 = vadd.f32 %v2750_v30, %v6513_v20  ;;  %v5262_v32 = vadd.f32 %v2821_v7, %v6523_v14 }
 0xb8d   :  { %v3922_v48 = vmul.f32 -1.442695, %v5245_v24  ;;  %v3924_v40 = vmul.f32 -1.442695, %v5261_v33 }
 0xb8e   :  { %v3923_v56 = vmul.f32 -1.442695, %v5246_v8 }
 0xb8f   :  { %5491 = vpow2.f32 %v3922_v48 }
 0xb90   :  { %5493 = vpow2.f32 %v3923_v56 }
 0xb91   :  { %5495 = vtanh.f32 %v5262_v32 }
 0xb92   :  { %5497 = vpow2.f32 %v3924_v40 }
 0xb99   :  { %v5492_v46 = vpop.eup %5491 }
 0xb9a   :  { %v2837_v60 = vadd.f32 1.0, %v5492_v46  ;;  %v5494_v51 = vpop.eup %5493 }
 0xb9b   :  { %v2838_v55 = vadd.f32 1.0, %v5494_v51  ;;  %v5496_v3 = vpop.eup %5495 }
 0xb9c   :  { %5499 = vrcp.f32 %v2837_v60  ;;  %v5498_v10 = vpop.eup %5497 }
 0xb9d   :  { %5501 = vrcp.f32 %v2838_v55  ;;  %v2839_v45 = vadd.f32 1.0, %v5498_v10 }
 0xb9f   :  { %5503 = vrcp.f32 %v2839_v45 }
 0xba6   :  { %v5500_v18 = vpop.eup %5499 }
 0xba7   :  { %v2848_v16 = vmul.f32 %v5500_v18, %v5496_v3  ;;  %v5502_v63 = vpop.eup %5501 }
 0xba8   :  { %v2847_v31 = vmul.f32 %v5502_v63, %v6573_v50 }
 0xba9   :  { %v5504_v1 = vpop.eup %5503 }
 0xbaa   :  { %v6619_v39 = vadd.f32 %v2848_v16, %v2847_v31 }
 0xbac   :  { %5505 = vtanh.f32 %v6619_v39 }
 0xbb6   :  { %v5506_v35 = vpop.eup %5505 }
 0xbb7   :  { %v6622_v47 = vmul.f32 %v5506_v35, %v5504_v1 }
 0xbb9   :  { %2922 = vmatmul.mubr.f32.vlgmr.msra.gmra.mrb[22].mxu0 %v6622_v47  ;;  %2993 = vmatmul.mubr.f32.vlgmr.msra.gmra.mrb[38].mxu1 %v6622_v47 }
 0xbba   :  { %4908 = vmatpush1.bf16.msra.mxu0 %v6367_v62  ;;  %4940 = vmatpush1.bf16.msra.mxu1 %v6370_v54 }
 0xbbb   :  { %4910 = vmatprep.subr.bf16.mxu0 %v6375_v25  ;;  %4942 = vmatprep.subr.bf16.mxu1 %v6377_v43 }
 0xbbc   :  { %3096 = vmatprep.mubr.f32.mxu0 %v6851_v0  ;;  %3167 = vmatprep.mubr.f32.mxu1 %v6851_v0 }
 0xbbe   :  { %4912 = vmatpush1.bf16.msra.mxu0 %v6379_v21  ;;  %4944 = vmatpush1.bf16.msra.mxu1 %v6382_v23 }
 0xbbf   :  { %4914 = vmatprep.subr.bf16.mxu0 %v6387_v59  ;;  %4946 = vmatprep.subr.bf16.mxu1 %v6389_v49 }
 0xbc2   :  { %4916 = vmatpush1.bf16.msra.mxu0 %v6391_v28  ;;  %4948 = vmatpush1.bf16.msra.mxu1 %v6394_v4 }
 0xbc3   :  { %4918 = vmatprep.subr.bf16.mxu0 %v6399_v27  ;;  %4950 = vmatprep.subr.bf16.mxu1 %v6401_v37 }
 0xbc6   :  { %4920 = vmatpush1.bf16.msra.mxu0 %v6403_v42  ;;  %4952 = vmatpush1.bf16.msra.mxu1 %v6406_v22 }
 0xbc7   :  { %4922 = vmatprep.subr.bf16.mxu0 %v6411_v44  ;;  %4954 = vmatprep.subr.bf16.mxu1 %v6413_v6 }
 0xbca   :  { %4924 = vmatpush1.bf16.msra.mxu0 %v6415_v15  ;;  %4956 = vmatpush1.bf16.msra.mxu1 %v6418_v19 }
 0xbcb   :  { %4926 = vmatprep.subr.bf16.mxu0 %v6422_v41  ;;  %4958 = vmatprep.subr.bf16.mxu1 %v6424_v5 }
 0xbce   :  { %4928 = vmatpush1.bf16.msra.mxu0 %v6427_v17  ;;  %4960 = vmatpush1.bf16.msra.mxu1 %v6431_v11 }
 0xbcf   :  { %4930 = vmatprep.subr.bf16.mxu0 %v6433_v58  ;;  %4962 = vmatprep.subr.bf16.mxu1 %v6435_v12 }
 0xbd2   :  { %4932 = vmatpush1.bf16.msra.mxu0 %v6438_v9  ;;  %4964 = vmatpush1.bf16.msra.mxu1 %v6442_v53 }
 0xbd3   :  { %4934 = vmatprep.subr.bf16.mxu0 %v6447_v38  ;;  %4966 = vmatprep.subr.bf16.mxu1 %v6449_v13 }
 0xbd6   :  { %4936 = vmatpush1.bf16.msra.mxu0 %v6451_v26  ;;  %4968 = vmatpush1.bf16.msra.mxu1 %v6454_v52 }
 0xbd7   :  { %4970 = vmatprep.subr.bf16.mxu0 %v6363_v36  ;;  %5002 = vmatprep.subr.bf16.mxu1 %v6365_v61 }
 0xc8c   :  { %v2923_v50 = vpop.f32.mrb[22].mxu0  ;;  %v2994_v24 = vpop.f32.mrb[38].mxu1 }
 0xc8d   :  { %v5247_v30 = vadd.f32 %v2923_v50, %v6509_v57  ;;  %v2925_v7 = vpop.f32.mrb[23].mxu0  ;;  %v2996_v8 = vpop.f32.mrb[39].mxu1  ;;  %v5263_v32 = vadd.f32 %v2994_v24, %v6519_v2 }
 0xc8e   :  { %v5248_v48 = vadd.f32 %v2925_v7, %v6513_v20  ;;  %v5264_v40 = vadd.f32 %v2996_v8, %v6523_v14 }
 0xc8f   :  { %v3925_v56 = vmul.f32 -1.442695, %v5247_v30  ;;  %v3927_v46 = vmul.f32 -1.442695, %v5263_v32 }
 0xc90   :  { %v3926_v33 = vmul.f32 -1.442695, %v5248_v48 }
 0xc91   :  { %5507 = vpow2.f32 %v3925_v56 }
 0xc92   :  { %5509 = vpow2.f32 %v3926_v33 }
 0xc93   :  { %5511 = vtanh.f32 %v5264_v40 }
 0xc94   :  { %5513 = vpow2.f32 %v3927_v46 }
 0xc9b   :  { %v5508_v60 = vpop.eup %5507 }
 0xc9c   :  { %v3012_v51 = vadd.f32 1.0, %v5508_v60  ;;  %v5510_v55 = vpop.eup %5509 }
 0xc9d   :  { %v3013_v3 = vadd.f32 1.0, %v5510_v55  ;;  %v5512_v10 = vpop.eup %5511 }
 0xc9e   :  { %5515 = vrcp.f32 %v3012_v51  ;;  %v5514_v18 = vpop.eup %5513 }
 0xc9f   :  { %5517 = vrcp.f32 %v3013_v3  ;;  %v3014_v31 = vadd.f32 1.0, %v5514_v18 }
 0xca1   :  { %5519 = vrcp.f32 %v3014_v31 }
 0xca8   :  { %v5516_v16 = vpop.eup %5515 }
 0xca9   :  { %v3023_v63 = vmul.f32 %v5516_v16, %v5512_v10  ;;  %v5518_v45 = vpop.eup %5517 }
 0xcaa   :  { %v3022_v1 = vmul.f32 %v5518_v45, %v6619_v39 }
 0xcab   :  { %v5520_v50 = vpop.eup %5519 }
 0xcac   :  { %v6665_v35 = vadd.f32 %v3023_v63, %v3022_v1 }
 0xcae   :  { %5521 = vtanh.f32 %v6665_v35 }
 0xcb8   :  { %v5522_v24 = vpop.eup %5521 }
 0xcb9   :  { %v6668_v30 = vmul.f32 %v5522_v24, %v5520_v50 }
 0xcbb   :  { %3097 = vmatmul.mubr.f32.vlgmr.msra.gmra.mrb[24].mxu0 %v6668_v30  ;;  %3168 = vmatmul.mubr.f32.vlgmr.msra.gmra.mrb[40].mxu1 %v6668_v30 }
 0xcbc   :  { %4972 = vmatpush1.bf16.msra.mxu0 %v6367_v62  ;;  %5004 = vmatpush1.bf16.msra.mxu1 %v6370_v54 }
 0xcbd   :  { %4974 = vmatprep.subr.bf16.mxu0 %v6375_v25  ;;  %5006 = vmatprep.subr.bf16.mxu1 %v6377_v43 }
 0xcbe   :  { %3271 = vmatprep.mubr.f32.mxu0 %v6851_v0  ;;  %3342 = vmatprep.mubr.f32.mxu1 %v6851_v0 }
 0xcc0   :  { %4976 = vmatpush1.bf16.msra.mxu0 %v6379_v21  ;;  %5008 = vmatpush1.bf16.msra.mxu1 %v6382_v23 }
 0xcc1   :  { %4978 = vmatprep.subr.bf16.mxu0 %v6387_v59  ;;  %5010 = vmatprep.subr.bf16.mxu1 %v6389_v49 }
 0xcc4   :  { %4980 = vmatpush1.bf16.msra.mxu0 %v6391_v28  ;;  %5012 = vmatpush1.bf16.msra.mxu1 %v6394_v4 }
 0xcc5   :  { %4982 = vmatprep.subr.bf16.mxu0 %v6399_v27  ;;  %5014 = vmatprep.subr.bf16.mxu1 %v6401_v37 }
 0xcc8   :  { %4984 = vmatpush1.bf16.msra.mxu0 %v6403_v42  ;;  %5016 = vmatpush1.bf16.msra.mxu1 %v6406_v22 }
 0xcc9   :  { %4986 = vmatprep.subr.bf16.mxu0 %v6411_v44  ;;  %5018 = vmatprep.subr.bf16.mxu1 %v6413_v6 }
 0xccc   :  { %4988 = vmatpush1.bf16.msra.mxu0 %v6415_v15  ;;  %5020 = vmatpush1.bf16.msra.mxu1 %v6418_v19 }
 0xccd   :  { %4990 = vmatprep.subr.bf16.mxu0 %v6422_v41  ;;  %5022 = vmatprep.subr.bf16.mxu1 %v6424_v5 }
 0xcd0   :  { %4992 = vmatpush1.bf16.msra.mxu0 %v6427_v17  ;;  %5024 = vmatpush1.bf16.msra.mxu1 %v6431_v11 }
 0xcd1   :  { %4994 = vmatprep.subr.bf16.mxu0 %v6433_v58  ;;  %5026 = vmatprep.subr.bf16.mxu1 %v6435_v12 }
 0xcd4   :  { %4996 = vmatpush1.bf16.msra.mxu0 %v6438_v9  ;;  %5028 = vmatpush1.bf16.msra.mxu1 %v6442_v53 }
 0xcd5   :  { %4998 = vmatprep.subr.bf16.mxu0 %v6447_v38  ;;  %5030 = vmatprep.subr.bf16.mxu1 %v6449_v13 }
 0xcd8   :  { %5000 = vmatpush1.bf16.msra.mxu0 %v6451_v26  ;;  %5032 = vmatpush1.bf16.msra.mxu1 %v6454_v52 }
 0xcd9   :  { %5034 = vmatprep.subr.bf16.mxu0 %v6363_v36  ;;  %5066 = vmatprep.subr.bf16.mxu1 %v6365_v61 }
 0xd8e   :  { %v3098_v39 = vpop.f32.mrb[24].mxu0  ;;  %v3169_v7 = vpop.f32.mrb[40].mxu1 }
 0xd8f   :  { %v5249_v8 = vadd.f32 %v3098_v39, %v6509_v57  ;;  %v3100_v48 = vpop.f32.mrb[25].mxu0  ;;  %v3171_v56 = vpop.f32.mrb[41].mxu1  ;;  %v5265_v46 = vadd.f32 %v3169_v7, %v6519_v2 }
 0xd90   :  { %v5250_v33 = vadd.f32 %v3100_v48, %v6513_v20  ;;  %v5266_v60 = vadd.f32 %v3171_v56, %v6523_v14 }
 0xd91   :  { %v3928_v32 = vmul.f32 -1.442695, %v5249_v8  ;;  %v3930_v51 = vmul.f32 -1.442695, %v5265_v46 }
 0xd92   :  { %v3929_v40 = vmul.f32 -1.442695, %v5250_v33 }
 0xd93   :  { %5523 = vpow2.f32 %v3928_v32 }
 0xd94   :  { %5525 = vpow2.f32 %v3929_v40 }
 0xd95   :  { %5527 = vtanh.f32 %v5266_v60 }
 0xd96   :  { %5529 = vpow2.f32 %v3930_v51 }
 0xd9d   :  { %v5524_v55 = vpop.eup %5523 }
 0xd9e   :  { %v3187_v3 = vadd.f32 1.0, %v5524_v55  ;;  %v5526_v10 = vpop.eup %5525 }
 0xd9f   :  { %v3188_v18 = vadd.f32 1.0, %v5526_v10  ;;  %v5528_v16 = vpop.eup %5527 }
 0xda0   :  { %5531 = vrcp.f32 %v3187_v3  ;;  %v5530_v63 = vpop.eup %5529 }
 0xda1   :  { %5533 = vrcp.f32 %v3188_v18  ;;  %v3189_v50 = vadd.f32 1.0, %v5530_v63 }
 0xda3   :  { %5535 = vrcp.f32 %v3189_v50 }
 0xdaa   :  { %v5532_v45 = vpop.eup %5531 }
 0xdab   :  { %v3198_v31 = vmul.f32 %v5532_v45, %v5528_v16  ;;  %v5534_v1 = vpop.eup %5533 }
 0xdac   :  { %v3197_v24 = vmul.f32 %v5534_v1, %v6665_v35 }
 0xdad   :  { %v5536_v7 = vpop.eup %5535 }
 0xdae   :  { %v6711_v39 = vadd.f32 %v3198_v31, %v3197_v24 }
 0xdb0   :  { %5537 = vtanh.f32 %v6711_v39 }
 0xdba   :  { %v5538_v8 = vpop.eup %5537 }
 0xdbb   :  { %v6714_v48 = vmul.f32 %v5538_v8, %v5536_v7 }
 0xdbd   :  { %3272 = vmatmul.mubr.f32.vlgmr.msra.gmra.mrb[26].mxu0 %v6714_v48  ;;  %3343 = vmatmul.mubr.f32.vlgmr.msra.gmra.mrb[42].mxu1 %v6714_v48 }
 0xdbe   :  { %5036 = vmatpush1.bf16.msra.mxu0 %v6367_v62  ;;  %5068 = vmatpush1.bf16.msra.mxu1 %v6370_v54 }
 0xdbf   :  { %5038 = vmatprep.subr.bf16.mxu0 %v6375_v25  ;;  %5070 = vmatprep.subr.bf16.mxu1 %v6377_v43 }
 0xdc0   :  { %3446 = vmatprep.mubr.f32.mxu0 %v6851_v0  ;;  %3517 = vmatprep.mubr.f32.mxu1 %v6851_v0 }
 0xdc2   :  { %5040 = vmatpush1.bf16.msra.mxu0 %v6379_v21  ;;  %5072 = vmatpush1.bf16.msra.mxu1 %v6382_v23 }
 0xdc3   :  { %5042 = vmatprep.subr.bf16.mxu0 %v6387_v59  ;;  %5074 = vmatprep.subr.bf16.mxu1 %v6389_v49 }
 0xdc6   :  { %5044 = vmatpush1.bf16.msra.mxu0 %v6391_v28  ;;  %5076 = vmatpush1.bf16.msra.mxu1 %v6394_v4 }
 0xdc7   :  { %5046 = vmatprep.subr.bf16.mxu0 %v6399_v27  ;;  %5078 = vmatprep.subr.bf16.mxu1 %v6401_v37 }
 0xdca   :  { %5048 = vmatpush1.bf16.msra.mxu0 %v6403_v42  ;;  %5080 = vmatpush1.bf16.msra.mxu1 %v6406_v22 }
 0xdcb   :  { %5050 = vmatprep.subr.bf16.mxu0 %v6411_v44  ;;  %5082 = vmatprep.subr.bf16.mxu1 %v6413_v6 }
 0xdce   :  { %5052 = vmatpush1.bf16.msra.mxu0 %v6415_v15  ;;  %5084 = vmatpush1.bf16.msra.mxu1 %v6418_v19 }
 0xdcf   :  { %5054 = vmatprep.subr.bf16.mxu0 %v6422_v41  ;;  %5086 = vmatprep.subr.bf16.mxu1 %v6424_v5 }
 0xdd2   :  { %5056 = vmatpush1.bf16.msra.mxu0 %v6427_v17  ;;  %5088 = vmatpush1.bf16.msra.mxu1 %v6431_v11 }
 0xdd3   :  { %5058 = vmatprep.subr.bf16.mxu0 %v6433_v58  ;;  %5090 = vmatprep.subr.bf16.mxu1 %v6435_v12 }
 0xdd6   :  { %5060 = vmatpush1.bf16.msra.mxu0 %v6438_v9  ;;  %5092 = vmatpush1.bf16.msra.mxu1 %v6442_v53 }
 0xdd7   :  { %5062 = vmatprep.subr.bf16.mxu0 %v6447_v38  ;;  %5094 = vmatprep.subr.bf16.mxu1 %v6449_v13 }
 0xdda   :  { %5064 = vmatpush1.bf16.msra.mxu0 %v6451_v26  ;;  %5096 = vmatpush1.bf16.msra.mxu1 %v6454_v52 }
 0xddb   :  { %5098 = vmatprep.subr.bf16.mxu0 %v6363_v36  ;;  %5130 = vmatprep.subr.bf16.mxu1 %v6365_v61 }
 0xe90   :  { %v3273_v35 = vpop.f32.mrb[26].mxu0  ;;  %v3344_v56 = vpop.f32.mrb[42].mxu1 }
 0xe91   :  { %v5251_v33 = vadd.f32 %v3273_v35, %v6509_v57  ;;  %v3275_v32 = vpop.f32.mrb[27].mxu0  ;;  %v3346_v40 = vpop.f32.mrb[43].mxu1  ;;  %v5267_v55 = vadd.f32 %v3344_v56, %v6519_v2 }
 0xe92   :  { %v5252_v46 = vadd.f32 %v3275_v32, %v6513_v20  ;;  %v5268_v3 = vadd.f32 %v3346_v40, %v6523_v14  ;;  %v3740_v32 = vld [vmem:[#allocation10 + $0x20] sm:$0xff]  ;;  %v3741_v40 = vld [vmem:[#allocation10 + $0x28] sm:$0xff] }
 0xe93   :  { %v3931_v60 = vmul.f32 -1.442695, %v5251_v33  ;;  %v3933_v10 = vmul.f32 -1.442695, %v5267_v55 }
 0xe94   :  { %v3932_v51 = vmul.f32 -1.442695, %v5252_v46  ;;  %v5169_v46 = vpack.c.bf16 %v3741_v40, %v3740_v32 }
 0xe95   :  { %5539 = vpow2.f32 %v3931_v60  ;;  %v3742_v60 = vld [vmem:[#allocation10 + $0x30] sm:$0xff] }
 0xe96   :  { %5541 = vpow2.f32 %v3932_v51  ;;  %v3743_v51 = vld [vmem:[#allocation10 + $0x38] sm:$0xff] }
 0xe97   :  { %5543 = vtanh.f32 %v5268_v3  ;;  %v5173_v55 = vpack.c.bf16 %v3743_v51, %v3742_v60  ;;  %v3744_v3 = vld [vmem:[#allocation10 + $0x40] sm:$0xff] }
 0xe98   :  { %5545 = vpow2.f32 %v3933_v10  ;;  %v3745_v10 = vld [vmem:[#allocation10 + $0x48] sm:$0xff] }
 0xe9f   :  { %v5540_v36 = vpop.eup %5539 }
 0xea0   :  { %v3362_v18 = vadd.f32 1.0, %v5540_v36  ;;  %v5542_v61 = vpop.eup %5541  ;;  %v5177_v36 = vpack.c.bf16 %v3745_v10, %v3744_v3 }
 0xea1   :  { %v3363_v16 = vadd.f32 1.0, %v5542_v61  ;;  %v5544_v63 = vpop.eup %5543  ;;  %v3747_v61 = vld [vmem:[#allocation10 + $0x58] sm:$0xff] }
 0xea2   :  { %5547 = vrcp.f32 %v3362_v18  ;;  %v5546_v45 = vpop.eup %5545  ;;  %v3746_v18 = vld [vmem:[#allocation10 + $0x50] sm:$0xff] }
 0xea3   :  { %5549 = vrcp.f32 %v3363_v16  ;;  %v3364_v24 = vadd.f32 1.0, %v5546_v45  ;;  %v5181_v16 = vpack.c.bf16 %v3747_v61, %v3746_v18  ;;  %v3749_v45 = vld [vmem:[#allocation10 + $0x68] sm:$0xff] }
 0xea5   :  { %5551 = vrcp.f32 %v3364_v24 }
 0xeac   :  { %v5548_v31 = vpop.eup %5547 }
 0xead   :  { %v3373_v1 = vmul.f32 %v5548_v31, %v5544_v63  ;;  %v5550_v50 = vpop.eup %5549  ;;  %v3748_v63 = vld [vmem:[#allocation10 + $0x60] sm:$0xff]  ;;  %v3750_v31 = vld [vmem:[#allocation10 + $0x70] sm:$0xff] }
 0xeae   :  { %v3372_v7 = vmul.f32 %v5550_v50, %v6711_v39 }
 0xeaf   :  { %v5552_v35 = vpop.eup %5551 }
 0xeb0   :  { %v6757_v8 = vadd.f32 %v3373_v1, %v3372_v7  ;;  %v3751_v1 = vld [vmem:[#allocation10 + $0x78] sm:$0xff] }
 0xeb1   :  { %v5189_v50 = vpack.c.bf16 %v3751_v1, %v3750_v31 }
 0xeb2   :  { %5553 = vtanh.f32 %v6757_v8 }
 0xebc   :  { %v5554_v56 = vpop.eup %5553 }
 0xebd   :  { %v6760_v33 = vmul.f32 %v5554_v56, %v5552_v35 }
 0xebf   :  { %3447 = vmatmul.mubr.f32.vlgmr.msra.gmra.mrb[28].mxu0 %v6760_v33  ;;  %3518 = vmatmul.mubr.f32.vlgmr.msra.gmra.mrb[44].mxu1 %v6760_v33 }
 0xec0   :  { %5100 = vmatpush1.bf16.msra.mxu0 %v6367_v62  ;;  %5132 = vmatpush1.bf16.msra.mxu1 %v6370_v54  ;;  %v3737_v62 = vld [vmem:[#allocation10 + $0x8] sm:$0xff] }
 0xec1   :  { %5102 = vmatprep.subr.bf16.mxu0 %v6375_v25  ;;  %5134 = vmatprep.subr.bf16.mxu1 %v6377_v43 }
 0xec2   :  { %3621 = vmatprep.mubr.f32.mxu0 %v6851_v0  ;;  %3692 = vmatprep.mubr.f32.mxu1 %v6851_v0  ;;  %v3736_v0 = vld [vmem:[#allocation10] sm:$0xff] }
 0xec3   :  { %v5161_v54 = vpack.c.bf16 %v3737_v62, %v3736_v0 }
 0xec4   :  { %5104 = vmatpush1.bf16.msra.mxu0 %v6379_v21  ;;  %5136 = vmatpush1.bf16.msra.mxu1 %v6382_v23 }
 0xec5   :  { %5106 = vmatprep.subr.bf16.mxu0 %v6387_v59  ;;  %5138 = vmatprep.subr.bf16.mxu1 %v6389_v49 }
 0xec8   :  { %5108 = vmatpush1.bf16.msra.mxu0 %v6391_v28  ;;  %5140 = vmatpush1.bf16.msra.mxu1 %v6394_v4 }
 0xec9   :  { %5110 = vmatprep.subr.bf16.mxu0 %v6399_v27  ;;  %5142 = vmatprep.subr.bf16.mxu1 %v6401_v37 }
 0xecc   :  { %5112 = vmatpush1.bf16.msra.mxu0 %v6403_v42  ;;  %5144 = vmatpush1.bf16.msra.mxu1 %v6406_v22 }
 0xecd   :  { %5114 = vmatprep.subr.bf16.mxu0 %v6411_v44  ;;  %5146 = vmatprep.subr.bf16.mxu1 %v6413_v6 }
 0xed0   :  { %5116 = vmatpush1.bf16.msra.mxu0 %v6415_v15  ;;  %5148 = vmatpush1.bf16.msra.mxu1 %v6418_v19 }
 0xed1   :  { %5118 = vmatprep.subr.bf16.mxu0 %v6422_v41  ;;  %5150 = vmatprep.subr.bf16.mxu1 %v6424_v5 }
 0xed4   :  { %5120 = vmatpush1.bf16.msra.mxu0 %v6427_v17  ;;  %5152 = vmatpush1.bf16.msra.mxu1 %v6431_v11 }
 0xed5   :  { %5122 = vmatprep.subr.bf16.mxu0 %v6433_v58  ;;  %5154 = vmatprep.subr.bf16.mxu1 %v6435_v12 }
 0xed8   :  { %5124 = vmatpush1.bf16.msra.mxu0 %v6438_v9  ;;  %5156 = vmatpush1.bf16.msra.mxu1 %v6442_v53  ;;  %v3738_v53 = vld [vmem:[#allocation10 + $0x10] sm:$0xff] }
 0xed9   :  { %5126 = vmatprep.subr.bf16.mxu0 %v6447_v38  ;;  %5158 = vmatprep.subr.bf16.mxu1 %v6449_v13  ;;  %v3739_v38 = vld [vmem:[#allocation10 + $0x18] sm:$0xff] }
 0xeda   :  { %v5165_v39 = vpack.c.bf16 %v3739_v38, %v3738_v53 }
 0xedc   :  { %5128 = vmatpush1.bf16.msra.mxu0 %v6451_v26  ;;  %5160 = vmatpush1.bf16.msra.mxu1 %v6454_v52 }
 0xedd   :  { %5162 = vmatprep.subr.bf16.mxu0 %v5161_v54 }
 0xf92   :  { %v3448_v25 = vpop.f32.mrb[28].mxu0  ;;  %v3519_v43 = vpop.f32.mrb[44].mxu1 }
 0xf93   :  { %v5253_v21 = vadd.f32 %v3448_v25, %v6509_v57  ;;  %v3450_v23 = vpop.f32.mrb[29].mxu0  ;;  %v3521_v59 = vpop.f32.mrb[45].mxu1  ;;  %v5269_v27 = vadd.f32 %v3519_v43, %v6519_v2 }
 0xf94   :  { %v5254_v49 = vadd.f32 %v3450_v23, %v6513_v20  ;;  %v5270_v37 = vadd.f32 %v3521_v59, %v6523_v14 }
 0xf95   :  { %v3934_v28 = vmul.f32 -1.442695, %v5253_v21  ;;  %v3936_v42 = vmul.f32 -1.442695, %v5269_v27 }
 0xf96   :  { %v3935_v4 = vmul.f32 -1.442695, %v5254_v49 }
 0xf97   :  { %5555 = vpow2.f32 %v3934_v28 }
 0xf98   :  { %5557 = vpow2.f32 %v3935_v4 }
 0xf99   :  { %5559 = vtanh.f32 %v5270_v37 }
 0xf9a   :  { %5561 = vpow2.f32 %v3936_v42 }
 0xfa1   :  { %v5556_v22 = vpop.eup %5555 }
 0xfa2   :  { %v3537_v44 = vadd.f32 1.0, %v5556_v22  ;;  %v5558_v6 = vpop.eup %5557 }
 0xfa3   :  { %v3538_v15 = vadd.f32 1.0, %v5558_v6  ;;  %v5560_v19 = vpop.eup %5559 }
 0xfa4   :  { %5563 = vrcp.f32 %v3537_v44  ;;  %v5562_v41 = vpop.eup %5561 }
 0xfa5   :  { %5565 = vrcp.f32 %v3538_v15  ;;  %v3539_v58 = vadd.f32 1.0, %v5562_v41 }
 0xfa7   :  { %5567 = vrcp.f32 %v3539_v58 }
 0xfae   :  { %v5564_v5 = vpop.eup %5563 }
 0xfaf   :  { %v3548_v17 = vmul.f32 %v5564_v5, %v5560_v19  ;;  %v5566_v11 = vpop.eup %5565 }
 0xfb0   :  { %v3547_v12 = vmul.f32 %v5566_v11, %v6757_v8 }
 0xfb1   :  { %v5568_v13 = vpop.eup %5567 }
 0xfb2   :  { %v6801_v9 = vadd.f32 %v3548_v17, %v3547_v12 }
 0xfb4   :  { %5569 = vtanh.f32 %v6801_v9 }
 0xfbe   :  { %v5570_v26 = vpop.eup %5569 }
 0xfbf   :  { %v3551_v52 = vmul.f32 %v5570_v26, %v5568_v13 }
 0xfc1   :  { %3622 = vmatmul.mubr.f32.vlgmr.msra.gmra.mrb[30].mxu0 %v3551_v52  ;;  %3693 = vmatmul.mubr.f32.vlgmr.msra.gmra.mrb[46].mxu1 %v3551_v52 }
 0xfc2   :  { %5164 = vmatpush3.bf16.msra.mxu0 %v5161_v54  ;;  %3997 = vmatprep.mubr.f32.mxu0 %v6530_v29  ;;  %v5185_v29 = vpack.c.bf16 %v3749_v45, %v3748_v63 }
 0xfc3   :  { %5166 = vmatprep.subr.bf16.mxu0 %v5165_v39 }
 0xfc6   :  { %5168 = vmatpush3.bf16.msra.mxu0 %v5165_v39 }
 0xfc7   :  { %5170 = vmatprep.subr.bf16.mxu0 %v5169_v46 }
 0xfca   :  { %5172 = vmatpush3.bf16.msra.mxu0 %v5169_v46 }
 0xfcb   :  { %5174 = vmatprep.subr.bf16.mxu0 %v5173_v55 }
 0xfce   :  { %5176 = vmatpush3.bf16.msra.mxu0 %v5173_v55 }
 0xfcf   :  { %5178 = vmatprep.subr.bf16.mxu0 %v5177_v36 }
 0xfd2   :  { %5180 = vmatpush3.bf16.msra.mxu0 %v5177_v36 }
 0xfd3   :  { %5182 = vmatprep.subr.bf16.mxu0 %v5181_v16 }
 0xfd6   :  { %5184 = vmatpush3.bf16.msra.mxu0 %v5181_v16 }
 0xfd7   :  { %5186 = vmatprep.subr.bf16.mxu0 %v5185_v29 }
 0xfda   :  { %5188 = vmatpush3.bf16.msra.mxu0 %v5185_v29 }
 0xfdb   :  { %5190 = vmatprep.subr.bf16.mxu0 %v5189_v50 }
 0xfde   :  { %5192 = vmatpush3.bf16.msra.mxu0 %v5189_v50 }
 0xfe1   :  { %3998 = vmatmul.mubr.f32.vlgmr.msra.gmra.mrb[32].mxu0 %v6576_v34 }
 0xfe2   :  { %4000 = vmatprep.mubr.f32.mxu0 %v6622_v47 }
 0xfe5   :  { %4001 = vmatmul.mubr.f32.gmra.mrb[34].mxu0 %v6668_v30 }
 0xfe6   :  { %4003 = vmatprep.mubr.f32.mxu0 %v6714_v48 }
 0xfe9   :  { %4004 = vmatmul.mubr.f32.gmra.mrb[36].mxu0 %v6760_v33 }
 0xfea   :  { %4006 = vmatprep.mubr.f32.mxu0 %v3551_v52 }
0x1094   :  { %v3623_v24 = vpop.f32.mrb[30].mxu0  ;;  %v3694_v7 = vpop.f32.mrb[46].mxu1 }
0x1095   :  { %v5255_v8 = vadd.f32 %v3623_v24, %v6509_v57  ;;  %v3625_v35 = vpop.f32.mrb[31].mxu0  ;;  %v3696_v56 = vpop.f32.mrb[47].mxu1  ;;  %v5271_v34 = vadd.f32 %v3694_v7, %v6519_v2  ;;  %v3940_v2 = vld [vmem:[%s6838_s5] ss:$0 sm:$0xff]  ;;  %s5714_s5 = smov [#allocation12]  }
0x1096   :  { %v5256_v0 = vadd.f32 %v3625_v35, %v6513_v20  ;;  %v5272_v47 = vadd.f32 %v3696_v56, %v6523_v14  ;;  %s3877_s27 = sshll.u32 %s5714_s5, 4  ;;  %s3878_s27 = int_to_ptr.vmem [resolvable:$true] %s3877_s27 }
0x1097   :  { %v3937_v62 = vmul.f32 -1.442695, %v5255_v8  ;;  %v3939_v30 = vmul.f32 -1.442695, %v5271_v34  ;;  %s5675_s28 = scalar_lea.vmem %s3878_s27, 1024  ;;  %p5680_p5 = scmp.lt.s32.totalorder %s3878_s27, %s3878_s27 }
0x1098   :  { %v3938_v54 = vmul.f32 -1.442695, %v5256_v0  ;;  %p5676_p4 = scmp.ne.s32.totalorder %s3878_s27, %s5675_s28  ;;  %p5681_p6 = scmp.lt.s32.totalorder %s5675_s28, %s5675_s28 }
0x1099   :  { %5571 = vpow2.f32 %v3937_v62 }
0x109a   :  { %5573 = vpow2.f32 %v3938_v54  ;;  %p5682_p7 = por %p5681_p6, %p5680_p5 }
0x109b   :  { %5575 = vtanh.f32 %v5272_v47 }
0x109c   :  { %5577 = vpow2.f32 %v3939_v30  ;;  %p5683_p8 = pnand %p5682_p7, %p5676_p4 }
0x10a3   :  { %v5572_v48 = vpop.eup %5571 }
0x10a4   :  { %v3712_v33 = vadd.f32 1.0, %v5572_v48  ;;  %v5574_v25 = vpop.eup %5573 }
0x10a5   :  { %v3713_v57 = vadd.f32 1.0, %v5574_v25  ;;  %v5576_v43 = vpop.eup %5575 }
0x10a6   :  { %5579 = vrcp.f32 %v3712_v33  ;;  %v5578_v21 = vpop.eup %5577 }
0x10a7   :  { %5581 = vrcp.f32 %v3713_v57  ;;  %v3714_v49 = vadd.f32 1.0, %v5578_v21 }
0x10a9   :  { %5583 = vrcp.f32 %v3714_v49 }
0x10b0   :  { %v5580_v20 = vpop.eup %5579 }
0x10b1   :  { %v3723_v23 = vmul.f32 %v5580_v20, %v5576_v43  ;;  %v5582_v59 = vpop.eup %5581 }
0x10b2   :  { %v3722_v14 = vmul.f32 %v5582_v59, %v6801_v9 }
0x10b3   :  { %v5584_v11 = vpop.eup %5583 }
0x10b4   :  { %v3999_v28 = vpop.f32.mrb[32].mxu0  ;;  %v3724_v4 = vadd.f32 %v3723_v23, %v3722_v14 }
0x10b5   :  { %v3831_v27 = vadd.f32 %v3999_v28, %v3940_v2  ;;  %v3825_v37 = vpop.f32.mrb[33].mxu0 }
0x10b6   :  { %v3826_v42 = vadd.f32 %v3940_v2, %v3825_v37  ;;  %5585 = vtanh.f32 %v3724_v4 }
0x10b7   :  { %3865 = vst [vmem:[#allocation12 + $0x8] sm:$0xff] %v3831_v27 }
0x10b8   :  { %3864 = vst [vmem:[#allocation12] sm:$0xff] %v3826_v42  ;;  %v4002_v22 = vpop.f32.mrb[34].mxu0 }
0x10b9   :  { %v3841_v44 = vadd.f32 %v4002_v22, %v3940_v2  ;;  %v3835_v6 = vpop.f32.mrb[35].mxu0 }
0x10ba   :  { %v3836_v15 = vadd.f32 %v3940_v2, %v3835_v6 }
0x10bb   :  { %3867 = vst [vmem:[#allocation12 + $0x18] sm:$0xff] %v3841_v44 }
0x10bc   :  { %3866 = vst [vmem:[#allocation12 + $0x10] sm:$0xff] %v3836_v15  ;;  %v4005_v19 = vpop.f32.mrb[36].mxu0 }
0x10bd   :  { %v3851_v41 = vadd.f32 %v4005_v19, %v3940_v2  ;;  %v3845_v5 = vpop.f32.mrb[37].mxu0 }
0x10be   :  { %v3846_v17 = vadd.f32 %v3940_v2, %v3845_v5 }
0x10bf   :  { %3869 = vst [vmem:[#allocation12 + $0x28] sm:$0xff] %v3851_v41 }
0x10c0   :  { %3868 = vst [vmem:[#allocation12 + $0x20] sm:$0xff] %v3846_v17  ;;  %v5586_v58 = vpop.eup %5585 }
0x10c1   :  { %v3726_v12 = vmul.f32 %v5586_v58, %v5584_v11 }
0x10c3   :  { %4007 = vmatmul.mubr.f32.gmra.mrb[38].mxu0 %v3726_v12 }
0x1196   :  { %v4008_v9 = vpop.f32.mrb[38].mxu0 }
0x1197   :  { %v3861_v53 = vadd.f32 %v4008_v9, %v3940_v2  ;;  %v3855_v38 = vpop.f32.mrb[39].mxu0 }
0x1198   :  { %v3856_v13 = vadd.f32 %v3940_v2, %v3855_v38 }
0x1199   :  { %3871 = vst [vmem:[#allocation12 + $0x38] sm:$0xff] %v3861_v53 }
0x119a   :  { %3870 = vst [vmem:[#allocation12 + $0x30] sm:$0xff] %v3856_v13 }
0x119b   :  { %5686 = shalt.err (!%p5683_p8)
}
0x119c   :  { %s5687_s9 = scalar_lea.hbm %s6839_s6, 1024 }
0x119d   :  { %p5688_p9 = scmp.ne.s32.totalorder %s6839_s6, %s5687_s9  ;;  %p5691_p10 = scmp.lt.u32.totalorder %s5687_s9, %s6839_s6 }
0x119f   :  { %p5693_p11 = pnand %p5691_p10, %p5688_p9 }
0x11a1   :  { %5696 = shalt.err (!%p5693_p11)
}
0x11a2   :  { %3883 = dma.vmem_to_hbm [thread:$0]  %s3878_s27, 1024, %s6839_s6, [#allocation6], %s5709_s1, %s5709_s1, %s5710_s21  }
0x11a3   :  { %5703 = dma.done.wait [#allocation6], 1024  }
0x11a4   :  { %5704 = vsyncadd [#allocation6], 4294966272 }
0x11a5   :  { %3887 = vsyncpa [#allocation5], 1 }
0x11a6   :  { %3888 = vsyncpa [#allocation8], 1 }
0x11a7   :  { %3889 = vsyncpa [#allocation11], 1 }
0x11a8   :  { %3890 = vsyncpa [#allocation6], 1 }

</bundles_post_ra>
